<compile_context>
chip_gen: v7x
topology: tpu7x:2x2x1
jax: 0.10.0
libtpu: 0.0.40
codegen_flags: <defaults>
</compile_context>

<pallas_src>
import functools
import math

import numpy as np

import jax
import jax.numpy as jnp
from jax.experimental import pallas as pl
from jax.experimental.pallas import tpu as pltpu


_VMEM_LIMIT = 32 * 1024 * 1024


def _round_up(x, m):
    return (x + m - 1) // m * m


def _pick_key_tile(n, target=512):
    """Largest key-block size <= target that divides n and is a multiple of 8."""
    if n <= target:
        return n
    t = target - (target % 8)
    while t >= 8:
        if n % t == 0:
            return t
        t -= 8
    return n


# ------------------- fused attention pipeline (one kernel) -------------------

def _fused_attention_kernel(y_ref, spool_ref,
                            wy_ref, by_ref,
                            ws_ref, bs_ref,
                            wq_ref, wk_ref, wv_ref,
                            wc_ref, bc_ref,
                            o_ref,
                            y1_scr, q_scr, acc_scr,
                            *, scale, tk):
    """Sconv + Yconv + Q/K/V + softmax(dim=1) attention + output conv, key-block tiled.

    The dim=1 softmax normalizes over the query index, which is fully reduced inside
    every (N, tk) score block (the query axis is resident), so no online-softmax carry
    is needed; the attention output is accumulated in a VMEM scratch across the
    "arbitrary" key-block axis and the final 1x1+BN+ReLU is applied at the last step.
    """
    kb = pl.program_id(0)
    B, N, D = acc_scr.shape
    Yc = y_ref.shape[2]

    @pl.when(kb == 0)
    def _():
        # Yconv: 1x1 conv (BN folded) + ReLU; all batches folded into the M axis.
        yb = y_ref[...].astype(jnp.bfloat16).reshape(B * N, Yc)
        y1 = jnp.maximum(
            jnp.dot(yb, wy_ref[...], preferred_element_type=jnp.float32)
            + by_ref[...], 0.0)
        y1_16 = y1.astype(jnp.bfloat16)
        y1_scr[...] = y1_16.reshape(B, N, D)
        # Q projection with 1/sqrt(D) folded in (softmax is shift/scale consistent).
        q = jnp.dot(y1_16, wq_ref[...], preferred_element_type=jnp.float32) * scale
        q_scr[...] = q.astype(jnp.bfloat16).reshape(B, N, D)
        acc_scr[...] = jnp.zeros_like(acc_scr)

    # Sconv on this key block (1x1 + folded BN + ReLU) and V projection; never
    # round-trips through HBM.
    sb = spool_ref[...].reshape(B * tk, D)
    s1 = jnp.maximum(
        jnp.dot(sb, ws_ref[...], preferred_element_type=jnp.float32)
        + bs_ref[...], 0.0).astype(jnp.bfloat16)
    v_blk = jnp.dot(s1, wv_ref[...],
                    preferred_element_type=jnp.float32).astype(jnp.bfloat16)
    v_blk = v_blk.reshape(B, tk, D)

    # K for this key block, recomputed from the resident Y1 scratch (no K scratch,
    # no lane-offset slices).
    start = kb * tk
    if tk % 8 == 0:
        start = pl.multiple_of(start, tk)
    y1_blk = y1_scr[:, pl.ds(start, tk), :].reshape(B * tk, D)
    k_blk = jnp.dot(y1_blk, wk_ref[...],
                    preferred_element_type=jnp.float32).astype(jnp.bfloat16)
    k_blk = k_blk.reshape(B, tk, D)

    # Scores (B, N, tk): contraction over the last dims folds the K transpose into
    # the matmul (no XLU transpose). Scale already folded into Q.
    s = jnp.einsum('bqd,bkd->bqk', q_scr[...], k_blk,
                   preferred_element_type=jnp.float32)
    # softmax over the query axis (torch dim=1) -- complete within this key block.
    m = jnp.max(s, axis=1, keepdims=True)
    e = jnp.exp(s - m)
    inv = pl.reciprocal(jnp.sum(e, axis=1, keepdims=True), approx=True)  # EUP recip
    a16 = (e * inv).astype(jnp.bfloat16)
    acc_scr[...] += jnp.einsum('bqk,bkd->bqd', a16, v_blk,
                               preferred_element_type=jnp.float32)

    @pl.when(kb == pl.num_programs(0) - 1)
    def _():
        # conv: 1x1 (BN folded) + ReLU on the attention output (pre-upsample).
        z = jnp.dot(acc_scr[...].astype(jnp.bfloat16).reshape(B * N, D), wc_ref[...],
                    preferred_element_type=jnp.float32) + bc_ref[...]
        o_ref[...] = jnp.maximum(z, 0.0).reshape(B, N, D)


def _fold_bn(p):
    """Fold eval BatchNorm (scale/shift) into the preceding 1x1 conv weight/bias."""
    w_eff = (p["w"] * p["scale"][None, :]).astype(jnp.bfloat16)
    b_eff = (p["b"] * p["scale"] + p["shift"]).reshape(1, -1).astype(jnp.float32)
    return w_eff, b_eff


def fused_attention_pipeline(y_flat, spool_flat, params):
    B, N, Yc = y_flat.shape
    D = params["wq"].shape[0]
    tk = _pick_key_tile(N)
    nk = N // tk

    wy, by = _fold_bn(params["yconv"])
    ws, bs = _fold_bn(params["sconv"])
    wc, bc = _fold_bn(params["conv"])

    kern = functools.partial(_fused_attention_kernel,
                             scale=1.0 / math.sqrt(D), tk=tk)
    full2 = lambda kb: (0, 0)
    full3 = lambda kb: (0, 0, 0)
    return pl.pallas_call(
        kern,
        out_shape=jax.ShapeDtypeStruct((B, N, D), jnp.float32),
        grid=(nk,),
        in_specs=[
            pl.BlockSpec((B, N, Yc), full3),                   # Y (+pe), resident, f32
            pl.BlockSpec((B, tk, D), lambda kb: (0, kb, 0)),   # pooled S (+pe), bf16
            pl.BlockSpec((Yc, D), full2), pl.BlockSpec((1, D), full2),   # Yconv
            pl.BlockSpec((D, D), full2), pl.BlockSpec((1, D), full2),    # Sconv
            pl.BlockSpec((D, D), full2),                                  # Wq
            pl.BlockSpec((D, D), full2),                                  # Wk
            pl.BlockSpec((D, D), full2),                                  # Wv
            pl.BlockSpec((D, D), full2), pl.BlockSpec((1, D), full2),    # conv
        ],
        out_specs=pl.BlockSpec((B, N, D), full3),
        scratch_shapes=[
            pltpu.VMEM((B, N, D), jnp.bfloat16),   # Y1 (resident)
            pltpu.VMEM((B, N, D), jnp.bfloat16),   # Q, pre-scaled
            pltpu.VMEM((B, N, D), jnp.float32),    # attention accumulator
        ],
        compiler_params=pltpu.CompilerParams(
            dimension_semantics=("arbitrary",),
            vmem_limit_bytes=_VMEM_LIMIT),
    )(y_flat.astype(jnp.float32), spool_flat,
      wy, by, ws, bs,
      params["wq"].astype(jnp.bfloat16),
      params["wk"].astype(jnp.bfloat16),
      params["wv"].astype(jnp.bfloat16),
      wc, bc)


# ---------------- Yconv2: conv3x3(pad=1) + conv1x1 + BN + ReLU ----------------

def _yconv2_kernel(x_ref, w3_ref, b3_ref, w1_ref, b1_ref, o_ref, *, h, wp, cmid):
    """3x3 conv (padding=1) + 1x1 conv (BN folded) + ReLU, fused in one pass.

    The padded image arrives flattened to (Hp*wp, cin); each of the 9 taps is then a
    contiguous (h*wp, cin) sublane slice (wp is a multiple of 8), so the conv becomes
    9 shifted matmuls accumulated in f32 (no im2col HBM expansion). Columns w >= W of
    each output row contain wrap-around garbage and are sliced off by the wrapper.
    """
    m = h * wp
    acc = jnp.zeros((m, cmid), jnp.float32)
    for t in range(9):
        di, dj = divmod(t, 3)
        off = di * wp + dj
        acc = acc + jnp.dot(x_ref[off:off + m, :], w3_ref[t],
                            preferred_element_type=jnp.float32)
    mid = (acc + b3_ref[...]).astype(jnp.bfloat16)       # 3x3 bias; no ReLU in between
    y = jnp.dot(mid, w1_ref[...], preferred_element_type=jnp.float32) + b1_ref[...]
    o_ref[...] = jnp.maximum(y, 0.0)


def yconv2_fused(x_img, w3, b3, p1x1):
    """Upsampled Y -> Conv3x3(pad=1) -> Conv1x1 -> BN -> ReLU as one Pallas kernel."""
    B, H, W, cin = x_img.shape
    cmid = w3.shape[3]
    w1_eff, b1_eff = _fold_bn(p1x1)
    cout = p1x1["w"].shape[1]
    wp = _round_up(W + 2, 8)                 # sublane-aligned padded row width
    # 1 row top / 2 rows bottom (keeps the last tap's flat slice in bounds),
    # 1 col left / (wp - W - 1) cols right (alignment padding, zeros).
    xpad = jnp.pad(x_img, ((0, 0), (1, 2), (1, wp - W - 1), (0, 0)))
    mp = (H + 3) * wp
    xflat = xpad.reshape(B, mp, cin)
    w3f = w3.reshape(9, cin, cmid).astype(jnp.bfloat16)
    kern = functools.partial(_yconv2_kernel, h=H, wp=wp, cmid=cmid)
    out = pl.pallas_call(
        kern,
        out_shape=jax.ShapeDtypeStruct((B, H * wp, cout), jnp.float32),
        grid=(B,),
        in_specs=[
            pl.BlockSpec((None, mp, cin), lambda b: (b, 0, 0)),
            pl.BlockSpec((9, cin, cmid), lambda b: (0, 0, 0)),
            pl.BlockSpec((1, cmid), lambda b: (0, 0)),
            pl.BlockSpec((cmid, cout), lambda b: (0, 0)),
            pl.BlockSpec((1, cout), lambda b: (0, 0)),
        ],
        out_specs=pl.BlockSpec((None, H * wp, cout), lambda b: (b, 0, 0)),
        compiler_params=pltpu.CompilerParams(
            dimension_semantics=("parallel",),
            vmem_limit_bytes=_VMEM_LIMIT),
    )(xflat, w3f, b3.reshape(1, cmid).astype(jnp.float32), w1_eff, b1_eff)
    return out.reshape(B, H, wp, cout)[:, :, :W, :]


# --------------------------------- JAX glue ----------------------------------

def positional_encoding_2d(batch, h, w, orig_ch):
    """PositionalEncoding2D / PositionalEncodingPermute2D, produced channels-last."""
    ch = int(np.ceil(orig_ch / 2))
    inv_freq = 1.0 / (10000.0 ** (np.arange(0, ch, 2, dtype=np.float32) / ch))
    pos_x = np.arange(h, dtype=np.float32)
    pos_y = np.arange(w, dtype=np.float32)
    sin_x = np.einsum("i,j->ij", pos_x, inv_freq)
    sin_y = np.einsum("i,j->ij", pos_y, inv_freq)
    emb_x = np.concatenate([np.sin(sin_x), np.cos(sin_x)], axis=-1)     # (h, ch)
    emb_y = np.concatenate([np.sin(sin_y), np.cos(sin_y)], axis=-1)     # (w, ch)
    emb = np.zeros((h, w, 2 * ch), dtype=np.float32)
    emb[:, :, :ch] = emb_x[:, None, :]
    emb[:, :, ch:2 * ch] = emb_y[None, :, :]
    pe = np.broadcast_to(emb[None, :, :, :orig_ch], (batch, h, w, orig_ch))
    return jnp.asarray(pe)


def maxpool2x2(x):  # (B, H, W, C), kernel 2 stride 2
    B, H, W, C = x.shape
    return x.reshape(B, H // 2, 2, W // 2, 2, C).max(axis=(2, 4))


def upsample_bilinear_x2_align_corners(x):  # (B, H, W, C) -> (B, 2H, 2W, C)
    B, H, W, C = x.shape
    Ho, Wo = 2 * H, 2 * W

    def src(n_in, n_out):
        if n_in == 1:
            return jnp.zeros((n_out,), jnp.float32)
        return jnp.arange(n_out, dtype=jnp.float32) * (n_in - 1) / (n_out - 1)

    ys, xs = src(H, Ho), src(W, Wo)
    y0 = jnp.floor(ys).astype(jnp.int32)
    y1 = jnp.minimum(y0 + 1, H - 1)
    wy = ys - y0.astype(jnp.float32)
    x0 = jnp.floor(xs).astype(jnp.int32)
    x1 = jnp.minimum(x0 + 1, W - 1)
    wx = xs - x0.astype(jnp.float32)

    rows = (x[:, y0, :, :] * (1.0 - wy)[None, :, None, None]
            + x[:, y1, :, :] * wy[None, :, None, None])
    out = (rows[:, :, x0, :] * (1.0 - wx)[None, None, :, None]
           + rows[:, :, x1, :] * wx[None, None, :, None])
    return out


# ----------------------------- module forward ------------------------------

def multi_head_cross_attention(Y_nchw, S_nchw, params):
    Y = jnp.transpose(Y_nchw, (0, 2, 3, 1)).astype(jnp.float32)   # (B, Yh, Yw, Yc)
    S = jnp.transpose(S_nchw, (0, 2, 3, 1)).astype(jnp.float32)   # (B, Sh, Sw, Sc)
    B, Sh, Sw, Sc = S.shape
    _, Yh, Yw, Yc = Y.shape
    N = Yh * Yw

    # PE adds stay in plain JAX: S+pe and Y+pe are each consumed by two branches, so
    # they are materialized once (XLA fuses the add with the NCHW->NHWC transpose).
    S = S + positional_encoding_2d(B, Sh, Sw, Sc)
    Y = Y + positional_encoding_2d(B, Yh, Yw, Yc)

    # MaxPool2d(2) in JAX; bf16 cast fuses into the pool reduction so the pooled
    # tensor hits HBM once as bf16 and is read once by the fused kernel.
    spool = maxpool2x2(S).astype(jnp.bfloat16).reshape(B, N, Sc)
    y_flat = Y.reshape(B, N, Yc)   # stays f32: the same buffer also feeds the upsample

    # ONE Pallas kernel: Sconv + Yconv + Q/K/V + softmax(dim=1) attention + conv.
    z_small = fused_attention_pipeline(y_flat, spool, params)     # (B, N, Sc)
    z_img = z_small.reshape(B, Yh, Yw, Sc)

    # Yconv2: Upsample(x2, bilinear, align_corners) -> Conv3x3 -> Conv1x1 -> BN -> ReLU
    Yup = upsample_bilinear_x2_align_corners(Y).astype(jnp.bfloat16)
    Y2 = yconv2_fused(Yup, params["yconv2_w3"], params["yconv2_b3"],
                      params["yconv2_1x1"])                        # (B, Sh, Sw, Sc)

    # Upsample(x2) of the conv'd attention output; Z*S stays in plain JAX so XLA fuses
    # the multiply into the upsample gathers (no extra HBM round trip).
    Z = upsample_bilinear_x2_align_corners(z_img)
    Z = Z * S
    Z = jnp.concatenate([Z, Y2], axis=-1)                          # (B, Sh, Sw, 2*Sc)
    return jnp.transpose(Z, (0, 3, 1, 2))                          # back to NCHW


# ------------------------------ parameters ---------------------------------

def _uniform(key, shape, bound):
    return jax.random.uniform(key, shape, jnp.float32, -bound, bound)


def make_params(key, channelY, channelS):
    eps = 1e-5
    bn_scale = jnp.full((channelS,), 1.0 / math.sqrt(1.0 + eps), jnp.float32)  # gamma=1, var=1
    bn_shift = jnp.zeros((channelS,), jnp.float32)                             # beta=0, mean=0
    keys = jax.random.split(key, 11)

    def conv_p(kw, kb, cin, cout):
        bound = 1.0 / math.sqrt(cin)
        return {"w": _uniform(kw, (cin, cout), bound),
                "b": _uniform(kb, (cout,), bound),
                "scale": bn_scale, "shift": bn_shift}

    p = {}
    p["sconv"] = conv_p(keys[0], keys[1], channelS, channelS)
    p["yconv"] = conv_p(keys[2], keys[3], channelY, channelS)
    p["conv"] = conv_p(keys[4], keys[5], channelS, channelS)
    b3 = 1.0 / math.sqrt(channelY * 9)
    p["yconv2_w3"] = _uniform(keys[6], (3, 3, channelY, channelY), b3)
    p["yconv2_b3"] = _uniform(keys[7], (channelY,), b3)
    p["yconv2_1x1"] = conv_p(keys[8], keys[9], channelY, channelS)
    bd = 1.0 / math.sqrt(channelS)
    kq, kk, kv = jax.random.split(keys[10], 3)
    p["wq"] = _uniform(kq, (channelS, channelS), bd)   # MultiHeadDense: x @ W (no transpose)
    p["wk"] = _uniform(kk, (channelS, channelS), bd)
    p["wv"] = _uniform(kv, (channelS, channelS), bd)
    return p


# --------------------------------- main -------------------------------------

if __name__ == "__main__":
    channelY, channelS = 8, 4
    B, Yh, Yw = 2, 8, 8
    Sh, Sw = 2 * Yh, 2 * Yw          # S is the high-res skip (MaxPool(2) maps it to Y's size)

    key = jax.random.PRNGKey(0)
    ky, ks, kp = jax.random.split(key, 3)
    Y = jax.random.normal(ky, (B, channelY, Yh, Yw), jnp.float32)   # NCHW, like PyTorch
    S = jax.random.normal(ks, (B, channelS, Sh, Sw), jnp.float32)   # NCHW, like PyTorch
    params = make_params(kp, channelY, channelS)

    out = jax.jit(multi_head_cross_attention)(Y, S, params)
    out = jax.block_until_ready(out)

    assert out.shape == (B, 2 * channelS, Sh, Sw), out.shape
    assert bool(jnp.all(jnp.isfinite(out)))
    print("KERNEL_OK")
</pallas_src>

<mosaic_0001>
module attributes {stable_mosaic.version = 11 : i64} {
  func.func @_fused_attention_kernel(%arg0: i32, %arg1: memref<2x64x8xf32, #tpu.memory_space<vmem>>, %arg2: memref<2x64x4xbf16, #tpu.memory_space<vmem>>, %arg3: memref<8x4xbf16, #tpu.memory_space<vmem>>, %arg4: memref<1x4xf32, #tpu.memory_space<vmem>>, %arg5: memref<4x4xbf16, #tpu.memory_space<vmem>>, %arg6: memref<1x4xf32, #tpu.memory_space<vmem>>, %arg7: memref<4x4xbf16, #tpu.memory_space<vmem>>, %arg8: memref<4x4xbf16, #tpu.memory_space<vmem>>, %arg9: memref<4x4xbf16, #tpu.memory_space<vmem>>, %arg10: memref<4x4xbf16, #tpu.memory_space<vmem>>, %arg11: memref<1x4xf32, #tpu.memory_space<vmem>>, %arg12: memref<2x64x4xf32, #tpu.memory_space<vmem>>, %arg13: memref<2x64x4xbf16, #tpu.memory_space<vmem>>, %arg14: memref<2x64x4xbf16, #tpu.memory_space<vmem>>, %arg15: memref<2x64x4xf32, #tpu.memory_space<vmem>>) attributes {dimension_semantics = [#tpu.dimension_semantics<arbitrary>], iteration_bounds = array<i64: 1>, scalar_prefetch = 0 : i64, scratch_operands = 3 : i64, tpu.core_type = #tpu.core_type<tc>, window_params = [{pipeline_mode = #tpu.pipeline_mode<synchronous>, transform_indices = @transform_0, window_bounds = array<i64: 2, 64, 8>}, {transform_indices = @transform_1, window_bounds = array<i64: 2, 64, 4>}, {pipeline_mode = #tpu.pipeline_mode<synchronous>, transform_indices = @transform_2, window_bounds = array<i64: 8, 4>}, {pipeline_mode = #tpu.pipeline_mode<synchronous>, transform_indices = @transform_3, window_bounds = array<i64: 1, 4>}, {pipeline_mode = #tpu.pipeline_mode<synchronous>, transform_indices = @transform_4, window_bounds = array<i64: 4, 4>}, {pipeline_mode = #tpu.pipeline_mode<synchronous>, transform_indices = @transform_5, window_bounds = array<i64: 1, 4>}, {pipeline_mode = #tpu.pipeline_mode<synchronous>, transform_indices = @transform_6, window_bounds = array<i64: 4, 4>}, {pipeline_mode = #tpu.pipeline_mode<synchronous>, transform_indices = @transform_7, window_bounds = array<i64: 4, 4>}, {pipeline_mode = #tpu.pipeline_mode<synchronous>, transform_indices = @transform_8, window_bounds = array<i64: 4, 4>}, {pipeline_mode = #tpu.pipeline_mode<synchronous>, transform_indices = @transform_9, window_bounds = array<i64: 4, 4>}, {pipeline_mode = #tpu.pipeline_mode<synchronous>, transform_indices = @transform_10, window_bounds = array<i64: 1, 4>}, {pipeline_mode = #tpu.pipeline_mode<synchronous>, transform_indices = @transform_11, window_bounds = array<i64: 2, 64, 4>}]} {
    %c0_i32 = arith.constant 0 : i32
    %0 = arith.cmpi eq, %arg0, %c0_i32 : i32
    %1 = arith.extui %0 : i1 to i32
    %c0_i32_0 = arith.constant 0 : i32
    %2 = arith.cmpi ne, %1, %c0_i32_0 : i32
    scf.if %2 {
      %c0_31 = arith.constant 0 : index
      %c0_32 = arith.constant 0 : index
      %c0_33 = arith.constant 0 : index
      %46 = vector.load %arg1[%c0_31, %c0_32, %c0_33] : memref<2x64x8xf32, #tpu.memory_space<vmem>>, vector<2x64x8xf32>
      %47 = arith.truncf %46 : vector<2x64x8xf32> to vector<2x64x8xbf16>
      %48 = vector.shape_cast %47 : vector<2x64x8xbf16> to vector<128x8xbf16>
      %c0_34 = arith.constant 0 : index
      %c0_35 = arith.constant 0 : index
      %49 = vector.load %arg3[%c0_34, %c0_35] : memref<8x4xbf16, #tpu.memory_space<vmem>>, vector<8x4xbf16>
      %cst_36 = arith.constant dense<0.000000e+00> : vector<128x4xf32>
      %50 = tpu.matmul %48, %49, %cst_36 {dimension_numbers = #tpu.dot_dimension_numbers<[1], [0], [0], [1], [0, 0, 1, 1], [], []>} : vector<128x8xbf16>, vector<8x4xbf16>, vector<128x4xf32> -> vector<128x4xf32>
      %c0_37 = arith.constant 0 : index
      %c0_38 = arith.constant 0 : index
      %51 = vector.load %arg4[%c0_37, %c0_38] : memref<1x4xf32, #tpu.memory_space<vmem>>, vector<1x4xf32>
      %52 = vector.broadcast %51 : vector<1x4xf32> to vector<128x4xf32>
      %53 = arith.addf %50, %52 : vector<128x4xf32>
      %cst_39 = arith.constant 0.000000e+00 : f32
      %54 = vector.broadcast %cst_39 : f32 to vector<128x4xf32>
      %55 = arith.maximumf %53, %54 : vector<128x4xf32>
      %56 = arith.truncf %55 : vector<128x4xf32> to vector<128x4xbf16>
      %57 = vector.shape_cast %56 : vector<128x4xbf16> to vector<2x64x4xbf16>
      %c0_40 = arith.constant 0 : index
      %c0_41 = arith.constant 0 : index
      %c0_42 = arith.constant 0 : index
      %58 = vector.load %arg13[%c0_40, %c0_41, %c0_42] : memref<2x64x4xbf16, #tpu.memory_space<vmem>>, vector<2x64x4xbf16>
      tpu.vector_store %arg13[%c0_40, %c0_41, %c0_42], %57 {strides = array<i32>} : memref<2x64x4xbf16, #tpu.memory_space<vmem>>, vector<2x64x4xbf16>,
      %c0_43 = arith.constant 0 : index
      %c0_44 = arith.constant 0 : index
      %59 = vector.load %arg7[%c0_43, %c0_44] : memref<4x4xbf16, #tpu.memory_space<vmem>>, vector<4x4xbf16>
      %cst_45 = arith.constant dense<0.000000e+00> : vector<128x4xf32>
      %60 = tpu.matmul %56, %59, %cst_45 {dimension_numbers = #tpu.dot_dimension_numbers<[1], [0], [0], [1], [0, 0, 1, 1], [], []>} : vector<128x4xbf16>, vector<4x4xbf16>, vector<128x4xf32> -> vector<128x4xf32>
      %cst_46 = arith.constant 5.000000e-01 : f32
      %61 = vector.broadcast %cst_46 : f32 to vector<128x4xf32>
      %62 = arith.mulf %60, %61 : vector<128x4xf32>
      %63 = arith.truncf %62 : vector<128x4xf32> to vector<128x4xbf16>
      %64 = vector.shape_cast %63 : vector<128x4xbf16> to vector<2x64x4xbf16>
      %c0_47 = arith.constant 0 : index
      %c0_48 = arith.constant 0 : index
      %c0_49 = arith.constant 0 : index
      %65 = vector.load %arg14[%c0_47, %c0_48, %c0_49] : memref<2x64x4xbf16, #tpu.memory_space<vmem>>, vector<2x64x4xbf16>
      tpu.vector_store %arg14[%c0_47, %c0_48, %c0_49], %64 {strides = array<i32>} : memref<2x64x4xbf16, #tpu.memory_space<vmem>>, vector<2x64x4xbf16>,
      %cst_50 = arith.constant 0.000000e+00 : f32
      %66 = vector.broadcast %cst_50 : f32 to vector<2x64x4xf32>
      %c0_51 = arith.constant 0 : index
      %c0_52 = arith.constant 0 : index
      %c0_53 = arith.constant 0 : index
      %67 = vector.load %arg15[%c0_51, %c0_52, %c0_53] : memref<2x64x4xf32, #tpu.memory_space<vmem>>, vector<2x64x4xf32>
      tpu.vector_store %arg15[%c0_51, %c0_52, %c0_53], %66 {strides = array<i32>} : memref<2x64x4xf32, #tpu.memory_space<vmem>>, vector<2x64x4xf32>,
    } else {
    }
    %c0 = arith.constant 0 : index
    %c0_1 = arith.constant 0 : index
    %c0_2 = arith.constant 0 : index
    %3 = vector.load %arg2[%c0, %c0_1, %c0_2] : memref<2x64x4xbf16, #tpu.memory_space<vmem>>, vector<2x64x4xbf16>
    %4 = vector.shape_cast %3 : vector<2x64x4xbf16> to vector<128x4xbf16>
    %c0_3 = arith.constant 0 : index
    %c0_4 = arith.constant 0 : index
    %5 = vector.load %arg5[%c0_3, %c0_4] : memref<4x4xbf16, #tpu.memory_space<vmem>>, vector<4x4xbf16>
    %cst = arith.constant dense<0.000000e+00> : vector<128x4xf32>
    %6 = tpu.matmul %4, %5, %cst {dimension_numbers = #tpu.dot_dimension_numbers<[1], [0], [0], [1], [0, 0, 1, 1], [], []>} : vector<128x4xbf16>, vector<4x4xbf16>, vector<128x4xf32> -> vector<128x4xf32>
    %c0_5 = arith.constant 0 : index
    %c0_6 = arith.constant 0 : index
    %7 = vector.load %arg6[%c0_5, %c0_6] : memref<1x4xf32, #tpu.memory_space<vmem>>, vector<1x4xf32>
    %8 = vector.broadcast %7 : vector<1x4xf32> to vector<128x4xf32>
    %9 = arith.addf %6, %8 : vector<128x4xf32>
    %cst_7 = arith.constant 0.000000e+00 : f32
    %10 = vector.broadcast %cst_7 : f32 to vector<128x4xf32>
    %11 = arith.maximumf %9, %10 : vector<128x4xf32>
    %12 = arith.truncf %11 : vector<128x4xf32> to vector<128x4xbf16>
    %c0_8 = arith.constant 0 : index
    %c0_9 = arith.constant 0 : index
    %13 = vector.load %arg9[%c0_8, %c0_9] : memref<4x4xbf16, #tpu.memory_space<vmem>>, vector<4x4xbf16>
    %cst_10 = arith.constant dense<0.000000e+00> : vector<128x4xf32>
    %14 = tpu.matmul %12, %13, %cst_10 {dimension_numbers = #tpu.dot_dimension_numbers<[1], [0], [0], [1], [0, 0, 1, 1], [], []>} : vector<128x4xbf16>, vector<4x4xbf16>, vector<128x4xf32> -> vector<128x4xf32>
    %15 = arith.truncf %14 : vector<128x4xf32> to vector<128x4xbf16>
    %16 = vector.shape_cast %15 : vector<128x4xbf16> to vector<2x64x4xbf16>
    %c64_i32 = arith.constant 64 : i32
    %17 = arith.muli %arg0, %c64_i32 : i32
    %18 = tpu.assume_multiple %17, 64 : i32
    %c0_11 = arith.constant 0 : index
    %19 = arith.index_cast %18 : i32 to index
    %c0_12 = arith.constant 0 : index
    %20 = vector.load %arg13[%c0_11, %19, %c0_12] : memref<2x64x4xbf16, #tpu.memory_space<vmem>>, vector<2x64x4xbf16>
    %21 = vector.shape_cast %20 : vector<2x64x4xbf16> to vector<128x4xbf16>
    %c0_13 = arith.constant 0 : index
    %c0_14 = arith.constant 0 : index
    %22 = vector.load %arg8[%c0_13, %c0_14] : memref<4x4xbf16, #tpu.memory_space<vmem>>, vector<4x4xbf16>
    %cst_15 = arith.constant dense<0.000000e+00> : vector<128x4xf32>
    %23 = tpu.matmul %21, %22, %cst_15 {dimension_numbers = #tpu.dot_dimension_numbers<[1], [0], [0], [1], [0, 0, 1, 1], [], []>} : vector<128x4xbf16>, vector<4x4xbf16>, vector<128x4xf32> -> vector<128x4xf32>
    %24 = arith.truncf %23 : vector<128x4xf32> to vector<128x4xbf16>
    %25 = vector.shape_cast %24 : vector<128x4xbf16> to vector<2x64x4xbf16>
    %c0_16 = arith.constant 0 : index
    %c0_17 = arith.constant 0 : index
    %c0_18 = arith.constant 0 : index
    %26 = vector.load %arg14[%c0_16, %c0_17, %c0_18] : memref<2x64x4xbf16, #tpu.memory_space<vmem>>, vector<2x64x4xbf16>
    "tpu.trace_start"() <{level = 10 : i32, message = "bqd,bkd->bqk"}> : () -> ()
    %cst_19 = arith.constant dense<0.000000e+00> : vector<2x64x64xf32>
    %27 = tpu.matmul %26, %25, %cst_19 {dimension_numbers = #tpu.dot_dimension_numbers<[2], [2], [1], [1], [0, 0, 0, 1, 1, 1], [0], [0]>} : vector<2x64x4xbf16>, vector<2x64x4xbf16>, vector<2x64x64xf32> -> vector<2x64x64xf32>
    "tpu.trace_stop"() : () -> ()
    %cst_20 = arith.constant dense<0xFF800000> : vector<2x64xf32>
    %28 = vector.multi_reduction <maximumf>, %27, %cst_20 [1] : vector<2x64x64xf32> to vector<2x64xf32>
    %29 = vector.shape_cast %28 : vector<2x64xf32> to vector<2x1x64xf32>
    %30 = vector.broadcast %29 : vector<2x1x64xf32> to vector<2x64x64xf32>
    %31 = arith.subf %27, %30 : vector<2x64x64xf32>
    %32 = math.exp %31 : vector<2x64x64xf32>
    %cst_21 = arith.constant dense<0.000000e+00> : vector<2x64xf32>
    %33 = vector.multi_reduction <add>, %32, %cst_21 [1] : vector<2x64x64xf32> to vector<2x64xf32>
    %34 = vector.shape_cast %33 : vector<2x64xf32> to vector<2x1x64xf32>
    %35 = tpu.reciprocal %34 {approx = true} : vector<2x1x64xf32> -> vector<2x1x64xf32>
    %36 = vector.broadcast %35 : vector<2x1x64xf32> to vector<2x64x64xf32>
    %37 = arith.mulf %32, %36 : vector<2x64x64xf32>
    %38 = arith.truncf %37 : vector<2x64x64xf32> to vector<2x64x64xbf16>
    %c0_22 = arith.constant 0 : index
    %c0_23 = arith.constant 0 : index
    %c0_24 = arith.constant 0 : index
    %39 = vector.load %arg15[%c0_22, %c0_23, %c0_24] : memref<2x64x4xf32, #tpu.memory_space<vmem>>, vector<2x64x4xf32>
    "tpu.trace_start"() <{level = 10 : i32, message = "bqk,bkd->bqd"}> : () -> ()
    %cst_25 = arith.constant dense<0.000000e+00> : vector<2x64x4xf32>
    %40 = tpu.matmul %38, %16, %cst_25 {dimension_numbers = #tpu.dot_dimension_numbers<[2], [1], [1], [2], [0, 0, 0, 1, 1, 2], [0], [0]>} : vector<2x64x64xbf16>, vector<2x64x4xbf16>, vector<2x64x4xf32> -> vector<2x64x4xf32>
    "tpu.trace_stop"() : () -> ()
    %41 = arith.addf %39, %40 : vector<2x64x4xf32>
    %c0_26 = arith.constant 0 : index
    %c0_27 = arith.constant 0 : index
    %c0_28 = arith.constant 0 : index
    %42 = vector.load %arg15[%c0_26, %c0_27, %c0_28] : memref<2x64x4xf32, #tpu.memory_space<vmem>>, vector<2x64x4xf32>
    tpu.vector_store %arg15[%c0_26, %c0_27, %c0_28], %41 {strides = array<i32>} : memref<2x64x4xf32, #tpu.memory_space<vmem>>, vector<2x64x4xf32>,
    %c0_i32_29 = arith.constant 0 : i32
    %43 = arith.cmpi eq, %arg0, %c0_i32_29 : i32
    %44 = arith.extui %43 : i1 to i32
    %c0_i32_30 = arith.constant 0 : i32
    %45 = arith.cmpi ne, %44, %c0_i32_30 : i32
    scf.if %45 {
      %c0_31 = arith.constant 0 : index
      %c0_32 = arith.constant 0 : index
      %c0_33 = arith.constant 0 : index
      %46 = vector.load %arg15[%c0_31, %c0_32, %c0_33] : memref<2x64x4xf32, #tpu.memory_space<vmem>>, vector<2x64x4xf32>
      %47 = arith.truncf %46 : vector<2x64x4xf32> to vector<2x64x4xbf16>
      %48 = vector.shape_cast %47 : vector<2x64x4xbf16> to vector<128x4xbf16>
      %c0_34 = arith.constant 0 : index
      %c0_35 = arith.constant 0 : index
      %49 = vector.load %arg10[%c0_34, %c0_35] : memref<4x4xbf16, #tpu.memory_space<vmem>>, vector<4x4xbf16>
      %cst_36 = arith.constant dense<0.000000e+00> : vector<128x4xf32>
      %50 = tpu.matmul %48, %49, %cst_36 {dimension_numbers = #tpu.dot_dimension_numbers<[1], [0], [0], [1], [0, 0, 1, 1], [], []>} : vector<128x4xbf16>, vector<4x4xbf16>, vector<128x4xf32> -> vector<128x4xf32>
      %c0_37 = arith.constant 0 : index
      %c0_38 = arith.constant 0 : index
      %51 = vector.load %arg11[%c0_37, %c0_38] : memref<1x4xf32, #tpu.memory_space<vmem>>, vector<1x4xf32>
      %52 = vector.broadcast %51 : vector<1x4xf32> to vector<128x4xf32>
      %53 = arith.addf %50, %52 : vector<128x4xf32>
      %cst_39 = arith.constant 0.000000e+00 : f32
      %54 = vector.broadcast %cst_39 : f32 to vector<128x4xf32>
      %55 = arith.maximumf %53, %54 : vector<128x4xf32>
      %56 = vector.shape_cast %55 : vector<128x4xf32> to vector<2x64x4xf32>
      %c0_40 = arith.constant 0 : index
      %c0_41 = arith.constant 0 : index
      %c0_42 = arith.constant 0 : index
      %57 = vector.load %arg12[%c0_40, %c0_41, %c0_42] : memref<2x64x4xf32, #tpu.memory_space<vmem>>, vector<2x64x4xf32>
      tpu.vector_store %arg12[%c0_40, %c0_41, %c0_42], %56 {strides = array<i32>} : memref<2x64x4xf32, #tpu.memory_space<vmem>>, vector<2x64x4xf32>,
    } else {
    }
    return
  }
  func.func @transform_0(%arg0: i32) -> (i32, i32, i32) {
    %c0_i32 = arith.constant 0 : i32
    %c0_i32_0 = arith.constant 0 : i32
    %c0_i32_1 = arith.constant 0 : i32
    %c0_i32_2 = arith.constant 0 : i32
    return %c0_i32, %c0_i32_0, %c0_i32_1 : i32, i32, i32
  }
  func.func @transform_1(%arg0: i32) -> (i32, i32, i32) {
    %c0_i32 = arith.constant 0 : i32
    %c0_i32_0 = arith.constant 0 : i32
    %c0_i32_1 = arith.constant 0 : i32
    return %c0_i32, %arg0, %c0_i32_0 : i32, i32, i32
  }
  func.func @transform_2(%arg0: i32) -> (i32, i32) {
    %c0_i32 = arith.constant 0 : i32
    %c0_i32_0 = arith.constant 0 : i32
    %c0_i32_1 = arith.constant 0 : i32
    return %c0_i32, %c0_i32_0 : i32, i32
  }
  func.func @transform_3(%arg0: i32) -> (i32, i32) {
    %c0_i32 = arith.constant 0 : i32
    %c0_i32_0 = arith.constant 0 : i32
    %c0_i32_1 = arith.constant 0 : i32
    return %c0_i32, %c0_i32_0 : i32, i32
  }
  func.func @transform_4(%arg0: i32) -> (i32, i32) {
    %c0_i32 = arith.constant 0 : i32
    %c0_i32_0 = arith.constant 0 : i32
    %c0_i32_1 = arith.constant 0 : i32
    return %c0_i32, %c0_i32_0 : i32, i32
  }
  func.func @transform_5(%arg0: i32) -> (i32, i32) {
    %c0_i32 = arith.constant 0 : i32
    %c0_i32_0 = arith.constant 0 : i32
    %c0_i32_1 = arith.constant 0 : i32
    return %c0_i32, %c0_i32_0 : i32, i32
  }
  func.func @transform_6(%arg0: i32) -> (i32, i32) {
    %c0_i32 = arith.constant 0 : i32
    %c0_i32_0 = arith.constant 0 : i32
    %c0_i32_1 = arith.constant 0 : i32
    return %c0_i32, %c0_i32_0 : i32, i32
  }
  func.func @transform_7(%arg0: i32) -> (i32, i32) {
    %c0_i32 = arith.constant 0 : i32
    %c0_i32_0 = arith.constant 0 : i32
    %c0_i32_1 = arith.constant 0 : i32
    return %c0_i32, %c0_i32_0 : i32, i32
  }
  func.func @transform_8(%arg0: i32) -> (i32, i32) {
    %c0_i32 = arith.constant 0 : i32
    %c0_i32_0 = arith.constant 0 : i32
    %c0_i32_1 = arith.constant 0 : i32
    return %c0_i32, %c0_i32_0 : i32, i32
  }
  func.func @transform_9(%arg0: i32) -> (i32, i32) {
    %c0_i32 = arith.constant 0 : i32
    %c0_i32_0 = arith.constant 0 : i32
    %c0_i32_1 = arith.constant 0 : i32
    return %c0_i32, %c0_i32_0 : i32, i32
  }
  func.func @transform_10(%arg0: i32) -> (i32, i32) {
    %c0_i32 = arith.constant 0 : i32
    %c0_i32_0 = arith.constant 0 : i32
    %c0_i32_1 = arith.constant 0 : i32
    return %c0_i32, %c0_i32_0 : i32, i32
  }
  func.func @transform_11(%arg0: i32) -> (i32, i32, i32) {
    %c0_i32 = arith.constant 0 : i32
    %c0_i32_0 = arith.constant 0 : i32
    %c0_i32_1 = arith.constant 0 : i32
    %c0_i32_2 = arith.constant 0 : i32
    return %c0_i32, %c0_i32_0, %c0_i32_1 : i32, i32, i32
  }
}

module attributes {stable_mosaic.version = 11 : i64} {
  func.func @_yconv2_kernel(%arg0: i32, %arg1: memref<1x456x8xbf16, #tpu.memory_space<vmem>>, %arg2: memref<9x8x8xbf16, #tpu.memory_space<vmem>>, %arg3: memref<1x8xf32, #tpu.memory_space<vmem>>, %arg4: memref<8x4xbf16, #tpu.memory_space<vmem>>, %arg5: memref<1x4xf32, #tpu.memory_space<vmem>>, %arg6: memref<1x384x4xf32, #tpu.memory_space<vmem>>) attributes {dimension_semantics = [#tpu.dimension_semantics<parallel>], iteration_bounds = array<i64: 2>, scalar_prefetch = 0 : i64, scratch_operands = 0 : i64, tpu.core_type = #tpu.core_type<tc>, window_params = [{transform_indices = @transform_0, window_bounds = array<i64: 1, 456, 8>}, {pipeline_mode = #tpu.pipeline_mode<synchronous>, transform_indices = @transform_1, window_bounds = array<i64: 9, 8, 8>}, {pipeline_mode = #tpu.pipeline_mode<synchronous>, transform_indices = @transform_2, window_bounds = array<i64: 1, 8>}, {pipeline_mode = #tpu.pipeline_mode<synchronous>, transform_indices = @transform_3, window_bounds = array<i64: 8, 4>}, {pipeline_mode = #tpu.pipeline_mode<synchronous>, transform_indices = @transform_4, window_bounds = array<i64: 1, 4>}, {transform_indices = @transform_5, window_bounds = array<i64: 1, 384, 4>}]} {
    %cst = arith.constant 0.000000e+00 : f32
    %0 = vector.broadcast %cst : f32 to vector<384x8xf32>
    %c0 = arith.constant 0 : index
    %c0_0 = arith.constant 0 : index
    %c0_1 = arith.constant 0 : index
    %1 = vector.load %arg1[%c0, %c0_0, %c0_1] : memref<1x456x8xbf16, #tpu.memory_space<vmem>>, vector<1x384x8xbf16>
    %2 = vector.shape_cast %1 : vector<1x384x8xbf16> to vector<384x8xbf16>
    %c0_2 = arith.constant 0 : index
    %c0_3 = arith.constant 0 : index
    %c0_4 = arith.constant 0 : index
    %3 = vector.load %arg2[%c0_2, %c0_3, %c0_4] : memref<9x8x8xbf16, #tpu.memory_space<vmem>>, vector<1x8x8xbf16>
    %4 = vector.shape_cast %3 : vector<1x8x8xbf16> to vector<8x8xbf16>
    %cst_5 = arith.constant dense<0.000000e+00> : vector<384x8xf32>
    %5 = tpu.matmul %2, %4, %cst_5 {dimension_numbers = #tpu.dot_dimension_numbers<[1], [0], [0], [1], [0, 0, 1, 1], [], []>} : vector<384x8xbf16>, vector<8x8xbf16>, vector<384x8xf32> -> vector<384x8xf32>
    %6 = arith.addf %0, %5 : vector<384x8xf32>
    %c0_6 = arith.constant 0 : index
    %c1 = arith.constant 1 : index
    %c0_7 = arith.constant 0 : index
    %7 = vector.load %arg1[%c0_6, %c1, %c0_7] : memref<1x456x8xbf16, #tpu.memory_space<vmem>>, vector<1x384x8xbf16>
    %8 = vector.shape_cast %7 : vector<1x384x8xbf16> to vector<384x8xbf16>
    %c1_8 = arith.constant 1 : index
    %c0_9 = arith.constant 0 : index
    %c0_10 = arith.constant 0 : index
    %9 = vector.load %arg2[%c1_8, %c0_9, %c0_10] : memref<9x8x8xbf16, #tpu.memory_space<vmem>>, vector<1x8x8xbf16>
    %10 = vector.shape_cast %9 : vector<1x8x8xbf16> to vector<8x8xbf16>
    %cst_11 = arith.constant dense<0.000000e+00> : vector<384x8xf32>
    %11 = tpu.matmul %8, %10, %cst_11 {dimension_numbers = #tpu.dot_dimension_numbers<[1], [0], [0], [1], [0, 0, 1, 1], [], []>} : vector<384x8xbf16>, vector<8x8xbf16>, vector<384x8xf32> -> vector<384x8xf32>
    %12 = arith.addf %6, %11 : vector<384x8xf32>
    %c0_12 = arith.constant 0 : index
    %c2 = arith.constant 2 : index
    %c0_13 = arith.constant 0 : index
    %13 = vector.load %arg1[%c0_12, %c2, %c0_13] : memref<1x456x8xbf16, #tpu.memory_space<vmem>>, vector<1x384x8xbf16>
    %14 = vector.shape_cast %13 : vector<1x384x8xbf16> to vector<384x8xbf16>
    %c2_14 = arith.constant 2 : index
    %c0_15 = arith.constant 0 : index
    %c0_16 = arith.constant 0 : index
    %15 = vector.load %arg2[%c2_14, %c0_15, %c0_16] : memref<9x8x8xbf16, #tpu.memory_space<vmem>>, vector<1x8x8xbf16>
    %16 = vector.shape_cast %15 : vector<1x8x8xbf16> to vector<8x8xbf16>
    %cst_17 = arith.constant dense<0.000000e+00> : vector<384x8xf32>
    %17 = tpu.matmul %14, %16, %cst_17 {dimension_numbers = #tpu.dot_dimension_numbers<[1], [0], [0], [1], [0, 0, 1, 1], [], []>} : vector<384x8xbf16>, vector<8x8xbf16>, vector<384x8xf32> -> vector<384x8xf32>
    %18 = arith.addf %12, %17 : vector<384x8xf32>
    %c0_18 = arith.constant 0 : index
    %c24 = arith.constant 24 : index
    %c0_19 = arith.constant 0 : index
    %19 = vector.load %arg1[%c0_18, %c24, %c0_19] : memref<1x456x8xbf16, #tpu.memory_space<vmem>>, vector<1x384x8xbf16>
    %20 = vector.shape_cast %19 : vector<1x384x8xbf16> to vector<384x8xbf16>
    %c3 = arith.constant 3 : index
    %c0_20 = arith.constant 0 : index
    %c0_21 = arith.constant 0 : index
    %21 = vector.load %arg2[%c3, %c0_20, %c0_21] : memref<9x8x8xbf16, #tpu.memory_space<vmem>>, vector<1x8x8xbf16>
    %22 = vector.shape_cast %21 : vector<1x8x8xbf16> to vector<8x8xbf16>
    %cst_22 = arith.constant dense<0.000000e+00> : vector<384x8xf32>
    %23 = tpu.matmul %20, %22, %cst_22 {dimension_numbers = #tpu.dot_dimension_numbers<[1], [0], [0], [1], [0, 0, 1, 1], [], []>} : vector<384x8xbf16>, vector<8x8xbf16>, vector<384x8xf32> -> vector<384x8xf32>
    %24 = arith.addf %18, %23 : vector<384x8xf32>
    %c0_23 = arith.constant 0 : index
    %c25 = arith.constant 25 : index
    %c0_24 = arith.constant 0 : index
    %25 = vector.load %arg1[%c0_23, %c25, %c0_24] : memref<1x456x8xbf16, #tpu.memory_space<vmem>>, vector<1x384x8xbf16>
    %26 = vector.shape_cast %25 : vector<1x384x8xbf16> to vector<384x8xbf16>
    %c4 = arith.constant 4 : index
    %c0_25 = arith.constant 0 : index
    %c0_26 = arith.constant 0 : index
    %27 = vector.load %arg2[%c4, %c0_25, %c0_26] : memref<9x8x8xbf16, #tpu.memory_space<vmem>>, vector<1x8x8xbf16>
    %28 = vector.shape_cast %27 : vector<1x8x8xbf16> to vector<8x8xbf16>
    %cst_27 = arith.constant dense<0.000000e+00> : vector<384x8xf32>
    %29 = tpu.matmul %26, %28, %cst_27 {dimension_numbers = #tpu.dot_dimension_numbers<[1], [0], [0], [1], [0, 0, 1, 1], [], []>} : vector<384x8xbf16>, vector<8x8xbf16>, vector<384x8xf32> -> vector<384x8xf32>
    %30 = arith.addf %24, %29 : vector<384x8xf32>
    %c0_28 = arith.constant 0 : index
    %c26 = arith.constant 26 : index
    %c0_29 = arith.constant 0 : index
    %31 = vector.load %arg1[%c0_28, %c26, %c0_29] : memref<1x456x8xbf16, #tpu.memory_space<vmem>>, vector<1x384x8xbf16>
    %32 = vector.shape_cast %31 : vector<1x384x8xbf16> to vector<384x8xbf16>
    %c5 = arith.constant 5 : index
    %c0_30 = arith.constant 0 : index
    %c0_31 = arith.constant 0 : index
    %33 = vector.load %arg2[%c5, %c0_30, %c0_31] : memref<9x8x8xbf16, #tpu.memory_space<vmem>>, vector<1x8x8xbf16>
    %34 = vector.shape_cast %33 : vector<1x8x8xbf16> to vector<8x8xbf16>
    %cst_32 = arith.constant dense<0.000000e+00> : vector<384x8xf32>
    %35 = tpu.matmul %32, %34, %cst_32 {dimension_numbers = #tpu.dot_dimension_numbers<[1], [0], [0], [1], [0, 0, 1, 1], [], []>} : vector<384x8xbf16>, vector<8x8xbf16>, vector<384x8xf32> -> vector<384x8xf32>
    %36 = arith.addf %30, %35 : vector<384x8xf32>
    %c0_33 = arith.constant 0 : index
    %c48 = arith.constant 48 : index
    %c0_34 = arith.constant 0 : index
    %37 = vector.load %arg1[%c0_33, %c48, %c0_34] : memref<1x456x8xbf16, #tpu.memory_space<vmem>>, vector<1x384x8xbf16>
    %38 = vector.shape_cast %37 : vector<1x384x8xbf16> to vector<384x8xbf16>
    %c6 = arith.constant 6 : index
    %c0_35 = arith.constant 0 : index
    %c0_36 = arith.constant 0 : index
    %39 = vector.load %arg2[%c6, %c0_35, %c0_36] : memref<9x8x8xbf16, #tpu.memory_space<vmem>>, vector<1x8x8xbf16>
    %40 = vector.shape_cast %39 : vector<1x8x8xbf16> to vector<8x8xbf16>
    %cst_37 = arith.constant dense<0.000000e+00> : vector<384x8xf32>
    %41 = tpu.matmul %38, %40, %cst_37 {dimension_numbers = #tpu.dot_dimension_numbers<[1], [0], [0], [1], [0, 0, 1, 1], [], []>} : vector<384x8xbf16>, vector<8x8xbf16>, vector<384x8xf32> -> vector<384x8xf32>
    %42 = arith.addf %36, %41 : vector<384x8xf32>
    %c0_38 = arith.constant 0 : index
    %c49 = arith.constant 49 : index
    %c0_39 = arith.constant 0 : index
    %43 = vector.load %arg1[%c0_38, %c49, %c0_39] : memref<1x456x8xbf16, #tpu.memory_space<vmem>>, vector<1x384x8xbf16>
    %44 = vector.shape_cast %43 : vector<1x384x8xbf16> to vector<384x8xbf16>
    %c7 = arith.constant 7 : index
    %c0_40 = arith.constant 0 : index
    %c0_41 = arith.constant 0 : index
    %45 = vector.load %arg2[%c7, %c0_40, %c0_41] : memref<9x8x8xbf16, #tpu.memory_space<vmem>>, vector<1x8x8xbf16>
    %46 = vector.shape_cast %45 : vector<1x8x8xbf16> to vector<8x8xbf16>
    %cst_42 = arith.constant dense<0.000000e+00> : vector<384x8xf32>
    %47 = tpu.matmul %44, %46, %cst_42 {dimension_numbers = #tpu.dot_dimension_numbers<[1], [0], [0], [1], [0, 0, 1, 1], [], []>} : vector<384x8xbf16>, vector<8x8xbf16>, vector<384x8xf32> -> vector<384x8xf32>
    %48 = arith.addf %42, %47 : vector<384x8xf32>
    %c0_43 = arith.constant 0 : index
    %c50 = arith.constant 50 : index
    %c0_44 = arith.constant 0 : index
    %49 = vector.load %arg1[%c0_43, %c50, %c0_44] : memref<1x456x8xbf16, #tpu.memory_space<vmem>>, vector<1x384x8xbf16>
    %50 = vector.shape_cast %49 : vector<1x384x8xbf16> to vector<384x8xbf16>
    %c8 = arith.constant 8 : index
    %c0_45 = arith.constant 0 : index
    %c0_46 = arith.constant 0 : index
    %51 = vector.load %arg2[%c8, %c0_45, %c0_46] : memref<9x8x8xbf16, #tpu.memory_space<vmem>>, vector<1x8x8xbf16>
    %52 = vector.shape_cast %51 : vector<1x8x8xbf16> to vector<8x8xbf16>
    %cst_47 = arith.constant dense<0.000000e+00> : vector<384x8xf32>
    %53 = tpu.matmul %50, %52, %cst_47 {dimension_numbers = #tpu.dot_dimension_numbers<[1], [0], [0], [1], [0, 0, 1, 1], [], []>} : vector<384x8xbf16>, vector<8x8xbf16>, vector<384x8xf32> -> vector<384x8xf32>
    %54 = arith.addf %48, %53 : vector<384x8xf32>
    %c0_48 = arith.constant 0 : index
    %c0_49 = arith.constant 0 : index
    %55 = vector.load %arg3[%c0_48, %c0_49] : memref<1x8xf32, #tpu.memory_space<vmem>>, vector<1x8xf32>
    %56 = vector.broadcast %55 : vector<1x8xf32> to vector<384x8xf32>
    %57 = arith.addf %54, %56 : vector<384x8xf32>
    %58 = arith.truncf %57 : vector<384x8xf32> to vector<384x8xbf16>
    %c0_50 = arith.constant 0 : index
    %c0_51 = arith.constant 0 : index
    %59 = vector.load %arg4[%c0_50, %c0_51] : memref<8x4xbf16, #tpu.memory_space<vmem>>, vector<8x4xbf16>
    %cst_52 = arith.constant dense<0.000000e+00> : vector<384x4xf32>
    %60 = tpu.matmul %58, %59, %cst_52 {dimension_numbers = #tpu.dot_dimension_numbers<[1], [0], [0], [1], [0, 0, 1, 1], [], []>} : vector<384x8xbf16>, vector<8x4xbf16>, vector<384x4xf32> -> vector<384x4xf32>
    %c0_53 = arith.constant 0 : index
    %c0_54 = arith.constant 0 : index
    %61 = vector.load %arg5[%c0_53, %c0_54] : memref<1x4xf32, #tpu.memory_space<vmem>>, vector<1x4xf32>
    %62 = vector.broadcast %61 : vector<1x4xf32> to vector<384x4xf32>
    %63 = arith.addf %60, %62 : vector<384x4xf32>
    %cst_55 = arith.constant 0.000000e+00 : f32
    %64 = vector.broadcast %cst_55 : f32 to vector<384x4xf32>
    %65 = arith.maximumf %63, %64 : vector<384x4xf32>
    %c0_56 = arith.constant 0 : index
    %c0_57 = arith.constant 0 : index
    %c0_58 = arith.constant 0 : index
    %66 = vector.load %arg6[%c0_56, %c0_57, %c0_58] : memref<1x384x4xf32, #tpu.memory_space<vmem>>, vector<1x384x4xf32>
    %67 = vector.shape_cast %66 : vector<1x384x4xf32> to vector<384x4xf32>
    %68 = vector.shape_cast %65 : vector<384x4xf32> to vector<1x384x4xf32>
    tpu.vector_store %arg6[%c0_56, %c0_57, %c0_58], %68 {strides = array<i32>} : memref<1x384x4xf32, #tpu.memory_space<vmem>>, vector<1x384x4xf32>,
    return
  }
  func.func @transform_0(%arg0: i32) -> (i32, i32, i32) {
    %c0_i32 = arith.constant 0 : i32
    %c0_i32_0 = arith.constant 0 : i32
    %c0_i32_1 = arith.constant 0 : i32
    return %arg0, %c0_i32, %c0_i32_0 : i32, i32, i32
  }
  func.func @transform_1(%arg0: i32) -> (i32, i32, i32) {
    %c0_i32 = arith.constant 0 : i32
    %c0_i32_0 = arith.constant 0 : i32
    %c0_i32_1 = arith.constant 0 : i32
    %c0_i32_2 = arith.constant 0 : i32
    return %c0_i32, %c0_i32_0, %c0_i32_1 : i32, i32, i32
  }
  func.func @transform_2(%arg0: i32) -> (i32, i32) {
    %c0_i32 = arith.constant 0 : i32
    %c0_i32_0 = arith.constant 0 : i32
    %c0_i32_1 = arith.constant 0 : i32
    return %c0_i32, %c0_i32_0 : i32, i32
  }
  func.func @transform_3(%arg0: i32) -> (i32, i32) {
    %c0_i32 = arith.constant 0 : i32
    %c0_i32_0 = arith.constant 0 : i32
    %c0_i32_1 = arith.constant 0 : i32
    return %c0_i32, %c0_i32_0 : i32, i32
  }
  func.func @transform_4(%arg0: i32) -> (i32, i32) {
    %c0_i32 = arith.constant 0 : i32
    %c0_i32_0 = arith.constant 0 : i32
    %c0_i32_1 = arith.constant 0 : i32
    return %c0_i32, %c0_i32_0 : i32, i32
  }
  func.func @transform_5(%arg0: i32) -> (i32, i32, i32) {
    %c0_i32 = arith.constant 0 : i32
    %c0_i32_0 = arith.constant 0 : i32
    %c0_i32_1 = arith.constant 0 : i32
    return %arg0, %c0_i32, %c0_i32_0 : i32, i32, i32
  }
}

</mosaic_0001>

<bundles_post_ra>
// kernel: multi_head_cross_attention.2
= control target key start
LH: loop header
LB: loop body
LE: loop exit
PB: predicated region body
PF: predicated region fallthrough
CT: control target
= control target key end

     0   :  { %vm100_vm0 = vcmask 1043456   ;;  %vm75_vm1 = vcmask 64512   ;;  %vm259_vm2 = vcmask 1041408   ;;  %vm225_vm3 = vcmask 31744   ;;  %s2536_s2 = inlined_call_operand.vmem [shape: bf16[8,4], index: 2, kind: input, shape index: {}]   ;;  %s2537_s0 = inlined_call_operand.vmem [shape: f32[2,64,8], index: 0, kind: input, shape index: {}]   ;;  %s2538_s4 = inlined_call_operand.vmem [shape: bf16[4,4], index: 4, kind: input, shape index: {}]   ;;  %s2539_s1 = inlined_call_operand.vmem [shape: bf16[2,64,4], index: 1, kind: input, shape index: {}]   ;;  %s2540_s7 = inlined_call_operand.vmem [shape: bf16[4,4], index: 7, kind: input, shape index: {}]   ;;  %s2541_s6 = inlined_call_operand.vmem [shape: bf16[4,4], index: 6, kind: input, shape index: {}]   ;;  %s2542_s8 = inlined_call_operand.vmem [shape: bf16[4,4], index: 8, kind: input, shape index: {}]   ;;  %s2543_s3 = inlined_call_operand.vmem [shape: f32[1,4], index: 3, kind: input, shape index: {}]   ;;  %s2544_s5 = inlined_call_operand.vmem [shape: f32[1,4], index: 5, kind: input, shape index: {}]   ;;  %s2545_s9 = inlined_call_operand.vmem [shape: bf16[4,4], index: 9, kind: input, shape index: {}]   ;;  %s2546_s10 = inlined_call_operand.vmem [shape: f32[1,4], index: 10, kind: input, shape index: {}]   ;;  %s2547_s11 = inlined_call_operand.vmem [shape: f32[2,64,4], index: 11, kind: output, shape index: {}]  }
   0x1   :  { %v67_v0 = vld [vmem:[%s2536_s2] sm:$0xf]  ;;  %v44_v2 = vld [vmem:[%s2537_s0 + $0x8] sm:$0xff]  ;;  %v45_v5 = vld [vmem:[%s2537_s0 + $0x10] sm:$0xff]  ;;  %vm1087_vm4 = vcmask 523264  }
   0x2   :  { %v43_v1 = vld [vmem:[%s2537_s0] sm:$0xff]  ;;  %1980 = vmatprep.subr.msk.bf16.mxu0 %vm100_vm0, %v67_v0  ;;  %v102_v3 = vsel %vm100_vm0, %v67_v0, 0  ;;  %v46_v6 = vld [vmem:[%s2537_s0 + $0x18] sm:$0xff]  ;;  %1981 = vmatprep.subr.msk.bf16.mxu1 %vm100_vm0, %v67_v0  ;;  %v48_v9 = vld [vmem:[%s2537_s0 + $0x28] sm:$0xff] }
   0x3   :  { %v59_v4 = vpack.c.bf16 %v44_v2, %v43_v1  ;;  %v47_v7 = vld [vmem:[%s2537_s0 + $0x20] sm:$0xff]  ;;  %1807 = vmatpush3.bf16.msra.mxu0 %v102_v3  ;;  %v60_v8 = vpack.c.bf16 %v46_v6, %v45_v5  ;;  %1979 = vmatpush3.bf16.msra.mxu1 %v102_v3  ;;  %v52_v12 = vld [vmem:[%s2537_s0 + $0x48] sm:$0xff]  ;;  %v53_v13 = vld [vmem:[%s2537_s0 + $0x50] sm:$0xff] }
   0x4   :  { %v61_v10 = vpack.c.bf16 %v48_v9, %v47_v7  ;;  %v51_v11 = vld [vmem:[%s2537_s0 + $0x40] sm:$0xff]  ;;  %v54_v15 = vld [vmem:[%s2537_s0 + $0x58] sm:$0xff]  ;;  %v56_v17 = vld [vmem:[%s2537_s0 + $0x68] sm:$0xff] }
   0x5   :  { %1808 = vmatprep.mubr.msk.bf16.mxu0 %vm75_vm1, %v59_v4  ;;  %v63_v14 = vpack.c.bf16 %v52_v12, %v51_v11  ;;  %v55_v16 = vld [vmem:[%s2537_s0 + $0x60] sm:$0xff]  ;;  %v49_v18 = vld [vmem:[%s2537_s0 + $0x30] sm:$0xff]  ;;  %v64_v19 = vpack.c.bf16 %v54_v15, %v53_v13  ;;  %v50_v22 = vld [vmem:[%s2537_s0 + $0x38] sm:$0xff] }
   0x6   :  { %1809 = vmatmul.mubr.msk.bf16.vlgmr.msra.gmra.mrb[0].mxu0 %vm75_vm1, %v60_v8  ;;  %v65_v20 = vpack.c.bf16 %v56_v17, %v55_v16  ;;  %v424_v21 = vld [vmem:[%s2538_s4] sm:$0x3]  ;;  %v57_v24 = vld [vmem:[%s2537_s0 + $0x70] sm:$0xff]  ;;  %v58_v25 = vld [vmem:[%s2537_s0 + $0x78] sm:$0xff]  ;;  %v62_v26 = vpack.c.bf16 %v50_v22, %v49_v18 }
   0x7   :  { %1812 = vmatprep.mubr.msk.bf16.mxu0 %vm75_vm1, %v61_v10  ;;  %1816 = vmatprep.mubr.msk.bf16.mxu1 %vm75_vm1, %v63_v14  ;;  %v499_v23 = vsel %vm259_vm2, %v424_v21, 0  ;;  %v1996_v27 = vld [vmem:[%s2539_s1] sm:$0xff]   ;;  %v66_v29 = vpack.c.bf16 %v58_v25, %v57_v24  ;;  %v1997_v30 = vld [vmem:[%s2539_s1 + $0x8] sm:$0xff]   ;;  %v1998_v31 = vld [vmem:[%s2539_s1 + $0x10] sm:$0xff]  }
   0x8   :  { %1817 = vmatmul.mubr.msk.bf16.vlgmr.msra.gmra.mrb[0].mxu1 %vm75_vm1, %v64_v19  ;;  %1983 = vmatprep.subr.msk.bf16.mxu0 %vm259_vm2, %v424_v21  ;;  %v768_v28 = vld [vmem:[%s2540_s7] sm:$0x3]  ;;  %v1999_v33 = vld [vmem:[%s2539_s1 + $0x18] sm:$0xff]   ;;  %v2001_v35 = vld [vmem:[%s2539_s1 + $0x28] sm:$0xff]  }
   0x9   :  { %1820 = vmatprep.mubr.msk.bf16.mxu1 %vm75_vm1, %v65_v20  ;;  %1843 = vmatpush3.bf16.msra.mxu0 %v499_v23  ;;  %v794_v32 = vsel %vm259_vm2, %v768_v28, 0  ;;  %v2000_v34 = vld [vmem:[%s2539_s1 + $0x20] sm:$0xff]   ;;  %v2002_v36 = vld [vmem:[%s2539_s1 + $0x30] sm:$0xff]   ;;  %v2003_v37 = vld [vmem:[%s2539_s1 + $0x38] sm:$0xff]  }
   0xa   :  { %1985 = vmatprep.subr.msk.bf16.mxu0 %vm259_vm2, %v768_v28  ;;  %v234_v38 = vld [vmem:[%s2541_s6] sm:$0x3] }
   0xb   :  { %1982 = vmatprep.subr.msk.bf16.mxu1 %vm259_vm2, %v234_v38  ;;  %v261_v39 = vsel %vm259_vm2, %v234_v38, 0  ;;  %v622_v40 = vld [vmem:[%s2542_s8] sm:$0x3] }
   0xc   :  { %1825 = vmatpush3.bf16.msra.mxu1 %v261_v39  ;;  %v1645_v41 = vld [vmem:[%s2543_s3] ss:$0 sm:$0xff]  ;;  %v648_v8 = vsel %vm259_vm2, %v622_v40, 0 }
   0xd   :  { %1984 = vmatprep.subr.msk.bf16.mxu1 %vm259_vm2, %v622_v40 }
   0xe   :  { %1813 = vmatmul.mubr.msk.bf16.gmra.mrb[4].mxu0 %vm75_vm1, %v62_v26 }
   0xf   :  { %1844 = vmatprep.mubr.msk.bf16.mxu0 %vm225_vm3, %v1996_v27 }
  0x10   :  { %1821 = vmatmul.mubr.msk.bf16.gmra.mrb[4].mxu1 %vm75_vm1, %v66_v29  ;;  %v2227_v29 = vld [vmem:[%s2544_s5] ss:$0 sm:$0xff] }
  0x16   :  { %1845 = vmatmul.mubr.msk.bf16.vlgmr.msra.gmra.mrb[8].mxu0 %vm225_vm3, %v1997_v30 }
  0x17   :  { %1848 = vmatprep.mubr.msk.bf16.mxu0 %vm225_vm3, %v1998_v31  ;;  %1879 = vmatpush3.bf16.msra.mxu0 %v794_v32 }
  0x1e   :  { %1849 = vmatmul.mubr.msk.bf16.gmra.mrb[12].mxu0 %vm225_vm3, %v1999_v33 }
  0x1f   :  { %1852 = vmatprep.mubr.msk.bf16.mxu0 %vm225_vm3, %v2000_v34 }
  0x26   :  { %1853 = vmatmul.mubr.msk.bf16.gmra.mrb[16].mxu0 %vm225_vm3, %v2001_v35 }
  0x27   :  { %1856 = vmatprep.mubr.msk.bf16.mxu0 %vm225_vm3, %v2002_v36 }
  0x2e   :  { %1857 = vmatmul.mubr.msk.bf16.gmra.mrb[20].mxu0 %vm225_vm3, %v2003_v37 }
  0xd9   :  { %v1810_v42 = vpop.f32.mrb[0].mxu0 }
  0xda   :  { %v147_v43 = vadd.f32 %v1810_v42, %v1645_v41  ;;  %v138_v44 = vpop.f32.mrb[1].mxu0 }
  0xdb   :  { %v139_v45 = vadd.f32 %v1645_v41, %v138_v44  ;;  %v1811_v46 = vpop.f32.mrb[2].mxu0  ;;  %v1818_v47 = vpop.f32.mrb[0].mxu1 }
  0xdc   :  { %v150_v48 = vadd.f32 %v1811_v46, %v1645_v41  ;;  %v141_v49 = vpop.f32.mrb[3].mxu0  ;;  %v179_v50 = vadd.f32 %v1818_v47, %v1645_v41  ;;  %v170_v51 = vpop.f32.mrb[1].mxu1  ;;  %v203_v55 = vmax.f32 %v147_v43, 0.0 }
  0xdd   :  { %v142_v52 = vadd.f32 %v1645_v41, %v141_v49  ;;  %v171_v53 = vadd.f32 %v1645_v41, %v170_v51  ;;  %v1819_v54 = vpop.f32.mrb[2].mxu1  ;;  %v201_v60 = vmax.f32 %v139_v45, 0.0 }
  0xde   :  { %v204_v56 = vmax.f32 %v150_v48, 0.0  ;;  %v211_v57 = vmax.f32 %v179_v50, 0.0  ;;  %v182_v58 = vadd.f32 %v1819_v54, %v1645_v41  ;;  %v173_v59 = vpop.f32.mrb[3].mxu1 }
  0xdf   :  { %v202_v61 = vmax.f32 %v142_v52, 0.0  ;;  %v209_v62 = vmax.f32 %v171_v53, 0.0  ;;  %v174_v63 = vadd.f32 %v1645_v41, %v173_v59 }
  0xe0   :  { %v218_v0 = vpack.c.bf16 %v204_v56, %v203_v55  ;;  %v212_v1 = vmax.f32 %v182_v58, 0.0 }
  0xe1   :  { %v217_v2 = vpack.c.bf16 %v202_v61, %v201_v60  ;;  %v1814_v3 = vpop.f32.mrb[4].mxu0  ;;  %v210_v4 = vmax.f32 %v174_v63, 0.0 }
  0xe2   :  { %227 = vst.msk [vmem:[#allocation2 + $0x8] sm:$0xff] %vm225_vm3, %v218_v0  ;;  %v163_v5 = vadd.f32 %v1814_v3, %v1645_v41  ;;  %v154_v6 = vpop.f32.mrb[5].mxu0  ;;  %v2215_v7 = vpack.c.bf16 %v212_v1, %v211_v57 }
  0xe3   :  { %226 = vst.msk [vmem:[#allocation2] sm:$0xff] %vm225_vm3, %v217_v2  ;;  %v155_v9 = vadd.f32 %v1645_v41, %v154_v6  ;;  %v1815_v10 = vpop.f32.mrb[6].mxu0  ;;  %1826 = vmatprep.mubr.msk.bf16.mxu1 %vm225_vm3, %v217_v2  ;;  %v221_v11 = vpack.c.bf16 %v210_v4, %v209_v62  ;;  %v1822_v12 = vpop.f32.mrb[4].mxu1 }
  0xe4   :  { %v166_v13 = vadd.f32 %v1815_v10, %v1645_v41  ;;  %v157_v14 = vpop.f32.mrb[7].mxu0  ;;  %1827 = vmatmul.mubr.msk.bf16.vlgmr.msra.gmra.mrb[8].mxu1 %vm225_vm3, %v218_v0  ;;  %231 = vst.msk [vmem:[#allocation2 + $0x28] sm:$0xff] %vm225_vm3, %v2215_v7  ;;  %v195_v15 = vadd.f32 %v1822_v12, %v1645_v41  ;;  %v186_v16 = vpop.f32.mrb[5].mxu1  ;;  %v207_v20 = vmax.f32 %v163_v5, 0.0 }
  0xe5   :  { %v158_v17 = vadd.f32 %v1645_v41, %v157_v14  ;;  %230 = vst.msk [vmem:[#allocation2 + $0x20] sm:$0xff] %vm225_vm3, %v221_v11  ;;  %v187_v18 = vadd.f32 %v1645_v41, %v186_v16  ;;  %v1823_v19 = vpop.f32.mrb[6].mxu1  ;;  %1861 = vmatpush3.bf16.msra.mxu1 %v648_v8  ;;  %v205_v25 = vmax.f32 %v155_v9, 0.0 }
  0xe6   :  { %v208_v21 = vmax.f32 %v166_v13, 0.0  ;;  %v215_v22 = vmax.f32 %v195_v15, 0.0  ;;  %v198_v23 = vadd.f32 %v1823_v19, %v1645_v41  ;;  %v189_v24 = vpop.f32.mrb[7].mxu1 }
  0xe7   :  { %v206_v26 = vmax.f32 %v158_v17, 0.0  ;;  %v213_v27 = vmax.f32 %v187_v18, 0.0  ;;  %v190_v28 = vadd.f32 %v1645_v41, %v189_v24 }
  0xe8   :  { %v220_v30 = vpack.c.bf16 %v208_v21, %v207_v20  ;;  %v216_v31 = vmax.f32 %v198_v23, 0.0 }
  0xe9   :  { %v219_v32 = vpack.c.bf16 %v206_v26, %v205_v25  ;;  %v214_v33 = vmax.f32 %v190_v28, 0.0  ;;  %v1846_v34 = vpop.f32.mrb[8].mxu0  ;;  %v761_v39 = vld [vmem:[#allocation2 + $0x8] sm:$0xff] }
  0xea   :  { %229 = vst.msk [vmem:[#allocation2 + $0x18] sm:$0xff] %vm225_vm3, %v220_v30  ;;  %v760_v35 = vld [vmem:[#allocation2] sm:$0xff]  ;;  %v224_v36 = vpack.c.bf16 %v216_v31, %v215_v22  ;;  %v544_v37 = vadd.f32 %v1846_v34, %v2227_v29  ;;  %v535_v38 = vpop.f32.mrb[9].mxu0 }
  0xeb   :  { %228 = vst.msk [vmem:[#allocation2 + $0x10] sm:$0xff] %vm225_vm3, %v219_v32  ;;  %1830 = vmatprep.mubr.msk.bf16.mxu1 %vm225_vm3, %v219_v32  ;;  %1880 = vmatprep.mubr.msk.bf16.mxu0 %vm225_vm3, %v760_v35  ;;  %v223_v40 = vpack.c.bf16 %v214_v33, %v213_v27  ;;  %v536_v41 = vadd.f32 %v2227_v29, %v535_v38  ;;  %v1847_v42 = vpop.f32.mrb[10].mxu0  ;;  %v765_v9 = vld [vmem:[#allocation2 + $0x28] sm:$0xff] }
  0xec   :  { %1831 = vmatmul.mubr.msk.bf16.gmra.mrb[12].mxu1 %vm225_vm3, %v220_v30  ;;  %1881 = vmatmul.mubr.msk.bf16.vlgmr.msra.gmra.mrb[24].mxu0 %vm225_vm3, %v761_v39  ;;  %233 = vst.msk [vmem:[#allocation2 + $0x38] sm:$0xff] %vm225_vm3, %v224_v36  ;;  %v600_v43 = vmax.f32 %v544_v37, 0.0  ;;  %v547_v44 = vadd.f32 %v1847_v42, %v2227_v29  ;;  %v538_v45 = vpop.f32.mrb[11].mxu0  ;;  %v764_v54 = vld [vmem:[#allocation2 + $0x20] sm:$0xff] }
  0xed   :  { %1834 = vmatprep.mubr.msk.bf16.mxu1 %vm225_vm3, %v221_v11  ;;  %232 = vst.msk [vmem:[#allocation2 + $0x30] sm:$0xff] %vm225_vm3, %v223_v40  ;;  %v598_v46 = vmax.f32 %v536_v41, 0.0  ;;  %v539_v47 = vadd.f32 %v2227_v29, %v538_v45 }
  0xee   :  { %v601_v48 = vmax.f32 %v547_v44, 0.0 }
  0xef   :  { %v599_v49 = vmax.f32 %v539_v47, 0.0 }
  0xf0   :  { %v615_v50 = vpack.c.bf16 %v601_v48, %v600_v43 }
  0xf1   :  { %v614_v51 = vpack.c.bf16 %v599_v49, %v598_v46  ;;  %v1850_v52 = vpop.f32.mrb[12].mxu0  ;;  %v763_v57 = vld [vmem:[#allocation2 + $0x18] sm:$0xff] }
  0xf2   :  { %v762_v53 = vld [vmem:[#allocation2 + $0x10] sm:$0xff]  ;;  %v560_v55 = vadd.f32 %v1850_v52, %v2227_v29  ;;  %v551_v56 = vpop.f32.mrb[13].mxu0 }
  0xf3   :  { %1884 = vmatprep.mubr.msk.bf16.mxu0 %vm225_vm3, %v762_v53  ;;  %v552_v58 = vadd.f32 %v2227_v29, %v551_v56  ;;  %v1851_v59 = vpop.f32.mrb[14].mxu0  ;;  %v767_v20 = vld [vmem:[#allocation2 + $0x38] sm:$0xff] }
  0xf4   :  { %1835 = vmatmul.mubr.msk.bf16.gmra.mrb[16].mxu1 %vm225_vm3, %v2215_v7  ;;  %1885 = vmatmul.mubr.msk.bf16.gmra.mrb[28].mxu0 %vm225_vm3, %v763_v57  ;;  %v604_v60 = vmax.f32 %v560_v55, 0.0  ;;  %v563_v61 = vadd.f32 %v1851_v59, %v2227_v29  ;;  %v554_v62 = vpop.f32.mrb[15].mxu0  ;;  %v766_v6 = vld [vmem:[#allocation2 + $0x30] sm:$0xff] }
  0xf5   :  { %1888 = vmatprep.mubr.msk.bf16.mxu0 %vm225_vm3, %v764_v54  ;;  %1838 = vmatprep.mubr.msk.bf16.mxu1 %vm225_vm3, %v223_v40  ;;  %v602_v63 = vmax.f32 %v552_v58, 0.0  ;;  %v555_v0 = vadd.f32 %v2227_v29, %v554_v62 }
  0xf6   :  { %v605_v1 = vmax.f32 %v563_v61, 0.0 }
  0xf7   :  { %v603_v2 = vmax.f32 %v555_v0, 0.0 }
  0xf8   :  { %v617_v3 = vpack.c.bf16 %v605_v1, %v604_v60 }
  0xf9   :  { %v616_v4 = vpack.c.bf16 %v603_v2, %v602_v63  ;;  %v1854_v5 = vpop.f32.mrb[16].mxu0 }
  0xfa   :  { %v576_v7 = vadd.f32 %v1854_v5, %v2227_v29  ;;  %v567_v8 = vpop.f32.mrb[17].mxu0 }
  0xfb   :  { %v568_v10 = vadd.f32 %v2227_v29, %v567_v8  ;;  %v1855_v11 = vpop.f32.mrb[18].mxu0 }
  0xfc   :  { %1889 = vmatmul.mubr.msk.bf16.gmra.mrb[32].mxu0 %vm225_vm3, %v765_v9  ;;  %1839 = vmatmul.mubr.msk.bf16.gmra.mrb[20].mxu1 %vm225_vm3, %v224_v36  ;;  %v608_v12 = vmax.f32 %v576_v7, 0.0  ;;  %v579_v13 = vadd.f32 %v1855_v11, %v2227_v29  ;;  %v570_v14 = vpop.f32.mrb[19].mxu0 }
  0xfd   :  { %1892 = vmatprep.mubr.msk.bf16.mxu0 %vm225_vm3, %v766_v6  ;;  %1862 = vmatprep.mubr.msk.bf16.mxu1 %vm225_vm3, %v614_v51  ;;  %v606_v15 = vmax.f32 %v568_v10, 0.0  ;;  %v571_v16 = vadd.f32 %v2227_v29, %v570_v14 }
  0xfe   :  { %v609_v17 = vmax.f32 %v579_v13, 0.0 }
  0xff   :  { %v607_v18 = vmax.f32 %v571_v16, 0.0 }
 0x100   :  { %v619_v19 = vpack.c.bf16 %v609_v17, %v608_v12 }
 0x101   :  { %v618_v21 = vpack.c.bf16 %v607_v18, %v606_v15  ;;  %v1858_v22 = vpop.f32.mrb[20].mxu0 }
 0x102   :  { %v592_v23 = vadd.f32 %v1858_v22, %v2227_v29  ;;  %v583_v24 = vpop.f32.mrb[21].mxu0 }
 0x103   :  { %v584_v25 = vadd.f32 %v2227_v29, %v583_v24  ;;  %v1859_v26 = vpop.f32.mrb[22].mxu0 }
 0x104   :  { %1893 = vmatmul.mubr.msk.bf16.gmra.mrb[36].mxu0 %vm225_vm3, %v767_v20  ;;  %1863 = vmatmul.mubr.msk.bf16.vlgmr.msra.gmra.mrb[24].mxu1 %vm225_vm3, %v615_v50  ;;  %v612_v27 = vmax.f32 %v592_v23, 0.0  ;;  %v595_v28 = vadd.f32 %v1859_v26, %v2227_v29  ;;  %v586_v30 = vpop.f32.mrb[23].mxu0 }
 0x105   :  { %1866 = vmatprep.mubr.msk.bf16.mxu1 %vm225_vm3, %v616_v4  ;;  %v610_v31 = vmax.f32 %v584_v25, 0.0  ;;  %v587_v32 = vadd.f32 %v2227_v29, %v586_v30 }
 0x106   :  { %v613_v33 = vmax.f32 %v595_v28, 0.0 }
 0x107   :  { %v611_v34 = vmax.f32 %v587_v32, 0.0 }
 0x108   :  { %v621_v35 = vpack.c.bf16 %v613_v33, %v612_v27 }
 0x109   :  { %v620_v36 = vpack.c.bf16 %v611_v34, %v610_v31 }
 0x10c   :  { %1867 = vmatmul.mubr.msk.bf16.gmra.mrb[28].mxu1 %vm225_vm3, %v617_v3 }
 0x10d   :  { %1870 = vmatprep.mubr.msk.bf16.mxu1 %vm225_vm3, %v618_v21 }
 0x114   :  { %1871 = vmatmul.mubr.msk.bf16.gmra.mrb[32].mxu1 %vm225_vm3, %v619_v19 }
 0x115   :  { %1874 = vmatprep.mubr.msk.bf16.mxu1 %vm225_vm3, %v620_v36 }
 0x11c   :  { %1875 = vmatmul.mubr.msk.bf16.gmra.mrb[36].mxu1 %vm225_vm3, %v621_v35 }
 0x1b7   :  { %v1828_v37 = vpop.f32.mrb[8].mxu1 }
 0x1b8   :  { %v297_v38 = vpop.f32.mrb[9].mxu1  ;;  %v362_v40 = vmul.f32 0.5, %v1828_v37 }
 0x1b9   :  { %v1829_v39 = vpop.f32.mrb[10].mxu1  ;;  %v360_v43 = vmul.f32 0.5, %v297_v38 }
 0x1ba   :  { %v363_v41 = vmul.f32 0.5, %v1829_v39  ;;  %v300_v42 = vpop.f32.mrb[11].mxu1 }
 0x1bb   :  { %v361_v44 = vmul.f32 0.5, %v300_v42 }
 0x1bc   :  { %v377_v45 = vpack.c.bf16 %v363_v41, %v362_v40 }
 0x1bd   :  { %v376_v46 = vpack.c.bf16 %v361_v44, %v360_v43 }
 0x1be   :  { %385 = vst.msk [vmem:[#allocation3 + $0x8] sm:$0xff] %vm225_vm3, %v377_v45 }
 0x1bf   :  { %384 = vst.msk [vmem:[#allocation3] sm:$0xff] %vm225_vm3, %v376_v46  ;;  %v1832_v29 = vpop.f32.mrb[12].mxu1  ;;  %v1882_v47 = vpop.f32.mrb[24].mxu0 }
 0x1c0   :  { %v313_v48 = vpop.f32.mrb[13].mxu1  ;;  %v830_v49 = vpop.f32.mrb[25].mxu0  ;;  %v366_v52 = vmul.f32 0.5, %v1832_v29 }
 0x1c1   :  { %v1833_v50 = vpop.f32.mrb[14].mxu1  ;;  %v1883_v51 = vpop.f32.mrb[26].mxu0  ;;  %v364_v57 = vmul.f32 0.5, %v313_v48 }
 0x1c2   :  { %v367_v53 = vmul.f32 0.5, %v1833_v50  ;;  %v894_v54 = vpack.c.bf16 %v1883_v51, %v1882_v47  ;;  %v316_v55 = vpop.f32.mrb[15].mxu1  ;;  %v833_v56 = vpop.f32.mrb[27].mxu0 }
 0x1c3   :  { %v365_v58 = vmul.f32 0.5, %v316_v55  ;;  %v893_v59 = vpack.c.bf16 %v833_v56, %v830_v49 }
 0x1c4   :  { %v379_v60 = vpack.c.bf16 %v367_v53, %v366_v52  ;;  %v925_v15 = vsel %vm225_vm3, %v894_v54, 0 }
 0x1c5   :  { %v378_v61 = vpack.c.bf16 %v365_v58, %v364_v57  ;;  %v922_v62 = vsel %vm225_vm3, %v893_v59, 0  ;;  %1986 = vmatprep.subr.msk.bf16.mxu1 %vm225_vm3, %v893_v59  ;;  %v902_v56 = vld [vmem:[#allocation3 + $0x8] sm:$0xff] }
 0x1c6   :  { %387 = vst.msk [vmem:[#allocation3 + $0x18] sm:$0xff] %vm225_vm3, %v379_v60  ;;  %1897 = vmatpush3.bf16.xpose.msra.mxu1 %v922_v62  ;;  %v901_v63 = vld [vmem:[#allocation3] sm:$0xff] }
 0x1c7   :  { %386 = vst.msk [vmem:[#allocation3 + $0x10] sm:$0xff] %vm225_vm3, %v378_v61  ;;  %v1836_v0 = vpop.f32.mrb[16].mxu1  ;;  %v1886_v1 = vpop.f32.mrb[28].mxu0  ;;  %1987 = vmatprep.subr.msk.bf16.mxu1 %vm225_vm3, %v894_v54  ;;  %1904 = vmatprep.mubr.msk.bf16.mxu1 %vm225_vm3, %v901_v63 }
 0x1c8   :  { %v329_v2 = vpop.f32.mrb[17].mxu1  ;;  %v846_v3 = vpop.f32.mrb[29].mxu0  ;;  %v370_v6 = vmul.f32 0.5, %v1836_v0 }
 0x1c9   :  { %v1837_v4 = vpop.f32.mrb[18].mxu1  ;;  %v1887_v5 = vpop.f32.mrb[30].mxu0  ;;  %v368_v11 = vmul.f32 0.5, %v329_v2 }
 0x1ca   :  { %v371_v7 = vmul.f32 0.5, %v1837_v4  ;;  %v896_v8 = vpack.c.bf16 %v1887_v5, %v1886_v1  ;;  %v332_v9 = vpop.f32.mrb[19].mxu1  ;;  %v849_v10 = vpop.f32.mrb[31].mxu0 }
 0x1cb   :  { %v369_v12 = vmul.f32 0.5, %v332_v9  ;;  %v895_v13 = vpack.c.bf16 %v849_v10, %v846_v3 }
 0x1cc   :  { %v381_v14 = vpack.c.bf16 %v371_v7, %v370_v6  ;;  %v931_v48 = vsel %vm225_vm3, %v896_v8, 0 }
 0x1cd   :  { %v380_v16 = vpack.c.bf16 %v369_v12, %v368_v11  ;;  %v928_v33 = vsel %vm225_vm3, %v895_v13, 0  ;;  %v904_v1 = vld [vmem:[#allocation3 + $0x18] sm:$0xff]  ;;  %v2040_v12 = vmov 0.0  }
 0x1ce   :  { %389 = vst.msk [vmem:[#allocation3 + $0x28] sm:$0xff] %vm225_vm3, %v381_v14  ;;  %1899 = vmatpush3.bf16.xpose.msra.mxu1 %v925_v15  ;;  %v903_v58 = vld [vmem:[#allocation3 + $0x10] sm:$0xff]  ;;  %394 = vst.msk [vmem:[#allocation4 + $0x10] sm:$0xff] %vm225_vm3, %v2040_v12 }
 0x1cf   :  { %388 = vst.msk [vmem:[#allocation3 + $0x20] sm:$0xff] %vm225_vm3, %v380_v16  ;;  %v1890_v17 = vpop.f32.mrb[32].mxu0  ;;  %1988 = vmatprep.subr.msk.bf16.mxu1 %vm225_vm3, %v895_v13  ;;  %v1840_v18 = vpop.f32.mrb[20].mxu1  ;;  %392 = vst.msk [vmem:[#allocation4] sm:$0xff] %vm225_vm3, %v2040_v12 }
 0x1d0   :  { %v374_v19 = vmul.f32 0.5, %v1840_v18  ;;  %v862_v20 = vpop.f32.mrb[33].mxu0  ;;  %v345_v21 = vpop.f32.mrb[21].mxu1  ;;  %393 = vst.msk [vmem:[#allocation4 + $0x8] sm:$0xff] %vm225_vm3, %v2040_v12  ;;  %395 = vst.msk [vmem:[#allocation4 + $0x18] sm:$0xff] %vm225_vm3, %v2040_v12 }
 0x1d1   :  { %v372_v22 = vmul.f32 0.5, %v345_v21  ;;  %v1891_v23 = vpop.f32.mrb[34].mxu0  ;;  %v1841_v24 = vpop.f32.mrb[22].mxu1  ;;  %396 = vst.msk [vmem:[#allocation4 + $0x20] sm:$0xff] %vm225_vm3, %v2040_v12  ;;  %397 = vst.msk [vmem:[#allocation4 + $0x28] sm:$0xff] %vm225_vm3, %v2040_v12 }
 0x1d2   :  { %v898_v25 = vpack.c.bf16 %v1891_v23, %v1890_v17  ;;  %v375_v26 = vmul.f32 0.5, %v1841_v24  ;;  %v865_v27 = vpop.f32.mrb[35].mxu0  ;;  %v348_v28 = vpop.f32.mrb[23].mxu1  ;;  %398 = vst.msk [vmem:[#allocation4 + $0x30] sm:$0xff] %vm225_vm3, %v2040_v12  ;;  %399 = vst.msk [vmem:[#allocation4 + $0x38] sm:$0xff] %vm225_vm3, %v2040_v12 }
 0x1d3   :  { %v897_v30 = vpack.c.bf16 %v865_v27, %v862_v20  ;;  %v373_v31 = vmul.f32 0.5, %v348_v28  ;;  %400 = vst.msk [vmem:[#allocation4 + $0x40] sm:$0xff] %vm225_vm3, %v2040_v12  ;;  %401 = vst.msk [vmem:[#allocation4 + $0x48] sm:$0xff] %vm225_vm3, %v2040_v12 }
 0x1d4   :  { %v383_v32 = vpack.c.bf16 %v375_v26, %v374_v19  ;;  %v1014_v49 = vsel %vm225_vm3, %v898_v25, 0  ;;  %402 = vst.msk [vmem:[#allocation4 + $0x50] sm:$0xff] %vm225_vm3, %v2040_v12  ;;  %403 = vst.msk [vmem:[#allocation4 + $0x58] sm:$0xff] %vm225_vm3, %v2040_v12 }
 0x1d5   :  { %v1011_v34 = vsel %vm225_vm3, %v897_v30, 0  ;;  %v382_v35 = vpack.c.bf16 %v373_v31, %v372_v22  ;;  %1990 = vmatprep.subr.msk.bf16.mxu0 %vm225_vm3, %v897_v30  ;;  %v906_v3 = vld [vmem:[#allocation3 + $0x28] sm:$0xff]  ;;  %404 = vst.msk [vmem:[#allocation4 + $0x60] sm:$0xff] %vm225_vm3, %v2040_v12  ;;  %405 = vst.msk [vmem:[#allocation4 + $0x68] sm:$0xff] %vm225_vm3, %v2040_v12 }
 0x1d6   :  { %391 = vst.msk [vmem:[#allocation3 + $0x38] sm:$0xff] %vm225_vm3, %v383_v32  ;;  %1901 = vmatpush3.bf16.xpose.msra.mxu1 %v928_v33  ;;  %1913 = vmatpush3.bf16.xpose.msra.mxu0 %v1011_v34  ;;  %v905_v36 = vld [vmem:[#allocation3 + $0x20] sm:$0xff]  ;;  %406 = vst.msk [vmem:[#allocation4 + $0x70] sm:$0xff] %vm225_vm3, %v2040_v12 }
 0x1d7   :  { %390 = vst.msk [vmem:[#allocation3 + $0x30] sm:$0xff] %vm225_vm3, %v382_v35  ;;  %1989 = vmatprep.subr.msk.bf16.mxu1 %vm225_vm3, %v896_v8  ;;  %1991 = vmatprep.subr.msk.bf16.mxu0 %vm225_vm3, %v898_v25  ;;  %v1894_v37 = vpop.f32.mrb[36].mxu0  ;;  %v1864_v38 = vpop.f32.mrb[24].mxu1  ;;  %407 = vst.msk [vmem:[#allocation4 + $0x78] sm:$0xff] %vm225_vm3, %v2040_v12 }
 0x1d8   :  { %1920 = vmatprep.mubr.msk.bf16.mxu0 %vm225_vm3, %v905_v36  ;;  %v878_v39 = vpop.f32.mrb[37].mxu0  ;;  %v684_v40 = vpop.f32.mrb[25].mxu1 }
 0x1d9   :  { %v1895_v41 = vpop.f32.mrb[38].mxu0  ;;  %v1865_v42 = vpop.f32.mrb[26].mxu1 }
 0x1da   :  { %v900_v43 = vpack.c.bf16 %v1895_v41, %v1894_v37  ;;  %v881_v44 = vpop.f32.mrb[39].mxu0  ;;  %v748_v45 = vpack.c.bf16 %v1865_v42, %v1864_v38  ;;  %v687_v46 = vpop.f32.mrb[27].mxu1 }
 0x1db   :  { %v899_v29 = vpack.c.bf16 %v881_v44, %v878_v39  ;;  %v747_v47 = vpack.c.bf16 %v687_v46, %v684_v40 }
 0x1dc   :  { %v1020_v2 = vsel %vm225_vm3, %v900_v43, 0 }
 0x1dd   :  { %v1017_v57 = vsel %vm225_vm3, %v899_v29, 0  ;;  %v908_v5 = vld [vmem:[#allocation3 + $0x38] sm:$0xff] }
 0x1de   :  { %1903 = vmatpush3.bf16.xpose.msra.mxu1 %v931_v48  ;;  %1915 = vmatpush3.bf16.xpose.msra.mxu0 %v1014_v49  ;;  %v907_v4 = vld [vmem:[#allocation3 + $0x30] sm:$0xff] }
 0x1df   :  { %1992 = vmatprep.subr.msk.bf16.mxu0 %vm225_vm3, %v899_v29  ;;  %1928 = vmatprep.subr.bf16.mxu1 %v747_v47  ;;  %v1868_v50 = vpop.f32.mrb[28].mxu1 }
 0x1e0   :  { %v700_v51 = vpop.f32.mrb[29].mxu1 }
 0x1e1   :  { %v1869_v52 = vpop.f32.mrb[30].mxu1 }
 0x1e2   :  { %v750_v53 = vpack.c.bf16 %v1869_v52, %v1868_v50  ;;  %v703_v54 = vpop.f32.mrb[31].mxu1 }
 0x1e3   :  { %v749_v55 = vpack.c.bf16 %v703_v54, %v700_v51 }
 0x1e5   :  { %1905 = vmatmul.mubr.msk.bf16.vlgmr.msra.gmra.mrb[40].mxu1 %vm225_vm3, %v902_v56 }
 0x1e6   :  { %1908 = vmatprep.mubr.msk.bf16.mxu1 %vm225_vm3, %v903_v58  ;;  %1917 = vmatpush3.bf16.xpose.msra.mxu0 %v1017_v57 }
 0x1e7   :  { %1993 = vmatprep.subr.msk.bf16.mxu0 %vm225_vm3, %v900_v43  ;;  %1929 = vmatpush3.bf16.msra.mxu1 %v747_v47  ;;  %v1872_v59 = vpop.f32.mrb[32].mxu1 }
 0x1e8   :  { %1930 = vmatprep.subr.bf16.mxu1 %v748_v45  ;;  %v716_v60 = vpop.f32.mrb[33].mxu1 }
 0x1e9   :  { %v1873_v61 = vpop.f32.mrb[34].mxu1 }
 0x1ea   :  { %v2299_v62 = vpack.c.bf16 %v1873_v61, %v1872_v59  ;;  %v719_v63 = vpop.f32.mrb[35].mxu1 }
 0x1eb   :  { %1931 = vmatpush3.bf16.msra.mxu1 %v748_v45  ;;  %v2301_v0 = vpack.c.bf16 %v719_v63, %v716_v60 }
 0x1ec   :  { %1932 = vmatprep.subr.bf16.mxu1 %v749_v55 }
 0x1ed   :  { %1909 = vmatmul.mubr.msk.bf16.gmra.mrb[44].mxu1 %vm225_vm3, %v904_v1 }
 0x1ee   :  { %1919 = vmatpush3.bf16.xpose.msra.mxu0 %v1020_v2 }
 0x1ef   :  { %1933 = vmatpush3.bf16.msra.mxu1 %v749_v55  ;;  %v1876_v6 = vpop.f32.mrb[36].mxu1 }
 0x1f0   :  { %1934 = vmatprep.subr.bf16.mxu1 %v750_v53  ;;  %v732_v7 = vpop.f32.mrb[37].mxu1 }
 0x1f1   :  { %v1877_v8 = vpop.f32.mrb[38].mxu1 }
 0x1f2   :  { %v2309_v9 = vpack.c.bf16 %v1877_v8, %v1876_v6  ;;  %v735_v10 = vpop.f32.mrb[39].mxu1 }
 0x1f3   :  { %1935 = vmatpush3.bf16.msra.mxu1 %v750_v53  ;;  %v2311_v11 = vpack.c.bf16 %v735_v10, %v732_v7 }
 0x1f4   :  { %1944 = vmatprep.subr.bf16.mxu1 %v2301_v0 }
 0x1f5   :  { %1921 = vmatmul.mubr.msk.bf16.vlgmr.msra.gmra.mrb[40].mxu0 %vm225_vm3, %v906_v3 }
 0x1f6   :  { %1924 = vmatprep.mubr.msk.bf16.mxu0 %vm225_vm3, %v907_v4 }
 0x1fd   :  { %1925 = vmatmul.mubr.msk.bf16.gmra.mrb[44].mxu0 %vm225_vm3, %v908_v5 }
 0x2b8   :  { %v1906_v13 = vpop.f32.mrb[40].mxu1 }
 0x2b9   :  { %v1090_v14 = vsel %vm1087_vm4, %v1906_v13, -inf  ;;  %v967_v15 = vpop.f32.mrb[41].mxu1 }
 0x2ba   :  { %v1088_v16 = vsel %vm1087_vm4, %v967_v15, -inf  ;;  %v1907_v17 = vpop.f32.mrb[42].mxu1 }
 0x2bb   :  { %v1091_v18 = vmax.f32 %v1088_v16, %v1090_v14  ;;  %v1092_v19 = vsel %vm1087_vm4, %v1907_v17, -inf  ;;  %v970_v20 = vpop.f32.mrb[43].mxu1 }
 0x2bc   :  { %v1089_v21 = vsel %vm1087_vm4, %v970_v20, -inf }
 0x2bd   :  { %v1093_v22 = vmax.f32 %v1089_v21, %v1092_v19 }
 0x2c0   :  { %v2333_v23 = vpop.f32.mrb[44].mxu1 }
 0x2c1   :  { %v983_v24 = vpop.f32.mrb[45].mxu1  ;;  %v1098_v30 = vsel %vm1087_vm4, %v2333_v23, -inf }
 0x2c2   :  { %v1094_v25 = vsel %vm1087_vm4, %v983_v24, -inf  ;;  %v2336_v26 = vpop.f32.mrb[46].mxu1 }
 0x2c3   :  { %v1095_v27 = vmax.f32 %v1091_v18, %v1094_v25  ;;  %v986_v28 = vpop.f32.mrb[47].mxu1  ;;  %v1100_v34 = vsel %vm1087_vm4, %v2336_v26, -inf }
 0x2c4   :  { %v1096_v31 = vsel %vm1087_vm4, %v986_v28, -inf }
 0x2c5   :  { %v1099_v32 = vmax.f32 %v1095_v27, %v1098_v30  ;;  %v1097_v33 = vmax.f32 %v1093_v22, %v1096_v31 }
 0x2c7   :  { %v1101_v35 = vmax.f32 %v1097_v33, %v1100_v34 }
 0x2c8   :  { %v2343_v36 = vpop.f32.mrb[40].mxu0 }
 0x2c9   :  { %v1102_v37 = vmax.f32 %v1099_v32, %v1101_v35  ;;  %v1111_v38 = vsel %vm1087_vm4, %v2343_v36, -inf  ;;  %v2347_v39 = vpop.f32.mrb[41].mxu0 }
 0x2ca   :  { %v1109_v40 = vsel %vm1087_vm4, %v2347_v39, -inf  ;;  %v2351_v41 = vpop.f32.mrb[42].mxu0 }
 0x2cb   :  { %v1103_v42 = vrot.slane %v1102_v37, 4  ;;  %v1112_v43 = vmax.f32 %v1109_v40, %v1111_v38  ;;  %v1113_v44 = vsel %vm1087_vm4, %v2351_v41, -inf  ;;  %v2355_v45 = vpop.f32.mrb[43].mxu0 }
 0x2cc   :  { %v1110_v46 = vsel %vm1087_vm4, %v2355_v45, -inf }
 0x2cd   :  { %v1104_v29 = vmax.f32 %v1102_v37, %v1103_v42  ;;  %v1114_v47 = vmax.f32 %v1110_v46, %v1113_v44 }
 0x2cf   :  { %v1105_v48 = vrot.slane %v1104_v29, 2 }
 0x2d0   :  { %v2359_v49 = vpop.f32.mrb[44].mxu0 }
 0x2d1   :  { %v1106_v50 = vmax.f32 %v1104_v29, %v1105_v48  ;;  %v2361_v51 = vpop.f32.mrb[45].mxu0  ;;  %v1119_v57 = vsel %vm1087_vm4, %v2359_v49, -inf }
 0x2d2   :  { %v1115_v52 = vsel %vm1087_vm4, %v2361_v51, -inf  ;;  %v2365_v53 = vpop.f32.mrb[46].mxu0 }
 0x2d3   :  { %v1107_v54 = vrot.slane %v1106_v50, 1  ;;  %v1116_v55 = vmax.f32 %v1112_v43, %v1115_v52  ;;  %v2367_v56 = vpop.f32.mrb[47].mxu0  ;;  %v1121_v63 = vsel %vm1087_vm4, %v2365_v53, -inf }
 0x2d4   :  { %v1117_v58 = vsel %vm1087_vm4, %v2367_v56, -inf }
 0x2d5   :  { %v1108_v59 = vmax.f32 %v1106_v50, %v1107_v54  ;;  %v1120_v60 = vmax.f32 %v1116_v55, %v1119_v57  ;;  %v1118_v61 = vmax.f32 %v1114_v47, %v1117_v58 }
 0x2d7   :  { %v1130_v1 = vsub.f32 %v967_v15, %v1108_v59  ;;  %v1131_v2 = vsub.f32 %v970_v20, %v1108_v59  ;;  %v1132_v3 = vsub.f32 %v1906_v13, %v1108_v59  ;;  %v1133_v4 = vsub.f32 %v1907_v17, %v1108_v59 }
 0x2d8   :  { %v1134_v5 = vsub.f32 %v983_v24, %v1108_v59  ;;  %v1135_v6 = vsub.f32 %v986_v28, %v1108_v59  ;;  %v1136_v7 = vsub.f32 %v2333_v23, %v1108_v59  ;;  %v1137_v8 = vsub.f32 %v2336_v26, %v1108_v59 }
 0x2d9   :  { %v1146_v10 = vmul.f32 1.442695, %v1130_v1  ;;  %v1148_v12 = vmul.f32 1.442695, %v1131_v2  ;;  %v1150_v14 = vmul.f32 1.442695, %v1132_v3  ;;  %v1122_v16 = vmax.f32 %v1118_v61, %v1121_v63 }
 0x2da   :  { %v1152_v18 = vmul.f32 1.442695, %v1133_v4  ;;  %v1154_v21 = vmul.f32 1.442695, %v1134_v5  ;;  %v1156_v13 = vmul.f32 1.442695, %v1135_v6 }
 0x2db   :  { %2004 = vpow2.f32 %v1146_v10  ;;  %v1123_v19 = vmax.f32 %v1120_v60, %v1122_v16  ;;  %v1158_v20 = vmul.f32 1.442695, %v1136_v7  ;;  %v1160_v23 = vmul.f32 1.442695, %v1137_v8 }
 0x2dc   :  { %2006 = vpow2.f32 %v1148_v12 }
 0x2dd   :  { %2008 = vpow2.f32 %v1150_v14  ;;  %v1124_v15 = vrot.slane %v1123_v19, 4 }
 0x2de   :  { %2010 = vpow2.f32 %v1152_v18 }
 0x2df   :  { %v1125_v17 = vmax.f32 %v1123_v19, %v1124_v15  ;;  %2012 = vpow2.f32 %v1154_v21 }
 0x2e0   :  { %2014 = vpow2.f32 %v1156_v13 }
 0x2e1   :  { %v1126_v22 = vrot.slane %v1125_v17, 2  ;;  %2016 = vpow2.f32 %v1158_v20 }
 0x2e2   :  { %2018 = vpow2.f32 %v1160_v23 }
 0x2e3   :  { %v1127_v24 = vmax.f32 %v1125_v17, %v1126_v22 }
 0x2e5   :  { %v2377_v25 = vpop.eup %2004  ;;  %v1128_v26 = vrot.slane %v1127_v24, 1 }
 0x2e6   :  { %v2379_v27 = vpop.eup %2006  ;;  %v1178_v28 = vsel %vm1087_vm4, %v2377_v25, 0.0 }
 0x2e7   :  { %v2383_v30 = vpop.eup %2008  ;;  %v1179_v31 = vsel %vm1087_vm4, %v2379_v27, 0.0  ;;  %v1129_v32 = vmax.f32 %v1127_v24, %v1128_v26 }
 0x2e8   :  { %v2387_v33 = vpop.eup %2010  ;;  %v1180_v34 = vadd.f32 %v1179_v31, %v1178_v28  ;;  %v1181_v35 = vsel %vm1087_vm4, %v2383_v30, 0.0 }
 0x2e9   :  { %v1138_v37 = vsub.f32 %v2347_v39, %v1129_v32  ;;  %v1139_v38 = vsub.f32 %v2355_v45, %v1129_v32  ;;  %v1140_v40 = vsub.f32 %v2343_v36, %v1129_v32  ;;  %v2394_v42 = vpop.eup %2012  ;;  %v1141_v44 = vsub.f32 %v2351_v41, %v1129_v32 }
 0x2ea   :  { %v1182_v43 = vadd.f32 %v1181_v35, %v1180_v34  ;;  %v1142_v46 = vsub.f32 %v2361_v51, %v1129_v32  ;;  %v1183_v29 = vsel %vm1087_vm4, %v2387_v33, 0.0  ;;  %v1143_v47 = vsub.f32 %v2367_v56, %v1129_v32  ;;  %v2403_v50 = vpop.eup %2014 }
 0x2eb   :  { %v1144_v48 = vsub.f32 %v2359_v49, %v1129_v32  ;;  %v1145_v39 = vsub.f32 %v2365_v53, %v1129_v32  ;;  %v1162_v36 = vmul.f32 1.442695, %v1138_v37  ;;  %v1164_v52 = vmul.f32 1.442695, %v1139_v38  ;;  %v2017_v51 = vpop.eup %2016 }
 0x2ec   :  { %v1184_v45 = vadd.f32 %v1183_v29, %v1182_v43  ;;  %v1185_v54 = vsel %vm1087_vm4, %v2394_v42, 0.0  ;;  %v1166_v41 = vmul.f32 1.442695, %v1140_v40  ;;  %v1168_v55 = vmul.f32 1.442695, %v1141_v44  ;;  %v2019_v58 = vpop.eup %2018 }
 0x2ed   :  { %2020 = vpow2.f32 %v1162_v36  ;;  %v1187_v56 = vsel %vm1087_vm4, %v2403_v50, 0.0  ;;  %v1170_v49 = vmul.f32 1.442695, %v1142_v46  ;;  %v1189_v59 = vsel %vm1087_vm4, %v2017_v51, 0.0 }
 0x2ee   :  { %v1186_v57 = vadd.f32 %v1185_v54, %v1184_v45  ;;  %2022 = vpow2.f32 %v1164_v52  ;;  %v1172_v60 = vmul.f32 1.442695, %v1143_v47  ;;  %v1191_v63 = vsel %vm1087_vm4, %v2019_v58, 0.0 }
 0x2ef   :  { %2024 = vpow2.f32 %v1166_v41  ;;  %v1174_v1 = vmul.f32 1.442695, %v1144_v48  ;;  %v1176_v3 = vmul.f32 1.442695, %v1145_v39 }
 0x2f0   :  { %v1188_v53 = vadd.f32 %v1187_v56, %v1186_v57  ;;  %2026 = vpow2.f32 %v1168_v55 }
 0x2f1   :  { %2028 = vpow2.f32 %v1170_v49 }
 0x2f2   :  { %v1190_v61 = vadd.f32 %v1189_v59, %v1188_v53  ;;  %2030 = vpow2.f32 %v1172_v60 }
 0x2f3   :  { %2032 = vpow2.f32 %v1174_v1 }
 0x2f4   :  { %v1192_v2 = vadd.f32 %v1191_v63, %v1190_v61  ;;  %2034 = vpow2.f32 %v1176_v3  ;;  %v1248_v3 = vld [vmem:[#allocation4 + $0x10] sm:$0xff] }
 0x2f6   :  { %v1193_v4 = vrot.slane %v1192_v2, 4 }
 0x2f7   :  { %v2021_v5 = vpop.eup %2020 }
 0x2f8   :  { %v1194_v6 = vadd.f32 %v1193_v4, %v1192_v2  ;;  %v2023_v7 = vpop.eup %2022  ;;  %v1199_v8 = vsel %vm1087_vm4, %v2021_v5, 0.0  ;;  %v1246_v4 = vld [vmem:[#allocation4] sm:$0xff] }
 0x2f9   :  { %v2025_v10 = vpop.eup %2024  ;;  %v1200_v14 = vsel %vm1087_vm4, %v2023_v7, 0.0 }
 0x2fa   :  { %v1195_v12 = vrot.slane %v1194_v6, 2  ;;  %v2027_v16 = vpop.eup %2026  ;;  %v1201_v18 = vadd.f32 %v1200_v14, %v1199_v8  ;;  %v1202_v21 = vsel %vm1087_vm4, %v2025_v10, 0.0 }
 0x2fb   :  { %v2029_v15 = vpop.eup %2028  ;;  %v1204_v20 = vsel %vm1087_vm4, %v2027_v16, 0.0 }
 0x2fc   :  { %v1196_v19 = vadd.f32 %v1195_v12, %v1194_v6  ;;  %v1203_v13 = vadd.f32 %v1202_v21, %v1201_v18  ;;  %v2031_v22 = vpop.eup %2030  ;;  %v1206_v26 = vsel %vm1087_vm4, %v2029_v15, 0.0  ;;  %v1249_v6 = vld [vmem:[#allocation4 + $0x18] sm:$0xff]  ;;  %v1252_v21 = vld [vmem:[#allocation4 + $0x30] sm:$0xff] }
 0x2fd   :  { %v2033_v28 = vpop.eup %2032  ;;  %v1208_v32 = vsel %vm1087_vm4, %v2031_v22, 0.0 }
 0x2fe   :  { %v1197_v17 = vrot.slane %v1196_v19, 1  ;;  %v1205_v23 = vadd.f32 %v1204_v20, %v1203_v13  ;;  %v2035_v34 = vpop.eup %2034  ;;  %v1210_v37 = vsel %vm1087_vm4, %v2033_v28, 0.0 }
 0x2ff   :  { %v1212_v40 = vsel %vm1087_vm4, %v2035_v34, 0.0 }
 0x300   :  { %v1198_v24 = vadd.f32 %v1197_v17, %v1196_v19  ;;  %v1207_v31 = vadd.f32 %v1206_v26, %v1205_v23  ;;  %v1253_v17 = vld [vmem:[#allocation4 + $0x38] sm:$0xff]  ;;  %v1251_v23 = vld [vmem:[#allocation4 + $0x28] sm:$0xff] }
 0x302   :  { %2036 = vrcp.f32 %v1198_v24  ;;  %v1209_v35 = vadd.f32 %v1208_v32, %v1207_v31 }
 0x304   :  { %v1211_v38 = vadd.f32 %v1210_v37, %v1209_v35 }
 0x306   :  { %v1213_v43 = vadd.f32 %v1212_v40, %v1211_v38 }
 0x308   :  { %v1214_v44 = vrot.slane %v1213_v43, 4 }
 0x30a   :  { %v1215_v46 = vadd.f32 %v1214_v44, %v1213_v43  ;;  %v1256_v44 = vld [vmem:[#allocation4 + $0x50] sm:$0xff] }
 0x30c   :  { %v2037_v29 = vpop.eup %2036  ;;  %v1216_v47 = vrot.slane %v1215_v46, 2 }
 0x30d   :  { %v1222_v48 = vmul.f32 %v2037_v29, %v2377_v25  ;;  %v1223_v39 = vmul.f32 %v2037_v29, %v2379_v27  ;;  %v1224_v45 = vmul.f32 %v2037_v29, %v2383_v30  ;;  %v1225_v36 = vmul.f32 %v2037_v29, %v2387_v33 }
 0x30e   :  { %v1226_v52 = vmul.f32 %v2037_v29, %v2394_v42  ;;  %v1227_v54 = vmul.f32 %v2037_v29, %v2403_v50  ;;  %v1228_v41 = vmul.f32 %v2037_v29, %v2017_v51  ;;  %v1217_v55 = vadd.f32 %v1216_v47, %v1215_v46  ;;  %v1254_v46 = vld [vmem:[#allocation4 + $0x40] sm:$0xff]  ;;  %v1257_v47 = vld [vmem:[#allocation4 + $0x58] sm:$0xff] }
 0x30f   :  { %v1238_v57 = vpack.c.bf16 %v1223_v39, %v1222_v48  ;;  %v1229_v56 = vmul.f32 %v2037_v29, %v2019_v58  ;;  %v1239_v49 = vpack.c.bf16 %v1225_v36, %v1224_v45  ;;  %v1255_v45 = vld [vmem:[#allocation4 + $0x48] sm:$0xff] }
 0x310   :  { %v1240_v53 = vpack.c.bf16 %v1227_v54, %v1226_v52  ;;  %v1218_v59 = vrot.slane %v1217_v55, 1 }
 0x311   :  { %1936 = vmatprep.mubr.msk.bf16.mxu1 %vm1087_vm4, %v1238_v57  ;;  %v1241_v25 = vpack.c.bf16 %v1229_v56, %v1228_v41 }
 0x312   :  { %1937 = vmatmul.mubr.msk.bf16.vlgmr.msra.gmra.mrb[48].mxu1 %vm1087_vm4, %v1239_v49  ;;  %v1219_v27 = vadd.f32 %v1218_v59, %v1217_v55 }
 0x313   :  { %1945 = vmatpush3.bf16.msra.mxu1 %v2301_v0  ;;  %1940 = vmatprep.mubr.msk.bf16.mxu1 %vm1087_vm4, %v1240_v53 }
 0x314   :  { %1946 = vmatprep.subr.bf16.mxu1 %v2299_v62  ;;  %2038 = vrcp.f32 %v1219_v27  ;;  %v1260_v27 = vld [vmem:[#allocation4 + $0x70] sm:$0xff] }
 0x317   :  { %1947 = vmatpush3.bf16.msra.mxu1 %v2299_v62 }
 0x318   :  { %1948 = vmatprep.subr.bf16.mxu1 %v2311_v11 }
 0x31a   :  { %1941 = vmatmul.mubr.msk.bf16.gmra.mrb[52].mxu1 %vm1087_vm4, %v1241_v25 }
 0x31b   :  { %1949 = vmatpush3.bf16.msra.mxu1 %v2311_v11 }
 0x31c   :  { %1950 = vmatprep.subr.bf16.mxu1 %v2309_v9 }
 0x31e   :  { %v2039_v30 = vpop.eup %2038 }
 0x31f   :  { %1951 = vmatpush3.bf16.msra.mxu1 %v2309_v9  ;;  %v1230_v33 = vmul.f32 %v2039_v30, %v2021_v5  ;;  %v1231_v0 = vmul.f32 %v2039_v30, %v2023_v7  ;;  %v1232_v42 = vmul.f32 %v2039_v30, %v2025_v10  ;;  %v1233_v50 = vmul.f32 %v2039_v30, %v2027_v16  ;;  %v1475_v9 = vld [vmem:[%s2545_s9] sm:$0x3]  ;;  %v1247_v10 = vld [vmem:[#allocation4 + $0x8] sm:$0xff] }
 0x320   :  { %v1234_v51 = vmul.f32 %v2039_v30, %v2029_v15  ;;  %v1235_v58 = vmul.f32 %v2039_v30, %v2031_v22  ;;  %v1236_v60 = vmul.f32 %v2039_v30, %v2033_v28  ;;  %v1237_v61 = vmul.f32 %v2039_v30, %v2035_v34  ;;  %1994 = vmatprep.subr.msk.bf16.mxu0 %vm259_vm2, %v1475_v9  ;;  %v1250_v15 = vld [vmem:[#allocation4 + $0x20] sm:$0xff] }
 0x321   :  { %v1242_v62 = vpack.c.bf16 %v1231_v0, %v1230_v33  ;;  %v1243_v63 = vpack.c.bf16 %v1233_v50, %v1232_v42  ;;  %v1508_v11 = vsel %vm259_vm2, %v1475_v9, 0  ;;  %v1258_v30 = vld [vmem:[#allocation4 + $0x60] sm:$0xff]  ;;  %v1261_v0 = vld [vmem:[#allocation4 + $0x78] sm:$0xff] }
 0x322   :  { %v1244_v1 = vpack.c.bf16 %v1235_v58, %v1234_v51  ;;  %v1245_v2 = vpack.c.bf16 %v1237_v61, %v1236_v60  ;;  %1961 = vmatpush3.bf16.msra.mxu0 %v1508_v11  ;;  %v1259_v51 = vld [vmem:[#allocation4 + $0x68] sm:$0xff] }
 0x323   :  { %1952 = vmatprep.mubr.msk.bf16.mxu1 %vm1087_vm4, %v1242_v62 }
 0x324   :  { %1953 = vmatmul.mubr.msk.bf16.vlgmr.msra.gmra.mrb[56].mxu1 %vm1087_vm4, %v1243_v63 }
 0x325   :  { %1956 = vmatprep.mubr.msk.bf16.mxu1 %vm1087_vm4, %v1244_v1 }
 0x32c   :  { %1957 = vmatmul.mubr.msk.bf16.gmra.mrb[60].mxu1 %vm1087_vm4, %v1245_v2 }
 0x3e5   :  { %v1938_v5 = vpop.f32.mrb[48].mxu1 }
 0x3e6   :  { %v1418_v7 = vadd.f32 %v1938_v5, %v1248_v3  ;;  %v1308_v8 = vpop.f32.mrb[49].mxu1 }
 0x3e7   :  { %v1416_v12 = vadd.f32 %v1308_v8, %v1246_v4  ;;  %v1939_v14 = vpop.f32.mrb[50].mxu1 }
 0x3e8   :  { %1434 = vst.msk [vmem:[#allocation4 + $0x10] sm:$0xff] %vm225_vm3, %v1418_v7  ;;  %v1419_v16 = vadd.f32 %v1939_v14, %v1249_v6  ;;  %v1311_v18 = vpop.f32.mrb[51].mxu1  ;;  %v1711_v14 = vld [vmem:[%s2546_s10] ss:$0 sm:$0xff] }
 0x3e9   :  { %1432 = vst.msk [vmem:[#allocation4] sm:$0xff] %vm225_vm3, %v1416_v12  ;;  %v1417_v19 = vadd.f32 %v1311_v18, %v1247_v10 }
 0x3ea   :  { %1435 = vst.msk [vmem:[#allocation4 + $0x18] sm:$0xff] %vm225_vm3, %v1419_v16 }
 0x3eb   :  { %1433 = vst.msk [vmem:[#allocation4 + $0x8] sm:$0xff] %vm225_vm3, %v1417_v19 }
 0x3ed   :  { %v1942_v13 = vpop.f32.mrb[52].mxu1 }
 0x3ee   :  { %v1422_v20 = vadd.f32 %v1942_v13, %v1252_v21  ;;  %v1324_v22 = vpop.f32.mrb[53].mxu1 }
 0x3ef   :  { %v1420_v24 = vadd.f32 %v1324_v22, %v1250_v15  ;;  %v1943_v26 = vpop.f32.mrb[54].mxu1  ;;  %v1453_v40 = vld [vmem:[#allocation4 + $0x10] sm:$0xff] }
 0x3f0   :  { %1438 = vst.msk [vmem:[#allocation4 + $0x30] sm:$0xff] %vm225_vm3, %v1422_v20  ;;  %v1423_v28 = vadd.f32 %v1943_v26, %v1253_v17  ;;  %v1327_v31 = vpop.f32.mrb[55].mxu1  ;;  %v1451_v35 = vld [vmem:[#allocation4] sm:$0xff] }
 0x3f1   :  { %1436 = vst.msk [vmem:[#allocation4 + $0x20] sm:$0xff] %vm225_vm3, %v1420_v24  ;;  %v1421_v32 = vadd.f32 %v1327_v31, %v1251_v23  ;;  %v1454_v34 = vld [vmem:[#allocation4 + $0x18] sm:$0xff] }
 0x3f2   :  { %1439 = vst.msk [vmem:[#allocation4 + $0x38] sm:$0xff] %vm225_vm3, %v1423_v28  ;;  %v1452_v37 = vld [vmem:[#allocation4 + $0x8] sm:$0xff]  ;;  %v1468_v43 = vpack.c.bf16 %v1454_v34, %v1453_v40 }
 0x3f3   :  { %1437 = vst.msk [vmem:[#allocation4 + $0x28] sm:$0xff] %vm225_vm3, %v1421_v32  ;;  %v1467_v38 = vpack.c.bf16 %v1452_v37, %v1451_v35 }
 0x3f5   :  { %1962 = vmatprep.mubr.msk.bf16.mxu0 %vm225_vm3, %v1467_v38 }
 0x3f6   :  { %1963 = vmatmul.mubr.msk.bf16.vlgmr.msra.gmra.mrb[48].mxu0 %vm225_vm3, %v1468_v43 }
 0x3f7   :  { %v1954_v29 = vpop.f32.mrb[56].mxu1  ;;  %v1457_v53 = vld [vmem:[#allocation4 + $0x30] sm:$0xff] }
 0x3f8   :  { %v1426_v48 = vadd.f32 %v1954_v29, %v1256_v44  ;;  %v1385_v39 = vpop.f32.mrb[57].mxu1  ;;  %v1455_v41 = vld [vmem:[#allocation4 + $0x20] sm:$0xff] }
 0x3f9   :  { %v1458_v36 = vld [vmem:[#allocation4 + $0x38] sm:$0xff]  ;;  %v1424_v52 = vadd.f32 %v1385_v39, %v1254_v46  ;;  %v1955_v54 = vpop.f32.mrb[58].mxu1 }
 0x3fa   :  { %v1456_v55 = vld [vmem:[#allocation4 + $0x28] sm:$0xff]  ;;  %1442 = vst.msk [vmem:[#allocation4 + $0x50] sm:$0xff] %vm225_vm3, %v1426_v48  ;;  %v1427_v57 = vadd.f32 %v1955_v54, %v1257_v47  ;;  %v1388_v56 = vpop.f32.mrb[59].mxu1  ;;  %v1470_v25 = vpack.c.bf16 %v1458_v36, %v1457_v53 }
 0x3fb   :  { %v1469_v49 = vpack.c.bf16 %v1456_v55, %v1455_v41  ;;  %1440 = vst.msk [vmem:[#allocation4 + $0x40] sm:$0xff] %vm225_vm3, %v1424_v52  ;;  %v1425_v59 = vadd.f32 %v1388_v56, %v1255_v45 }
 0x3fc   :  { %1443 = vst.msk [vmem:[#allocation4 + $0x58] sm:$0xff] %vm225_vm3, %v1427_v57 }
 0x3fd   :  { %1966 = vmatprep.mubr.msk.bf16.mxu0 %vm225_vm3, %v1469_v49  ;;  %1441 = vst.msk [vmem:[#allocation4 + $0x48] sm:$0xff] %vm225_vm3, %v1425_v59 }
 0x3fe   :  { %1967 = vmatmul.mubr.msk.bf16.gmra.mrb[52].mxu0 %vm225_vm3, %v1470_v25 }
 0x3ff   :  { %v1958_v33 = vpop.f32.mrb[60].mxu1 }
 0x400   :  { %v1430_v42 = vadd.f32 %v1958_v33, %v1260_v27  ;;  %v1401_v50 = vpop.f32.mrb[61].mxu1 }
 0x401   :  { %v1428_v58 = vadd.f32 %v1401_v50, %v1258_v30  ;;  %v1959_v60 = vpop.f32.mrb[62].mxu1  ;;  %v1461_v3 = vld [vmem:[#allocation4 + $0x50] sm:$0xff] }
 0x402   :  { %1446 = vst.msk [vmem:[#allocation4 + $0x70] sm:$0xff] %vm225_vm3, %v1430_v42  ;;  %v1431_v61 = vadd.f32 %v1959_v60, %v1261_v0  ;;  %v1404_v62 = vpop.f32.mrb[63].mxu1  ;;  %v1459_v2 = vld [vmem:[#allocation4 + $0x40] sm:$0xff] }
 0x403   :  { %1444 = vst.msk [vmem:[#allocation4 + $0x60] sm:$0xff] %vm225_vm3, %v1428_v58  ;;  %v1429_v63 = vadd.f32 %v1404_v62, %v1259_v51  ;;  %v1462_v1 = vld [vmem:[#allocation4 + $0x58] sm:$0xff] }
 0x404   :  { %1447 = vst.msk [vmem:[#allocation4 + $0x78] sm:$0xff] %vm225_vm3, %v1431_v61  ;;  %v1460_v9 = vld [vmem:[#allocation4 + $0x48] sm:$0xff]  ;;  %v1472_v4 = vpack.c.bf16 %v1462_v1, %v1461_v3 }
 0x405   :  { %1445 = vst.msk [vmem:[#allocation4 + $0x68] sm:$0xff] %vm225_vm3, %v1429_v63  ;;  %v1471_v11 = vpack.c.bf16 %v1460_v9, %v1459_v2 }
 0x407   :  { %1970 = vmatprep.mubr.msk.bf16.mxu0 %vm225_vm3, %v1471_v11 }
 0x408   :  { %1971 = vmatmul.mubr.msk.bf16.gmra.mrb[56].mxu0 %vm225_vm3, %v1472_v4 }
 0x409   :  { %v1465_v10 = vld [vmem:[#allocation4 + $0x70] sm:$0xff] }
 0x40a   :  { %v1463_v6 = vld [vmem:[#allocation4 + $0x60] sm:$0xff] }
 0x40b   :  { %v1466_v5 = vld [vmem:[#allocation4 + $0x78] sm:$0xff] }
 0x40c   :  { %v1464_v7 = vld [vmem:[#allocation4 + $0x68] sm:$0xff]  ;;  %v1474_v12 = vpack.c.bf16 %v1466_v5, %v1465_v10 }
 0x40d   :  { %v1473_v8 = vpack.c.bf16 %v1464_v7, %v1463_v6 }
 0x40f   :  { %1974 = vmatprep.mubr.msk.bf16.mxu0 %vm225_vm3, %v1473_v8 }
 0x410   :  { %1975 = vmatmul.mubr.msk.bf16.gmra.mrb[60].mxu0 %vm225_vm3, %v1474_v12 }
 0x4c9   :  { %v1964_v16 = vpop.f32.mrb[48].mxu0 }
 0x4ca   :  { %v1553_v18 = vadd.f32 %v1964_v16, %v1711_v14  ;;  %v1544_v19 = vpop.f32.mrb[49].mxu0 }
 0x4cb   :  { %v1545_v21 = vadd.f32 %v1711_v14, %v1544_v19  ;;  %v1965_v15 = vpop.f32.mrb[50].mxu0 }
 0x4cc   :  { %v1609_v13 = vmax.f32 %v1553_v18, 0.0  ;;  %v1556_v17 = vadd.f32 %v1965_v15, %v1711_v14  ;;  %v1547_v20 = vpop.f32.mrb[51].mxu0 }
 0x4cd   :  { %v1607_v22 = vmax.f32 %v1545_v21, 0.0  ;;  %v1548_v23 = vadd.f32 %v1711_v14, %v1547_v20 }
 0x4ce   :  { %1625 = vst.msk [vmem:[%s2547_s11 + $0x10] sm:$0xff] %vm225_vm3, %v1609_v13  ;;  %v1610_v24 = vmax.f32 %v1556_v17, 0.0 }
 0x4cf   :  { %1623 = vst.msk [vmem:[%s2547_s11] sm:$0xff] %vm225_vm3, %v1607_v22  ;;  %v1608_v26 = vmax.f32 %v1548_v23, 0.0 }
 0x4d0   :  { %1626 = vst.msk [vmem:[%s2547_s11 + $0x18] sm:$0xff] %vm225_vm3, %v1610_v24 }
 0x4d1   :  { %1624 = vst.msk [vmem:[%s2547_s11 + $0x8] sm:$0xff] %vm225_vm3, %v1608_v26  ;;  %v1968_v28 = vpop.f32.mrb[52].mxu0 }
 0x4d2   :  { %v1569_v31 = vadd.f32 %v1968_v28, %v1711_v14  ;;  %v1560_v32 = vpop.f32.mrb[53].mxu0 }
 0x4d3   :  { %v1561_v34 = vadd.f32 %v1711_v14, %v1560_v32  ;;  %v1969_v35 = vpop.f32.mrb[54].mxu0 }
 0x4d4   :  { %v1613_v37 = vmax.f32 %v1569_v31, 0.0  ;;  %v1572_v38 = vadd.f32 %v1969_v35, %v1711_v14  ;;  %v1563_v40 = vpop.f32.mrb[55].mxu0 }
 0x4d5   :  { %v1611_v43 = vmax.f32 %v1561_v34, 0.0  ;;  %v1564_v44 = vadd.f32 %v1711_v14, %v1563_v40 }
 0x4d6   :  { %1629 = vst.msk [vmem:[%s2547_s11 + $0x30] sm:$0xff] %vm225_vm3, %v1613_v37  ;;  %v1614_v46 = vmax.f32 %v1572_v38, 0.0 }
 0x4d7   :  { %1627 = vst.msk [vmem:[%s2547_s11 + $0x20] sm:$0xff] %vm225_vm3, %v1611_v43  ;;  %v1612_v29 = vmax.f32 %v1564_v44, 0.0 }
 0x4d8   :  { %1630 = vst.msk [vmem:[%s2547_s11 + $0x38] sm:$0xff] %vm225_vm3, %v1614_v46 }
 0x4d9   :  { %1628 = vst.msk [vmem:[%s2547_s11 + $0x28] sm:$0xff] %vm225_vm3, %v1612_v29 }
 0x4db   :  { %v1972_v47 = vpop.f32.mrb[56].mxu0 }
 0x4dc   :  { %v1585_v48 = vadd.f32 %v1972_v47, %v1711_v14  ;;  %v1576_v39 = vpop.f32.mrb[57].mxu0 }
 0x4dd   :  { %v1577_v45 = vadd.f32 %v1711_v14, %v1576_v39  ;;  %v1973_v36 = vpop.f32.mrb[58].mxu0 }
 0x4de   :  { %v1617_v52 = vmax.f32 %v1585_v48, 0.0  ;;  %v1588_v54 = vadd.f32 %v1973_v36, %v1711_v14  ;;  %v1579_v41 = vpop.f32.mrb[59].mxu0 }
 0x4df   :  { %v1615_v55 = vmax.f32 %v1577_v45, 0.0  ;;  %v1580_v57 = vadd.f32 %v1711_v14, %v1579_v41 }
 0x4e0   :  { %1633 = vst.msk [vmem:[%s2547_s11 + $0x50] sm:$0xff] %vm225_vm3, %v1617_v52  ;;  %v1618_v56 = vmax.f32 %v1588_v54, 0.0 }
 0x4e1   :  { %1631 = vst.msk [vmem:[%s2547_s11 + $0x40] sm:$0xff] %vm225_vm3, %v1615_v55  ;;  %v1616_v49 = vmax.f32 %v1580_v57, 0.0 }
 0x4e2   :  { %1634 = vst.msk [vmem:[%s2547_s11 + $0x58] sm:$0xff] %vm225_vm3, %v1618_v56 }
 0x4e3   :  { %1632 = vst.msk [vmem:[%s2547_s11 + $0x48] sm:$0xff] %vm225_vm3, %v1616_v49  ;;  %v1976_v53 = vpop.f32.mrb[60].mxu0 }
 0x4e4   :  { %v1601_v59 = vadd.f32 %v1976_v53, %v1711_v14  ;;  %v1592_v25 = vpop.f32.mrb[61].mxu0 }
 0x4e5   :  { %v1593_v27 = vadd.f32 %v1711_v14, %v1592_v25  ;;  %v1977_v30 = vpop.f32.mrb[62].mxu0 }
 0x4e6   :  { %v1621_v33 = vmax.f32 %v1601_v59, 0.0  ;;  %v1604_v0 = vadd.f32 %v1977_v30, %v1711_v14  ;;  %v1595_v42 = vpop.f32.mrb[63].mxu0 }
 0x4e7   :  { %v1619_v50 = vmax.f32 %v1593_v27, 0.0  ;;  %v1596_v51 = vadd.f32 %v1711_v14, %v1595_v42 }
 0x4e8   :  { %1637 = vst.msk [vmem:[%s2547_s11 + $0x70] sm:$0xff] %vm225_vm3, %v1621_v33  ;;  %v1622_v58 = vmax.f32 %v1604_v0, 0.0 }
 0x4e9   :  { %1635 = vst.msk [vmem:[%s2547_s11 + $0x60] sm:$0xff] %vm225_vm3, %v1619_v50  ;;  %v1620_v60 = vmax.f32 %v1596_v51, 0.0 }
 0x4ea   :  { %1638 = vst.msk [vmem:[%s2547_s11 + $0x78] sm:$0xff] %vm225_vm3, %v1622_v58 }
 0x4eb   :  { %1636 = vst.msk [vmem:[%s2547_s11 + $0x68] sm:$0xff] %vm225_vm3, %v1620_v60 }

// kernel: multi_head_cross_attention.3
= control target key start
LH: loop header
LB: loop body
LE: loop exit
PB: predicated region body
PF: predicated region fallthrough
CT: control target
= control target key end

     0   :  { %s7119_s18 = smov 0   ;;  %s8535_s0 = inlined_call_operand.vmem [shape: bf16[2,456,8], index: 0, kind: input, shape index: {}]   ;;  %s8536_s1 = inlined_call_operand.vmem [shape: bf16[9,8,8], index: 1, kind: input, shape index: {}]   ;;  %s8537_s2 = inlined_call_operand.vmem [shape: f32[1,8], index: 2, kind: input, shape index: {}]   ;;  %s8538_s3 = inlined_call_operand.vmem [shape: bf16[8,4], index: 3, kind: input, shape index: {}]   ;;  %s8539_s4 = inlined_call_operand.vmem [shape: f32[1,4], index: 4, kind: input, shape index: {}]   ;;  %s8540_s5 = inlined_call_operand.vmem [shape: f32[2,384,4], index: 5, kind: output, shape index: {}]  }
   0x1 LB: > { %s5397_s19 = sadd.s32 4294967295, %s7087_s18   ;;  %p5401_p0 = scmp.ge.s32.totalorder %s7087_s18, 1  ;;  %s7087_s18 = sphi %s7119_s18, %s15_s18  }
   0x2   : > { %p187_p1 = scmp.lt.s32.totalorder %s7087_s18, 3 }
   0x4   : > { %p188_p2 = pnand %p5401_p0, %p187_p1 }
   0x6   : > { %191 = sbr.rel (%p188_p2) target bundleno = 946 (0x3b2), region = 40 }
   0xd   : > { %vm671_vm0 = vcmask 1043456   ;;  %v5553_v0 = vld [vmem:[%s8536_s1 + $0x10] sm:$0xf]  ;;  %v5404_v1 = vld [vmem:[%s8536_s1 + $0x4] sm:$0xf]  ;;  %p215_p3 = scmp.lt.s32.totalorder %s5397_s19, 1 }
   0xe   : > { %6920 = vmatprep.subr.msk.bf16.mxu0 %vm671_vm0, %v5553_v0  ;;  %6916 = vmatprep.subr.msk.bf16.mxu1 %vm671_vm0, %v5404_v1  ;;  %v2541_v2 = vsel %vm671_vm0, %v5553_v0, 0  ;;  %v673_v3 = vsel %vm671_vm0, %v5404_v1, 0  ;;  %v5603_v4 = vld [vmem:[%s8536_s1 + $0x14] sm:$0xf]  ;;  %v274_v5 = vld [vmem:[%s8536_s1] sm:$0xf] }
   0xf   : > { %6233 = vmatpush3.bf16.msra.mxu0 %v2541_v2  ;;  %6033 = vmatpush3.bf16.msra.mxu1 %v673_v3  ;;  %s8563_s19 = smov (!%p215_p3, %s5397_s19), 1  ;;  %vm401_vm1 = vsmask.f32 7424  ;;  %vm598_vm2 = vcmask 64512   ;;  %v7154_v6 = vsel %vm671_vm0, %v5603_v4, 0  ;;  %v949_v12 = vsel %vm671_vm0, %v274_v5, 0 }
  0x10   : > { %6921 = vmatprep.subr.msk.bf16.mxu0 %vm671_vm0, %v5603_v4  ;;  %6917 = vmatprep.subr.msk.bf16.mxu1 %vm671_vm0, %v274_v5  ;;  %s6926_s28 = smul.u32 228, %s8563_s19  ;;  %v5629_v52 = vld [vmem:[%s8536_s1 + $0x18] sm:$0xf]  ;;  %vm1182_vm3 = vcmask 1046528   ;;  %vm5293_vm4 = vcmask 31744  }
  0x11   : > { %s6927_s25 = smul.u32 384, %s8563_s19 }
  0x12   : > { %s7151_s6 = scalar_lea.vmem %s8535_s0, %s6926_s28 }
  0x13   : > { %v226_v7 = vld [vmem:[%s7151_s6] sm:$0xf]  ;;  %v227_v8 = vld [vmem:[%s7151_s6 + $0x4] sm:$0xf]  ;;  %v6937_v10 = vld [vmem:[%s7151_s6 + $0x8] sm:$0xff]   ;;  %s8387_s30 = scalar_lea.vmem %s8540_s5, %s6927_s25 }
  0x14   : > { %v7158_v9 = vcombine.low %v226_v7, %v227_v8  ;;  %v2098_v11 = vld [vmem:[%s7151_s6 + $0xc] sm:$0xf]  ;;  %v7164_v13 = vld [vmem:[%s7151_s6 + $0x10] sm:$0xf]  ;;  %v410_v16 = vshll.u32 %v6937_v10, 16  ;;  %v414_v17 = vshrl.u32 %v6937_v10, 16 }
  0x15   : > { %v7169_v18 = vld [vmem:[%s7151_s6 + $0x14] sm:$0xff]   ;;  %v5554_v20 = vcombine.low %v2098_v11, %v7164_v13  ;;  %v7176_v28 = vld [vmem:[%s7151_s6 + $0x1c] sm:$0xff]   ;;  %v7180_v34 = vld [vmem:[%s7151_s6 + $0x24] sm:$0xff]  }
  0x16   : > { %v403_v14 = vshrl.u32 %v7158_v9, 16  ;;  %v405_v15 = vshll.u32 %v7158_v9, 16  ;;  %v6940_v19 = vld [vmem:[%s7151_s6 + $0x10] sm:$0xff]   ;;  %v412_v22 = vrot.slane %v410_v16, 1  ;;  %v2280_v23 = vshll.u32 %v7169_v18, 16  ;;  %v6942_v32 = vld [vmem:[%s7151_s6 + $0x18] sm:$0xff]  }
  0x17   : > { %v2284_v24 = vshrl.u32 %v7169_v18, 16  ;;  %v2273_v25 = vshrl.u32 %v5554_v20, 16  ;;  %v2275_v26 = vshll.u32 %v5554_v20, 16  ;;  %v418_v27 = vshll.u32 %v6940_v19, 16  ;;  %v6944_v47 = vld [vmem:[%s7151_s6 + $0x20] sm:$0xff]   ;;  %v7191_v51 = vld [vmem:[%s7151_s6 + $0x2c] sm:$0xff]  }
  0x18   : > { %v407_v21 = vrot.slane %v405_v15, 1  ;;  %v416_v30 = vor.u32 %v414_v17, %v412_v22  ;;  %v2282_v31 = vrot.slane %v2280_v23, 1  ;;  %v422_v33 = vshrl.u32 %v6940_v19, 16  ;;  %v6946_v57 = vld [vmem:[%s7151_s6 + $0x28] sm:$0xff]   ;;  %v7207_v2 = vld [vmem:[%s7151_s6 + $0x34] sm:$0xff]   ;;  %v7217_v16 = vld [vmem:[%s7151_s6 + $0x3c] sm:$0xff]  }
  0x19   : > { %v2277_v35 = vrot.slane %v2275_v26, 1  ;;  %v420_v36 = vrot.slane %v418_v27, 1  ;;  %v2288_v37 = vshll.u32 %v7176_v28, 16  ;;  %v2292_v38 = vshrl.u32 %v7176_v28, 16  ;;  %v6948_v7 = vld [vmem:[%s7151_s6 + $0x30] sm:$0xff]   ;;  %v6950_v19 = vld [vmem:[%s7151_s6 + $0x38] sm:$0xff]  }
  0x1a   : > { %v408_v29 = vor.u32 %v407_v21, %v403_v14  ;;  %v2286_v40 = vor.u32 %v2284_v24, %v2282_v31  ;;  %v426_v41 = vshll.u32 %v6942_v32, 16  ;;  %v2296_v42 = vshll.u32 %v7180_v34, 16  ;;  %v7226_v27 = vld [vmem:[%s7151_s6 + $0x44] sm:$0xff]  }
  0x1b   : > { %v2278_v43 = vor.u32 %v2277_v35, %v2273_v25  ;;  %v421_v44 = vsel %vm401_vm1, %v416_v30, %v420_v36  ;;  %v2290_v45 = vrot.slane %v2288_v37, 1  ;;  %v424_v46 = vor.u32 %v422_v33, %v420_v36 }
  0x1c   : > { %v413_v39 = vsel %vm401_vm1, %v408_v29, %v412_v22  ;;  %v428_v48 = vrot.slane %v426_v41, 1  ;;  %v2298_v49 = vrot.slane %v2296_v42, 1  ;;  %v430_v50 = vshrl.u32 %v6942_v32, 16  ;;  %v6952_v32 = vld [vmem:[%s7151_s6 + $0x40] sm:$0xff]  }
  0x1d   : > { %6034 = vmatprep.mubr.msk.bf16.mxu1 %vm598_vm2, %v413_v39  ;;  %v2283_v53 = vsel %vm401_vm1, %v2278_v43, %v2282_v31  ;;  %v2291_v54 = vsel %vm401_vm1, %v2286_v40, %v2290_v45  ;;  %v2294_v55 = vor.u32 %v2292_v38, %v2290_v45  ;;  %v434_v56 = vshll.u32 %v6944_v47, 16  ;;  %v7235_v38 = vld [vmem:[%s7151_s6 + $0x4c] sm:$0xff]  }
  0x1e   : > { %6035 = vmatmul.mubr.msk.bf16.vlgmr.msra.gmra.mrb[0].mxu1 %vm598_vm2, %v421_v44  ;;  %6234 = vmatprep.mubr.msk.bf16.mxu0 %vm598_vm2, %v2283_v53  ;;  %v429_v58 = vsel %vm401_vm1, %v424_v46, %v428_v48  ;;  %v432_v59 = vor.u32 %v430_v50, %v428_v48  ;;  %v2300_v60 = vshrl.u32 %v7180_v34, 16  ;;  %v2304_v61 = vshll.u32 %v7191_v51, 16  ;;  %v6954_v39 = vld [vmem:[%s7151_s6 + $0x48] sm:$0xff]   ;;  %v7241_v46 = vld [vmem:[%s7151_s6 + $0x54] sm:$0xff]  }
  0x1f   : > { %6083 = vmatpush3.bf16.msra.mxu1 %v949_v12  ;;  %6235 = vmatmul.mubr.msk.bf16.vlgmr.msra.gmra.mrb[0].mxu0 %vm598_vm2, %v2291_v54  ;;  %v2299_v62 = vsel %vm401_vm1, %v2294_v55, %v2298_v49  ;;  %v436_v63 = vrot.slane %v434_v56, 1  ;;  %v438_v0 = vshrl.u32 %v6944_v47, 16  ;;  %v442_v1 = vshll.u32 %v6946_v57, 16  ;;  %v7249_v55 = vld [vmem:[%s7151_s6 + $0x50] sm:$0xff]  }
  0x20   : > { %6038 = vmatprep.mubr.msk.bf16.mxu1 %vm598_vm2, %v429_v58  ;;  %6283 = vmatpush3.bf16.msra.mxu0 %v7154_v6  ;;  %v2302_v3 = vor.u32 %v2300_v60, %v2298_v49  ;;  %v2306_v4 = vrot.slane %v2304_v61, 1  ;;  %v2308_v5 = vshrl.u32 %v7191_v51, 16  ;;  %v446_v8 = vshrl.u32 %v6946_v57, 16 }
  0x21   : > { %6238 = vmatprep.mubr.msk.bf16.mxu0 %vm598_vm2, %v2299_v62  ;;  %v437_v10 = vsel %vm401_vm1, %v432_v59, %v436_v63  ;;  %v440_v11 = vor.u32 %v438_v0, %v436_v63  ;;  %v444_v12 = vrot.slane %v442_v1, 1  ;;  %v2312_v14 = vshll.u32 %v7207_v2, 16  ;;  %6922 = vmatprep.subr.msk.bf16.mxu0 %vm671_vm0, %v5629_v52  ;;  %v7256_v62 = vld [vmem:[%s7151_s6 + $0x58] sm:$0xff]  }
  0x22   : > { %v2310_v15 = vor.u32 %v2308_v5, %v2306_v4  ;;  %v450_v6 = vshll.u32 %v6948_v7, 16  ;;  %v2316_v17 = vshrl.u32 %v7207_v2, 16  ;;  %v454_v22 = vshrl.u32 %v6948_v7, 16  ;;  %v7260_v0 = vld [vmem:[%s7151_s6 + $0x5c] sm:$0xff]  }
  0x23   : > { %v445_v20 = vsel %vm401_vm1, %v440_v11, %v444_v12  ;;  %v2314_v21 = vrot.slane %v2312_v14, 1  ;;  %v2307_v23 = vsel %vm401_vm1, %v2302_v3, %v2306_v4  ;;  %v2320_v25 = vshll.u32 %v7217_v16, 16  ;;  %v7267_v11 = vld [vmem:[%s7151_s6 + $0x64] sm:$0xff]  }
  0x24   : > { %v452_v24 = vrot.slane %v450_v6, 1  ;;  %v458_v26 = vshll.u32 %v6950_v19, 16  ;;  %v448_v30 = vor.u32 %v446_v8, %v444_v12  ;;  %v2324_v31 = vshrl.u32 %v7217_v16, 16  ;;  %v7270_v12 = vld [vmem:[%s7151_s6 + $0x60] sm:$0xff]  }
  0x25   : > { %v2315_v29 = vsel %vm401_vm1, %v2310_v15, %v2314_v21  ;;  %v2322_v36 = vrot.slane %v2320_v25, 1  ;;  %v2328_v37 = vshll.u32 %v7226_v27, 16  ;;  %v2318_v40 = vor.u32 %v2316_v17, %v2314_v21 }
  0x26   : > { %6039 = vmatmul.mubr.msk.bf16.gmra.mrb[4].mxu1 %vm598_vm2, %v437_v10  ;;  %v456_v33 = vor.u32 %v454_v22, %v452_v24  ;;  %v460_v35 = vrot.slane %v458_v26, 1  ;;  %v466_v41 = vshll.u32 %v6952_v32, 16  ;;  %v453_v42 = vsel %vm401_vm1, %v448_v30, %v452_v24  ;;  %v7283_v24 = vld [vmem:[%s7151_s6 + $0x68] sm:$0xff]  }
  0x27   : > { %6042 = vmatprep.mubr.msk.bf16.mxu1 %vm598_vm2, %v445_v20  ;;  %6239 = vmatmul.mubr.msk.bf16.gmra.mrb[4].mxu0 %vm598_vm2, %v2307_v23  ;;  %v2326_v43 = vor.u32 %v2324_v31, %v2322_v36  ;;  %v2330_v44 = vrot.slane %v2328_v37, 1  ;;  %v462_v45 = vshrl.u32 %v6950_v19, 16  ;;  %v470_v48 = vshrl.u32 %v6952_v32, 16  ;;  %v7277_v19 = vld [vmem:[%s7151_s6 + $0x6c] sm:$0xff]   ;;  %v7293_v37 = vld [vmem:[%s7151_s6 + $0x74] sm:$0xff]  }
  0x28   : > { %6242 = vmatprep.mubr.msk.bf16.mxu0 %vm598_vm2, %v2315_v29  ;;  %v461_v47 = vsel %vm401_vm1, %v456_v33, %v460_v35  ;;  %v474_v49 = vshll.u32 %v6954_v39, 16  ;;  %v2336_v50 = vshll.u32 %v7235_v38, 16  ;;  %v2323_v52 = vsel %vm401_vm1, %v2318_v40, %v2322_v36 }
  0x29   : > { %v468_v53 = vrot.slane %v466_v41, 1  ;;  %v2332_v54 = vshrl.u32 %v7226_v27, 16  ;;  %v2331_v56 = vsel %vm401_vm1, %v2326_v43, %v2330_v44  ;;  %v464_v57 = vor.u32 %v462_v45, %v460_v35  ;;  %v7299_v41 = vld [vmem:[%s7151_s6 + $0x70] sm:$0xff]  }
  0x2a   : > { %v2340_v58 = vshrl.u32 %v7235_v38, 16  ;;  %v2344_v59 = vshll.u32 %v7241_v46, 16  ;;  %v476_v61 = vrot.slane %v474_v49, 1  ;;  %v2338_v63 = vrot.slane %v2336_v50, 1  ;;  %v7308_v50 = vld [vmem:[%s7151_s6 + $0x78] sm:$0xff]  }
  0x2b   : > { %v472_v60 = vor.u32 %v470_v48, %v468_v53  ;;  %v2334_v1 = vor.u32 %v2332_v54, %v2330_v44  ;;  %v478_v3 = vshrl.u32 %v6954_v39, 16  ;;  %v482_v4 = vshll.u32 %v7249_v55, 16  ;;  %8548 = vst [vmem:[#allocation2_spill] sm:$0xff] %v7308_v50  ;;  %v7313_v54 = vld [vmem:[%s7151_s6 + $0x84] sm:$0xff]  }
  0x2c   : > { %v469_v5 = vsel %vm401_vm1, %v464_v57, %v468_v53  ;;  %v2342_v7 = vor.u32 %v2340_v58, %v2338_v63  ;;  %v2346_v8 = vrot.slane %v2344_v59, 1  ;;  %v2348_v10 = vshrl.u32 %v7241_v46, 16 }
  0x2d   : > { %v477_v14 = vsel %vm401_vm1, %v472_v60, %v476_v61  ;;  %v486_v15 = vshrl.u32 %v7249_v55, 16  ;;  %v490_v6 = vshll.u32 %v7256_v62, 16  ;;  %v2352_v17 = vshll.u32 %v7260_v0, 16 }
  0x2e   : > { %6043 = vmatmul.mubr.msk.bf16.gmra.mrb[8].mxu1 %vm598_vm2, %v453_v42  ;;  %v2339_v20 = vsel %vm401_vm1, %v2334_v1, %v2338_v63  ;;  %v480_v21 = vor.u32 %v478_v3, %v476_v61  ;;  %v484_v22 = vrot.slane %v482_v4, 1  ;;  %v2356_v23 = vshrl.u32 %v7260_v0, 16  ;;  %v7322_v1 = vld [vmem:[%s7151_s6 + $0x80] sm:$0xff]  }
  0x2f   : > { %6046 = vmatprep.mubr.msk.bf16.mxu1 %vm598_vm2, %v461_v47  ;;  %6243 = vmatmul.mubr.msk.bf16.gmra.mrb[8].mxu0 %vm598_vm2, %v2323_v52  ;;  %v2347_v25 = vsel %vm401_vm1, %v2342_v7, %v2346_v8  ;;  %v2360_v26 = vshll.u32 %v7267_v11, 16  ;;  %v498_v29 = vshll.u32 %v7270_v12, 16  ;;  %v492_v31 = vrot.slane %v490_v6, 1  ;;  %v7303_v47 = vld [vmem:[%s7151_s6 + $0x7c] sm:$0xff]   ;;  %8549 = vst [vmem:[#allocation3_spill] sm:$0xff] %v7322_v1 }
  0x30   : > { %6246 = vmatprep.mubr.msk.bf16.mxu0 %vm598_vm2, %v2331_v56  ;;  %v488_v30 = vor.u32 %v486_v15, %v484_v22  ;;  %v2350_v32 = vor.u32 %v2348_v10, %v2346_v8  ;;  %v2354_v33 = vrot.slane %v2352_v17, 1  ;;  %v494_v35 = vshrl.u32 %v7256_v62, 16  ;;  %v7327_v8 = vld [vmem:[%s7151_s6 + $0x8c] sm:$0xff]  }
  0x31   : > { %v2368_v36 = vshll.u32 %v7277_v19, 16  ;;  %v485_v39 = vsel %vm401_vm1, %v480_v21, %v484_v22  ;;  %v506_v40 = vshll.u32 %v7283_v24, 16  ;;  %v2362_v43 = vrot.slane %v2360_v26, 1  ;;  %v7330_v10 = vld [vmem:[%s7151_s6 + $0x88] sm:$0xff]   ;;  %v7338_v22 = vld [vmem:[%s7151_s6 + $0x94] sm:$0xff]  }
  0x32   : > { %v2358_v42 = vor.u32 %v2356_v23, %v2354_v33  ;;  %v500_v44 = vrot.slane %v498_v29, 1  ;;  %v2364_v45 = vshrl.u32 %v7267_v11, 16  ;;  %v493_v48 = vsel %vm401_vm1, %v488_v30, %v492_v31  ;;  %8550 = vst [vmem:[#allocation4_spill] sm:$0xff] %v7330_v10 }
  0x33   : > { %v502_v49 = vshrl.u32 %v7270_v12, 16  ;;  %v2355_v52 = vsel %vm401_vm1, %v2350_v32, %v2354_v33  ;;  %v2372_v53 = vshrl.u32 %v7277_v19, 16  ;;  %v2370_v56 = vrot.slane %v2368_v36, 1 }
  0x34   : > { %v508_v57 = vrot.slane %v506_v40, 1  ;;  %v2376_v58 = vshll.u32 %v7293_v37, 16  ;;  %v514_v59 = vshll.u32 %v7299_v41, 16  ;;  %v2363_v60 = vsel %vm401_vm1, %v2358_v42, %v2362_v43  ;;  %v7349_v40 = vld [vmem:[%s7151_s6 + $0x90] sm:$0xff]   ;;  %v7352_v42 = vld [vmem:[%s7151_s6 + $0x98] sm:$0xff]  }
  0x35   : > { %v496_v61 = vor.u32 %v494_v35, %v492_v31  ;;  %v510_v63 = vshrl.u32 %v7283_v24, 16  ;;  %v2366_v3 = vor.u32 %v2364_v45, %v2362_v43  ;;  %v504_v4 = vor.u32 %v502_v49, %v500_v44  ;;  %8551 = vst [vmem:[#allocation5_spill] sm:$0xff] %v7349_v40  ;;  %8552 = vst [vmem:[#allocation6_spill] sm:$0xff] %v7352_v42  ;;  %v7358_v49 = vld [vmem:[%s7151_s6 + $0x9c] sm:$0xff]  }
  0x36   : > { %6047 = vmatmul.mubr.msk.bf16.gmra.mrb[12].mxu1 %vm598_vm2, %v469_v5  ;;  %v2380_v5 = vshrl.u32 %v7293_v37, 16  ;;  %v2384_v7 = vshll.u32 %v7303_v47, 16  ;;  %v2392_v15 = vshll.u32 %v7313_v54, 16  ;;  %v2374_v6 = vor.u32 %v2372_v53, %v2370_v56 }
  0x37   : > { %6050 = vmatprep.mubr.msk.bf16.mxu1 %vm598_vm2, %v477_v14  ;;  %6247 = vmatmul.mubr.msk.bf16.gmra.mrb[12].mxu0 %vm598_vm2, %v2339_v20  ;;  %v522_v14 = vshll.u32 %v7308_v50, 16  ;;  %v2378_v17 = vrot.slane %v2376_v58, 1  ;;  %v516_v20 = vrot.slane %v514_v59, 1  ;;  %v518_v21 = vshrl.u32 %v7299_v41, 16 }
  0x38   : > { %6250 = vmatprep.mubr.msk.bf16.mxu0 %vm598_vm2, %v2347_v25  ;;  %v501_v23 = vsel %vm401_vm1, %v496_v61, %v500_v44  ;;  %v2388_v25 = vshrl.u32 %v7303_v47, 16  ;;  %v530_v26 = vshll.u32 %v7322_v1, 16  ;;  %v2371_v29 = vsel %vm401_vm1, %v2366_v3, %v2370_v56 }
  0x39   : > { %v509_v30 = vsel %vm401_vm1, %v504_v4, %v508_v57  ;;  %v2400_v31 = vshll.u32 %v7327_v8, 16  ;;  %v538_v32 = vshll.u32 %v7330_v10, 16  ;;  %v2386_v33 = vrot.slane %v2384_v7, 1 }
  0x3a   : > { %v524_v35 = vrot.slane %v522_v14, 1  ;;  %v2394_v36 = vrot.slane %v2392_v15, 1  ;;  %v2379_v43 = vsel %vm401_vm1, %v2374_v6, %v2378_v17  ;;  %v512_v44 = vor.u32 %v510_v63, %v508_v57  ;;  %v7366_v63 = vld [vmem:[%s7151_s6 + $0xa4] sm:$0xff]  }
  0x3b   : > { %v2382_v45 = vor.u32 %v2380_v5, %v2378_v17  ;;  %v2396_v53 = vshrl.u32 %v7313_v54, 16  ;;  %v534_v56 = vshrl.u32 %v7322_v1, 16  ;;  %v2404_v58 = vshrl.u32 %v7327_v8, 16  ;;  %v7371_v5 = vld [vmem:[%s7151_s6 + $0xa0] sm:$0xff]  }
  0x3c   : > { %v520_v59 = vor.u32 %v518_v21, %v516_v20  ;;  %v540_v61 = vrot.slane %v538_v32, 1  ;;  %v542_v57 = vshrl.u32 %v7330_v10, 16  ;;  %v2390_v3 = vor.u32 %v2388_v25, %v2386_v33 }
  0x3d   : > { %v554_v4 = vshll.u32 %v7352_v42, 16  ;;  %v546_v14 = vshll.u32 %v7349_v40, 16  ;;  %v2412_v15 = vshrl.u32 %v7338_v22, 16  ;;  %v2416_v6 = vshll.u32 %v7358_v49, 16 }
  0x3e   : > { %6051 = vmatmul.mubr.msk.bf16.gmra.mrb[16].mxu1 %vm598_vm2, %v485_v39  ;;  %v526_v39 = vshrl.u32 %v7308_v50, 16  ;;  %v517_v17 = vsel %vm401_vm1, %v512_v44, %v516_v20  ;;  %v550_v21 = vshrl.u32 %v7349_v40, 16  ;;  %v2387_v25 = vsel %vm401_vm1, %v2382_v45, %v2386_v33  ;;  %v7390_v44 = vld [vmem:[%s7151_s6 + $0xa8] sm:$0xff]  }
  0x3f   : > { %6054 = vmatprep.mubr.msk.bf16.mxu1 %vm598_vm2, %v493_v48  ;;  %6251 = vmatmul.mubr.msk.bf16.gmra.mrb[16].mxu0 %vm598_vm2, %v2355_v52  ;;  %v2408_v48 = vshll.u32 %v7338_v22, 16  ;;  %v532_v52 = vrot.slane %v530_v26, 1  ;;  %v525_v26 = vsel %vm401_vm1, %v520_v59, %v524_v35  ;;  %v2395_v32 = vsel %vm401_vm1, %v2390_v3, %v2394_v36 }
  0x40   : > { %6254 = vmatprep.mubr.msk.bf16.mxu0 %vm598_vm2, %v2363_v60  ;;  %v2402_v60 = vrot.slane %v2400_v31, 1  ;;  %v7384_v31 = vld [vmem:[%s7151_s6 + $0xac] sm:$0xff]   ;;  %v562_v20 = vshll.u32 %v7371_v5, 16  ;;  %v2398_v40 = vor.u32 %v2396_v53, %v2394_v36  ;;  %v548_v45 = vrot.slane %v546_v14, 1 }
  0x41   : > { %v2410_v7 = vrot.slane %v2408_v48, 1  ;;  %v558_v48 = vshrl.u32 %v7352_v42, 16  ;;  %v536_v33 = vor.u32 %v534_v56, %v532_v52  ;;  %v2418_v59 = vrot.slane %v2416_v6, 1 }
  0x42   : > { %v552_v42 = vor.u32 %v550_v21, %v548_v45  ;;  %v2432_v50 = vshll.u32 %v7384_v31, 16  ;;  %v564_v53 = vrot.slane %v562_v20, 1  ;;  %v570_v56 = vshll.u32 %v7390_v44, 16 }
  0x43   : > { %v2414_v3 = vor.u32 %v2412_v15, %v2410_v7  ;;  %v566_v14 = vshrl.u32 %v7371_v5, 16  ;;  %v7403_v15 = vld [vmem:[%s7151_s6 + $0xb4] sm:$0xff]   ;;  %v2436_v6 = vshrl.u32 %v7384_v31, 16 }
  0x46   : > { %6055 = vmatmul.mubr.msk.bf16.gmra.mrb[20].mxu1 %vm598_vm2, %v501_v23  ;;  %v2420_v23 = vshrl.u32 %v7358_v49, 16 }
  0x47   : > { %6058 = vmatprep.mubr.msk.bf16.mxu1 %vm598_vm2, %v509_v30  ;;  %6255 = vmatmul.mubr.msk.bf16.gmra.mrb[20].mxu0 %vm598_vm2, %v2371_v29  ;;  %v528_v29 = vor.u32 %v526_v39, %v524_v35  ;;  %v2424_v30 = vshll.u32 %v7366_v63, 16  ;;  %v2406_v35 = vor.u32 %v2404_v58, %v2402_v60  ;;  %v544_v39 = vor.u32 %v542_v57, %v540_v61 }
  0x48   : > { %6258 = vmatprep.mubr.msk.bf16.mxu0 %vm598_vm2, %v2379_v43  ;;  %v556_v43 = vrot.slane %v554_v4, 1  ;;  %v2428_v4 = vshrl.u32 %v7366_v63, 16  ;;  %v2422_v10 = vor.u32 %v2420_v23, %v2418_v59  ;;  %v2403_v57 = vsel %vm401_vm1, %v2398_v40, %v2402_v60 }
  0x49   : > { %v2426_v1 = vrot.slane %v2424_v30, 1  ;;  %v533_v58 = vsel %vm401_vm1, %v528_v29, %v532_v52  ;;  %v2411_v21 = vsel %vm401_vm1, %v2406_v35, %v2410_v7  ;;  %v549_v23 = vsel %vm401_vm1, %v544_v39, %v548_v45  ;;  %v7424_v30 = vld [vmem:[%s7151_s6 + $0xbc] sm:$0xff]  }
  0x4a   : > { %v560_v36 = vor.u32 %v558_v48, %v556_v43  ;;  %v557_v40 = vsel %vm401_vm1, %v552_v42, %v556_v43  ;;  %v7421_v29 = vrot.slane %v2432_v50, 1  ;;  %v7433_v48 = vld [vmem:[%s7151_s6 + $0xb8] sm:$0xff]   ;;  %v2823_v42 = vrot.slane %v7169_v18, 1 }
  0x4b   : > { %v7417_v52 = vsel %vm401_vm1, %v2422_v10, %v2426_v1  ;;  %v7419_v60 = vor.u32 %v2428_v4, %v2426_v1  ;;  %v7438_v1 = vor.u32 %v566_v14, %v564_v53  ;;  %v2440_v10 = vshll.u32 %v7403_v15, 16 }
  0x4c   : > { %v7428_v7 = vsel %vm401_vm1, %v560_v36, %v564_v53  ;;  %v7441_v50 = vor.u32 %v2436_v6, %v7421_v29  ;;  %v574_v43 = vshrl.u32 %v7390_v44, 16  ;;  %v2444_v45 = vshrl.u32 %v7403_v15, 16 }
  0x4d   : > { %v2825_v18 = vrot.slane %v7176_v28, 1  ;;  %v2827_v35 = vrot.slane %v7180_v34, 1  ;;  %v2829_v39 = vrot.slane %v7191_v51, 1  ;;  %v586_v4 = vshll.u32 %v7433_v48, 16  ;;  %v7465_v34 = vld [vmem:[%s8536_s1 + $0x8] sm:$0xf] }
  0x4e   : > { %6059 = vmatmul.mubr.msk.bf16.gmra.mrb[24].mxu1 %vm598_vm2, %v517_v17  ;;  %v541_v17 = vsel %vm401_vm1, %v536_v33, %v540_v61  ;;  %v2816_v61 = vld [vmem:[%s7151_s6 + $0xc] sm:$0xe]  ;;  %v2833_v28 = vrot.slane %v7217_v16, 1  ;;  %6918 = vmatprep.subr.msk.bf16.mxu1 %vm671_vm0, %v7465_v34  ;;  %v2839_v14 = vrot.slane %v7241_v46, 1  ;;  %v2841_v6 = vrot.slane %v7260_v0, 1 }
  0x4f   : > { %6062 = vmatprep.mubr.msk.bf16.mxu1 %vm598_vm2, %v525_v26  ;;  %6259 = vmatmul.mubr.msk.bf16.gmra.mrb[24].mxu0 %vm598_vm2, %v2387_v25  ;;  %v7410_v25 = vsel %vm401_vm1, %v2414_v3, %v2418_v59  ;;  %v7413_v26 = vld [vmem:[%s7151_s6 + $0xb0] sm:$0xff]   ;;  %v5604_v20 = vcombine.low %v2816_v61, %v7164_v13  ;;  %v2448_v59 = vshll.u32 %v7424_v30, 16  ;;  %v2831_v3 = vrot.slane %v7207_v2, 1 }
  0x50   : > { %6262 = vmatprep.mubr.msk.bf16.mxu0 %vm598_vm2, %v2395_v32  ;;  %v7430_v32 = vrot.slane %v570_v56, 1  ;;  %v578_v33 = vshll.u32 %v7413_v26, 16  ;;  %v7459_v53 = vsel %vm1182_vm3, %v2823_v42, %v2825_v18  ;;  %v7469_v51 = vsel %vm1182_vm3, %v2825_v18, %v2827_v35 }
  0x51   : > { %v2822_v13 = vrot.slane %v5604_v20, 1  ;;  %v7472_v2 = vsel %vm1182_vm3, %v2827_v35, %v2829_v39  ;;  %v7475_v56 = vsel %vm1182_vm3, %v2829_v39, %v2831_v3  ;;  %v7481_v16 = vsel %vm1182_vm3, %v2831_v3, %v2833_v28  ;;  %v6983_v39 = vld [vmem:[%s7151_s6 + $0xc4] sm:$0xff]  }
  0x52   : > { %v2847_v61 = vrot.slane %v7293_v37, 1  ;;  %v7499_v46 = vsel %vm1182_vm3, %v2839_v14, %v2841_v6  ;;  %v2849_v0 = vrot.slane %v7303_v47, 1  ;;  %v2853_v47 = vrot.slane %v7327_v8, 1 }
  0x53   : > { %v7456_v36 = vsel %vm1182_vm3, %v2822_v13, %v2823_v42  ;;  %v2851_v42 = vrot.slane %v7313_v54, 1  ;;  %v6985_v13 = vld [vmem:[%s7151_s6 + $0xcc] ss:$0 sps:$4 sm:$0x11]   ;;  %v2857_v35 = vrot.slane %v7358_v49, 1  ;;  %v2861_v54 = vrot.slane %v7384_v31, 1 }
  0x54   : > { %v7516_v18 = vsel %vm1182_vm3, %v2847_v61, %v2849_v0  ;;  %v2865_v49 = vrot.slane %v7424_v30, 1 }
  0x55   : > { %v7523_v3 = vsel %vm1182_vm3, %v2849_v0, %v2851_v42  ;;  %v582_v0 = vshrl.u32 %v7413_v26, 16 }
  0x56   : > { %6063 = vmatmul.mubr.msk.bf16.gmra.mrb[28].mxu1 %vm598_vm2, %v533_v58  ;;  %v2835_v58 = vrot.slane %v7226_v27, 1  ;;  %v2845_v27 = vrot.slane %v7277_v19, 1 }
  0x57   : > { %6066 = vmatprep.mubr.msk.bf16.mxu1 %vm598_vm2, %v541_v17  ;;  %6263 = vmatmul.mubr.msk.bf16.gmra.mrb[28].mxu0 %vm598_vm2, %v2403_v57  ;;  %v2837_v57 = vrot.slane %v7235_v38, 1 }
  0x58   : > { %6266 = vmatprep.mubr.msk.bf16.mxu0 %vm598_vm2, %v2411_v21  ;;  %v7487_v17 = vsel %vm1182_vm3, %v2833_v28, %v2835_v58  ;;  %v2843_v21 = vrot.slane %v7267_v11, 1  ;;  %v7510_v37 = vsel %vm1182_vm3, %v2845_v27, %v2847_v61  ;;  %v2859_v28 = vrot.slane %v7366_v63, 1 }
  0x59   : > { %v7493_v20 = vsel %vm1182_vm3, %v2835_v58, %v2837_v57  ;;  %v7496_v38 = vsel %vm1182_vm3, %v2837_v57, %v2839_v14  ;;  %v7531_v58 = vsel %vm1182_vm3, %v2851_v42, %v2853_v47  ;;  %v2867_v57 = vrot.slane %v6983_v39, 1 }
  0x5a   : > { %v7504_v11 = vsel %vm1182_vm3, %v2841_v6, %v2843_v21  ;;  %v7507_v19 = vsel %vm1182_vm3, %v2843_v21, %v2845_v27  ;;  %v7543_v63 = vsel %vm1182_vm3, %v2857_v35, %v2859_v28  ;;  %v7546_v31 = vsel %vm1182_vm3, %v2859_v28, %v2861_v54 }
  0x5b   : > { %v573_v14 = vsel %vm401_vm1, %v7438_v1, %v7430_v32  ;;  %v2442_v6 = vrot.slane %v2440_v10, 1  ;;  %v580_v27 = vrot.slane %v578_v33, 1  ;;  %v2450_v61 = vrot.slane %v2448_v59, 1 }
  0x5c   : > { %v7561_v42 = vsel %vm1182_vm3, %v2865_v49, %v2867_v57  ;;  %v2435_v1 = vsel %vm401_vm1, %v7419_v60, %v7421_v29  ;;  %v588_v10 = vrot.slane %v586_v4, 1  ;;  %v2452_v33 = vshrl.u32 %v7424_v30, 16 }
  0x5d   : > { %v2443_v59 = vsel %vm401_vm1, %v7441_v50, %v2442_v6  ;;  %v576_v28 = vor.u32 %v574_v43, %v7430_v32  ;;  %v590_v60 = vshrl.u32 %v7433_v48, 16  ;;  %v2446_v29 = vor.u32 %v2444_v45, %v2442_v6 }
  0x5e   : > { %6067 = vmatmul.mubr.msk.bf16.gmra.mrb[32].mxu1 %vm598_vm2, %v549_v23  ;;  %v2855_v23 = vrot.slane %v7338_v22, 1  ;;  %v2460_v4 = vshrl.u32 %v6983_v39, 16 }
  0x5f   : > { %6070 = vmatprep.mubr.msk.bf16.mxu1 %vm598_vm2, %v557_v40  ;;  %v2863_v40 = vrot.slane %v7403_v15, 1  ;;  %6267 = vmatmul.mubr.msk.bf16.gmra.mrb[32].mxu0 %vm598_vm2, %v7410_v25  ;;  %v581_v50 = vsel %vm401_vm1, %v576_v28, %v580_v27  ;;  %v2451_v32 = vsel %vm401_vm1, %v2446_v29, %v2450_v61  ;;  %v592_v45 = vor.u32 %v590_v60, %v588_v10  ;;  %v6992_v28 = vld [vmem:[%s7151_s6 + $0x38] sm:$0xff]  }
  0x60   : > { %v7534_v8 = vsel %vm1182_vm3, %v2853_v47, %v2855_v23  ;;  %v7537_v22 = vsel %vm1182_vm3, %v2855_v23, %v2857_v35  ;;  %6270 = vmatprep.mubr.msk.bf16.mxu0 %vm598_vm2, %v7417_v52  ;;  %v2869_v52 = vrot.slane %v6985_v13, 1  ;;  %v2456_v47 = vshll.u32 %v6983_v39, 16  ;;  %v7564_v23 = vld [vmem:[%s7151_s6 + $0xc0] ss:$0 sps:$4 sm:$0x11]  }
  0x61   : > { %v7549_v25 = vsel %vm1182_vm3, %v2861_v54, %v2863_v40  ;;  %v7557_v21 = vsel %vm1182_vm3, %v2863_v40, %v2865_v49  ;;  %v584_v54 = vor.u32 %v582_v0, %v580_v27  ;;  %v594_v30 = vshll.u32 %v7564_v23, 16  ;;  %v7612_v0 = vld [vmem:[%s7151_s6 + $0x8] sm:$0xff]  }
  0x62   : > { %v7567_v35 = vsel %vm1182_vm3, %v2867_v57, %v2869_v52  ;;  %v2454_v40 = vor.u32 %v2452_v33, %v2450_v61  ;;  %v2464_v57 = vshll.u32 %v6985_v13, 16  ;;  %v7062_v13 = vld [vmem:[%s8536_s1 + $0x18] sm:$0xf]  ;;  %v1305_v61 = vsel %vm671_vm0, %v7465_v34, 0 }
  0x63   : > { %v589_v49 = vsel %vm401_vm1, %v584_v54, %v588_v10  ;;  %v596_v43 = vrot.slane %v594_v30, 1  ;;  %v3462_v27 = vsel %vm671_vm0, %v7062_v13, 0  ;;  %v7633_v34 = vld [vmem:[%s7151_s6 + $0x18] sm:$0xff]   ;;  %v6993_v30 = vld [vmem:[%s7151_s6 + $0x40] sm:$0xff]  }
  0x64   : > { %v6997_v13 = vld [vmem:[%s7151_s6 + $0x60] sm:$0xff]  }
  0x65   : > { %v597_v6 = vsel %vm401_vm1, %v592_v45, %v596_v43  ;;  %v6995_v43 = vld [vmem:[%s7151_s6 + $0x50] sm:$0xff]  }
  0x66   : > { %6071 = vmatmul.mubr.msk.bf16.gmra.mrb[36].mxu1 %vm598_vm2, %v7428_v7  ;;  %v2458_v7 = vrot.slane %v2456_v47, 1  ;;  %v7638_v47 = vld [vmem:[%s7151_s6 + $0x20] sm:$0xff]  }
  0x67   : > { %6074 = vmatprep.mubr.msk.bf16.mxu1 %vm598_vm2, %v573_v14  ;;  %6271 = vmatmul.mubr.msk.bf16.gmra.mrb[36].mxu0 %vm598_vm2, %v2435_v1  ;;  %v2466_v14 = vrot.slane %v2464_v57, 1  ;;  %v7764_v1 = vld [vmem:[%s8536_s1 + $0x20] sm:$0xf]  ;;  %v6996_v57 = vld [vmem:[%s7151_s6 + $0x58] sm:$0xff]  }
  0x68   : > { %6274 = vmatprep.mubr.msk.bf16.mxu0 %vm598_vm2, %v2443_v59  ;;  %v2459_v15 = vsel %vm401_vm1, %v2454_v40, %v2458_v7  ;;  %v2462_v39 = vor.u32 %v2460_v4, %v2458_v7  ;;  %v6991_v59 = vld [vmem:[%s7151_s6 + $0x30] sm:$0xff]   ;;  %v6994_v4 = vld [vmem:[%s7151_s6 + $0x48] sm:$0xff]  }
  0x6a   : > { %v2467_v52 = vsel %vm401_vm1, %v2462_v39, %v2466_v14  ;;  %v7074_v39 = vld [vmem:[%s7151_s6 + $0x58] sm:$0xff]  }
  0x6b   : > { %v1204_v14 = vrot.slane %v7074_v39, 1  ;;  %v7884_v39 = vld [vmem:[%s7151_s6 + $0x30] sm:$0xff]  }
  0x6e   : > { %6075 = vmatmul.mubr.msk.bf16.gmra.mrb[40].mxu1 %vm598_vm2, %v581_v50 }
  0x6f   : > { %6078 = vmatprep.mubr.msk.bf16.mxu1 %vm598_vm2, %v589_v49  ;;  %6275 = vmatmul.mubr.msk.bf16.gmra.mrb[40].mxu0 %vm598_vm2, %v2451_v32 }
  0x70   : > { %6278 = vmatprep.mubr.msk.bf16.mxu0 %vm598_vm2, %v2459_v15  ;;  %v7073_v15 = vld [vmem:[%s7151_s6 + $0x50] sm:$0xff]  }
  0x71   : > { %v1202_v45 = vrot.slane %v7073_v15, 1 }
  0x76   : > { %6079 = vmatmul.mubr.msk.bf16.gmra.mrb[44].mxu1 %vm598_vm2, %v597_v6 }
  0x77   : > { %6084 = vmatprep.mubr.msk.bf16.mxu1 %vm598_vm2, %v7158_v9  ;;  %6279 = vmatmul.mubr.msk.bf16.gmra.mrb[44].mxu0 %vm598_vm2, %v2467_v52  ;;  %v7619_v9 = vld [vmem:[%s8536_s1 + $0x1c] sm:$0xf]  ;;  %v1205_v52 = vsel %vm1182_vm3, %v1202_v45, %v1204_v14 }
  0x78   : > { %6284 = vmatprep.mubr.msk.bf16.mxu0 %vm598_vm2, %v7456_v36  ;;  %v7622_v36 = vld [vmem:[%s7151_s6 + $0x10] sm:$0xff]  }
  0x7e   : > { %6085 = vmatmul.mubr.msk.bf16.vlgmr.msra.gmra.mrb[0].mxu1 %vm598_vm2, %v7612_v0 }
  0x7f   : > { %6088 = vmatprep.mubr.msk.bf16.mxu1 %vm598_vm2, %v7622_v36  ;;  %6133 = vmatpush3.bf16.msra.mxu1 %v1305_v61  ;;  %v7075_v61 = vld [vmem:[%s7151_s6 + $0x60] sm:$0xff]  }
  0x80   : > { %6285 = vmatmul.mubr.msk.bf16.vlgmr.msra.gmra.mrb[0].mxu0 %vm598_vm2, %v7459_v53  ;;  %v7647_v53 = vld [vmem:[%s7151_s6 + $0x28] sm:$0xff]  }
  0x81   : > { %6333 = vmatpush3.bf16.msra.mxu0 %v3462_v27  ;;  %6288 = vmatprep.mubr.msk.bf16.mxu0 %vm598_vm2, %v7469_v51  ;;  %v7652_v51 = vld [vmem:[%s7151_s6 + $0x30] sm:$0xff]   ;;  %v6998_v27 = vld [vmem:[%s7151_s6 + $0x68] sm:$0xff]  }
  0x82   : > { %6923 = vmatprep.subr.msk.bf16.mxu0 %vm671_vm0, %v7619_v9  ;;  %v1194_v54 = vrot.slane %v7652_v51, 1 }
  0x86   : > { %6089 = vmatmul.mubr.msk.bf16.gmra.mrb[4].mxu1 %vm598_vm2, %v7633_v34 }
  0x87   : > { %6092 = vmatprep.mubr.msk.bf16.mxu1 %vm598_vm2, %v7638_v47 }
  0x88   : > { %6289 = vmatmul.mubr.msk.bf16.gmra.mrb[4].mxu0 %vm598_vm2, %v7472_v2  ;;  %v7661_v2 = vld [vmem:[%s7151_s6 + $0x38] sm:$0xff]  }
  0x89   : > { %6292 = vmatprep.mubr.msk.bf16.mxu0 %vm598_vm2, %v7475_v56  ;;  %v7666_v56 = vld [vmem:[%s7151_s6 + $0x40] sm:$0xff]   ;;  %v1196_v7 = vrot.slane %v7661_v2, 1 }
  0x8a   : > { %v1198_v50 = vrot.slane %v7666_v56, 1 }
  0x8b   : > { %v1197_v29 = vsel %vm1182_vm3, %v1194_v54, %v1196_v7 }
  0x8c   : > { %v1199_v49 = vsel %vm1182_vm3, %v1196_v7, %v1198_v50 }
  0x8e   : > { %6093 = vmatmul.mubr.msk.bf16.gmra.mrb[8].mxu1 %vm598_vm2, %v7647_v53 }
  0x8f   : > { %6096 = vmatprep.mubr.msk.bf16.mxu1 %vm598_vm2, %v7652_v51  ;;  %v7000_v51 = vld [vmem:[%s7151_s6 + $0x78] sm:$0xff]  }
  0x90   : > { %6293 = vmatmul.mubr.msk.bf16.gmra.mrb[8].mxu0 %vm598_vm2, %v7481_v16  ;;  %v7675_v16 = vld [vmem:[%s7151_s6 + $0x48] sm:$0xff]  }
  0x91   : > { %6296 = vmatprep.mubr.msk.bf16.mxu0 %vm598_vm2, %v7487_v17  ;;  %v8557_v17 = vld [vmem:[#allocation6_spill] sm:$0xff]  ;;  %v1200_v40 = vrot.slane %v7675_v16, 1 }
  0x93   : > { %v1201_v32 = vsel %vm1182_vm3, %v1198_v50, %v1200_v40  ;;  %v1203_v6 = vsel %vm1182_vm3, %v1200_v40, %v1202_v45 }
  0x96   : > { %6097 = vmatmul.mubr.msk.bf16.gmra.mrb[12].mxu1 %vm598_vm2, %v7661_v2  ;;  %v7077_v2 = vld [vmem:[%s7151_s6 + $0x70] sm:$0xff]  }
  0x97   : > { %6100 = vmatprep.mubr.msk.bf16.mxu1 %vm598_vm2, %v7666_v56  ;;  %v1210_v56 = vrot.slane %v7077_v2, 1 }
  0x98   : > { %6297 = vmatmul.mubr.msk.bf16.gmra.mrb[12].mxu0 %vm598_vm2, %v7493_v20  ;;  %v1176_v20 = vld [vmem:[%s7151_s6] sm:$0xe] }
  0x99   : > { %6300 = vmatprep.mubr.msk.bf16.mxu0 %vm598_vm2, %v7496_v38  ;;  %v7072_v38 = vld [vmem:[%s7151_s6 + $0x4] sm:$0xf] }
  0x9e   : > { %6101 = vmatmul.mubr.msk.bf16.gmra.mrb[16].mxu1 %vm598_vm2, %v7675_v16  ;;  %v7078_v16 = vld [vmem:[%s7151_s6 + $0x78] sm:$0xff]  }
  0x9f   : > { %6104 = vmatprep.mubr.msk.bf16.mxu1 %vm598_vm2, %v7249_v55  ;;  %v8553_v55 = vld [vmem:[#allocation2_spill] sm:$0xff] }
  0xa0   : > { %6301 = vmatmul.mubr.msk.bf16.gmra.mrb[16].mxu0 %vm598_vm2, %v7499_v46  ;;  %v5479_v46 = vcombine.low %v1176_v20, %v7072_v38  ;;  %v7002_v20 = vld [vmem:[%s7151_s6 + $0x88] sm:$0xff]   ;;  %v7079_v38 = vld [vmem:[%s7151_s6 + $0x80] sm:$0xff]  }
  0xa1   : > { %6304 = vmatprep.mubr.msk.bf16.mxu0 %vm598_vm2, %v7504_v11 }
  0xa2   : > { %v1183_v11 = vrot.slane %v5479_v46, 1  ;;  %v1214_v46 = vrot.slane %v7079_v38, 1  ;;  %v7916_v38 = vld [vmem:[%s7151_s6 + $0x48] sm:$0xff]  }
  0xa6   : > { %6105 = vmatmul.mubr.msk.bf16.gmra.mrb[20].mxu1 %vm598_vm2, %v7256_v62  ;;  %v8554_v62 = vld [vmem:[#allocation3_spill] sm:$0xff] }
  0xa7   : > { %6108 = vmatprep.mubr.msk.bf16.mxu1 %vm598_vm2, %v7270_v12  ;;  %v5504_v12 = vld [vmem:[%s8536_s1 + $0xc] sm:$0xf] }
  0xa8   : > { %6305 = vmatmul.mubr.msk.bf16.gmra.mrb[20].mxu0 %vm598_vm2, %v7507_v19  ;;  %6919 = vmatprep.subr.msk.bf16.mxu1 %vm671_vm0, %v5504_v12  ;;  %v1184_v19 = vrot.slane %v7612_v0, 1  ;;  %v1206_v0 = vrot.slane %v7075_v61, 1 }
  0xa9   : > { %6308 = vmatprep.mubr.msk.bf16.mxu0 %vm598_vm2, %v7510_v37 }
  0xaa   : > { %v1185_v37 = vsel %vm1182_vm3, %v1183_v11, %v1184_v19  ;;  %v7080_v11 = vld [vmem:[%s7151_s6 + $0x88] sm:$0xff]  }
  0xae   : > { %6109 = vmatmul.mubr.msk.bf16.gmra.mrb[24].mxu1 %vm598_vm2, %v7283_v24  ;;  %v8555_v24 = vld [vmem:[#allocation4_spill] sm:$0xff] }
  0xaf   : > { %6112 = vmatprep.mubr.msk.bf16.mxu1 %vm598_vm2, %v7299_v41  ;;  %v8556_v41 = vld [vmem:[#allocation5_spill] sm:$0xff] }
  0xb0   : > { %6309 = vmatmul.mubr.msk.bf16.gmra.mrb[24].mxu0 %vm598_vm2, %v7516_v18  ;;  %v6988_v18 = vld [vmem:[%s7151_s6 + $0x18] sm:$0xff]  }
  0xb1   : > { %6312 = vmatprep.mubr.msk.bf16.mxu0 %vm598_vm2, %v7523_v3  ;;  %v1186_v3 = vrot.slane %v7622_v36, 1 }
  0xb6   : > { %6113 = vmatmul.mubr.msk.bf16.gmra.mrb[28].mxu1 %vm598_vm2, %v8553_v55  ;;  %v1212_v55 = vrot.slane %v7078_v16, 1  ;;  %v3939_v16 = vshrl.u32 %v7884_v39, 16 }
  0xb7   : > { %6116 = vmatprep.mubr.msk.bf16.mxu1 %vm598_vm2, %v8554_v62 }
  0xb8   : > { %6313 = vmatmul.mubr.msk.bf16.gmra.mrb[28].mxu0 %vm598_vm2, %v7531_v58  ;;  %v1188_v58 = vrot.slane %v7633_v34, 1  ;;  %v1207_v34 = vsel %vm1182_vm3, %v1204_v14, %v1206_v0 }
  0xb9   : > { %6316 = vmatprep.mubr.msk.bf16.mxu0 %vm598_vm2, %v7534_v8  ;;  %v1187_v8 = vsel %vm1182_vm3, %v1184_v19, %v1186_v3  ;;  %v1216_v19 = vrot.slane %v7080_v11, 1 }
  0xbe   : > { %6117 = vmatmul.mubr.msk.bf16.gmra.mrb[32].mxu1 %vm598_vm2, %v8555_v24  ;;  %v7001_v24 = vld [vmem:[%s7151_s6 + $0x80] sm:$0xff]  }
  0xbf   : > { %6120 = vmatprep.mubr.msk.bf16.mxu1 %vm598_vm2, %v8556_v41 }
  0xc0   : > { %6317 = vmatmul.mubr.msk.bf16.gmra.mrb[32].mxu0 %vm598_vm2, %v7537_v22  ;;  %v1189_v22 = vsel %vm1182_vm3, %v1186_v3, %v1188_v58  ;;  %v7003_v3 = vld [vmem:[%s7151_s6 + $0x90] sm:$0xff]  }
  0xc1   : > { %6320 = vmatprep.mubr.msk.bf16.mxu0 %vm598_vm2, %v7543_v63  ;;  %v1823_v63 = vsel %vm671_vm0, %v5504_v12, 0  ;;  %v1213_v12 = vsel %vm1182_vm3, %v1210_v56, %v1212_v55 }
  0xc6   : > { %6121 = vmatmul.mubr.msk.bf16.gmra.mrb[36].mxu1 %vm598_vm2, %v8557_v17 }
  0xc7   : > { %6124 = vmatprep.mubr.msk.bf16.mxu1 %vm598_vm2, %v7371_v5 }
  0xc8   : > { %6321 = vmatmul.mubr.msk.bf16.gmra.mrb[36].mxu0 %vm598_vm2, %v7546_v31  ;;  %v6989_v31 = vld [vmem:[%s7151_s6 + $0x20] sm:$0xff]  }
  0xc9   : > { %6324 = vmatprep.mubr.msk.bf16.mxu0 %vm598_vm2, %v7549_v25  ;;  %v6990_v25 = vld [vmem:[%s7151_s6 + $0x28] sm:$0xff]  }
  0xce   : > { %6125 = vmatmul.mubr.msk.bf16.gmra.mrb[40].mxu1 %vm598_vm2, %v7390_v44 }
  0xcf   : > { %6128 = vmatprep.mubr.msk.bf16.mxu1 %vm598_vm2, %v7413_v26 }
  0xd0   : > { %6325 = vmatmul.mubr.msk.bf16.gmra.mrb[40].mxu0 %vm598_vm2, %v7557_v21  ;;  %v4180_v21 = vsel %vm671_vm0, %v7619_v9, 0  ;;  %v7076_v9 = vld [vmem:[%s7151_s6 + $0x68] sm:$0xff]  }
  0xd1   : > { %6328 = vmatprep.mubr.msk.bf16.mxu0 %vm598_vm2, %v7561_v42  ;;  %v1190_v42 = vrot.slane %v7638_v47, 1  ;;  %v1208_v36 = vrot.slane %v7076_v9, 1 }
  0xd3   : > { %v1191_v10 = vsel %vm1182_vm3, %v1188_v58, %v1190_v42  ;;  %v1209_v47 = vsel %vm1182_vm3, %v1206_v0, %v1208_v36  ;;  %v1211_v62 = vsel %vm1182_vm3, %v1208_v36, %v1210_v56  ;;  %v7004_v58 = vld [vmem:[%s7151_s6 + $0x98] sm:$0xff]  }
  0xd4   : > { %v7896_v0 = vld [vmem:[%s7151_s6 + $0x38] sm:$0xff]  }
  0xd5   : > { %v7015_v36 = vld [vmem:[%s7151_s6 + $0x14] sm:$0xff]   ;;  %v3943_v2 = vshll.u32 %v7896_v0, 16 }
  0xd6   : > { %6129 = vmatmul.mubr.msk.bf16.gmra.mrb[44].mxu1 %vm598_vm2, %v7433_v48 }
  0xd7   : > { %6134 = vmatprep.mubr.msk.bf16.mxu1 %vm598_vm2, %v1185_v37  ;;  %v1215_v37 = vsel %vm1182_vm3, %v1212_v55, %v1214_v46  ;;  %v4583_v55 = vsel %vm671_vm0, %v7764_v1, 0 }
  0xd8   : > { %6329 = vmatmul.mubr.msk.bf16.gmra.mrb[44].mxu0 %vm598_vm2, %v7567_v35  ;;  %v1192_v35 = vrot.slane %v7647_v53, 1  ;;  %v6999_v53 = vld [vmem:[%s7151_s6 + $0x70] sm:$0xff]  }
  0xd9   : > { %6334 = vmatprep.mubr.msk.bf16.mxu0 %vm598_vm2, %v6988_v18  ;;  %v1217_v18 = vsel %vm1182_vm3, %v1214_v46, %v1216_v19  ;;  %v7019_v46 = vld [vmem:[%s7151_s6 + $0x24] sm:$0xff]  }
  0xda   : > { %v1193_v33 = vsel %vm1182_vm3, %v1190_v42, %v1192_v35  ;;  %v1195_v60 = vsel %vm1182_vm3, %v1192_v35, %v1194_v54  ;;  %v1228_v54 = vrot.slane %v7433_v48, 1  ;;  %v1230_v48 = vrot.slane %v7564_v23, 1  ;;  %v7011_v23 = vld [vmem:[%s7151_s6 + $0xd0] sm:$0xff]  }
  0xde   : > { %6135 = vmatmul.mubr.msk.bf16.vlgmr.msra.gmra.mrb[0].mxu1 %vm598_vm2, %v1187_v8  ;;  %v1218_v8 = vrot.slane %v8556_v41, 1  ;;  %v1222_v41 = vrot.slane %v7371_v5, 1  ;;  %v7008_v5 = vld [vmem:[%s7151_s6 + $0xb8] sm:$0xff]  }
  0xdf   : > { %6138 = vmatprep.mubr.msk.bf16.mxu1 %vm598_vm2, %v1189_v22  ;;  %6183 = vmatpush3.bf16.msra.mxu1 %v1823_v63  ;;  %v1220_v22 = vrot.slane %v8557_v17, 1  ;;  %v1224_v17 = vrot.slane %v7390_v44, 1  ;;  %v1226_v44 = vrot.slane %v7413_v26, 1  ;;  %v7010_v26 = vld [vmem:[%s7151_s6 + $0xc8] sm:$0xff]  }
  0xe0   : > { %6335 = vmatmul.mubr.msk.bf16.vlgmr.msra.gmra.mrb[0].mxu0 %vm598_vm2, %v6989_v31  ;;  %v1219_v63 = vsel %vm1182_vm3, %v1216_v19, %v1218_v8 }
  0xe1   : > { %6383 = vmatpush3.bf16.msra.mxu0 %v4180_v21  ;;  %6338 = vmatprep.mubr.msk.bf16.mxu0 %vm598_vm2, %v6990_v25  ;;  %v1221_v31 = vsel %vm1182_vm3, %v1218_v8, %v1220_v22  ;;  %v7005_v25 = vld [vmem:[%s7151_s6 + $0xa0] sm:$0xff]   ;;  %v7006_v21 = vld [vmem:[%s7151_s6 + $0xa8] sm:$0xff]   ;;  %v1223_v42 = vsel %vm1182_vm3, %v1220_v22, %v1222_v41  ;;  %v1225_v35 = vsel %vm1182_vm3, %v1222_v41, %v1224_v17  ;;  %v7023_v41 = vld [vmem:[%s7151_s6 + $0x34] sm:$0xff]  }
  0xe2   : > { %6924 = vmatprep.subr.msk.bf16.mxu0 %vm671_vm0, %v7764_v1  ;;  %v1227_v7 = vsel %vm1182_vm3, %v1224_v17, %v1226_v44  ;;  %v7021_v1 = vld [vmem:[%s7151_s6 + $0x2c] sm:$0xff]  }
  0xe6   : > { %6139 = vmatmul.mubr.msk.bf16.gmra.mrb[4].mxu1 %vm598_vm2, %v1191_v10  ;;  %v3737_v10 = vld [vmem:[%s7151_s6 + $0x18] sm:$0xf] }
  0xe7   : > { %6142 = vmatprep.mubr.msk.bf16.mxu1 %vm598_vm2, %v1193_v33  ;;  %v7854_v33 = vld [vmem:[%s7151_s6 + $0x1c] sm:$0xf] }
  0xe8   : > { %6339 = vmatmul.mubr.msk.bf16.gmra.mrb[4].mxu0 %vm598_vm2, %v6991_v59  ;;  %v7007_v59 = vld [vmem:[%s7151_s6 + $0xb0] sm:$0xff]  }
  0xe9   : > { %6342 = vmatprep.mubr.msk.bf16.mxu0 %vm598_vm2, %v6992_v28  ;;  %v5679_v28 = vcombine.low %v3737_v10, %v7854_v33 }
  0xeb   : > { %v3912_v50 = vshrl.u32 %v5679_v28, 16 }
  0xee   : > { %6143 = vmatmul.mubr.msk.bf16.gmra.mrb[8].mxu1 %vm598_vm2, %v1195_v60  ;;  %v7867_v60 = vld [vmem:[%s7151_s6 + $0x20] sm:$0xff]  }
  0xef   : > { %6146 = vmatprep.mubr.msk.bf16.mxu1 %vm598_vm2, %v1197_v29  ;;  %v3914_v29 = vshll.u32 %v5679_v28, 16 }
  0xf0   : > { %6343 = vmatmul.mubr.msk.bf16.gmra.mrb[8].mxu0 %vm598_vm2, %v6993_v30  ;;  %v1229_v30 = vsel %vm1182_vm3, %v1226_v44, %v1228_v54 }
  0xf1   : > { %6346 = vmatprep.mubr.msk.bf16.mxu0 %vm598_vm2, %v6994_v4  ;;  %v7009_v4 = vld [vmem:[%s7151_s6 + $0xc0] sm:$0xff]   ;;  %v3916_v40 = vrot.slane %v3914_v29, 1 }
  0xf3   : > { %v3917_v15 = vor.u32 %v3916_v40, %v3912_v50  ;;  %v7029_v50 = vld [vmem:[%s7151_s6 + $0x4c] sm:$0xff]  }
  0xf6   : > { %6147 = vmatmul.mubr.msk.bf16.gmra.mrb[12].mxu1 %vm598_vm2, %v1199_v49  ;;  %v3919_v49 = vshll.u32 %v7867_v60, 16 }
  0xf7   : > { %6150 = vmatprep.mubr.msk.bf16.mxu1 %vm598_vm2, %v1201_v32  ;;  %v7878_v32 = vld [vmem:[%s7151_s6 + $0x28] sm:$0xff]  }
  0xf8   : > { %6347 = vmatmul.mubr.msk.bf16.gmra.mrb[12].mxu0 %vm598_vm2, %v6995_v43  ;;  %v1231_v43 = vsel %vm1182_vm3, %v1228_v54, %v1230_v48  ;;  %v3921_v45 = vrot.slane %v3919_v49, 1  ;;  %v3927_v14 = vshll.u32 %v7878_v32, 16 }
  0xf9   : > { %6350 = vmatprep.mubr.msk.bf16.mxu0 %vm598_vm2, %v6996_v57  ;;  %v7012_v57 = vld [vmem:[%s7151_s6 + $0xc] sm:$0xff]  }
  0xfa   : > { %v3929_v61 = vrot.slane %v3927_v14, 1 }
  0xfe   : > { %6151 = vmatmul.mubr.msk.bf16.gmra.mrb[16].mxu1 %vm598_vm2, %v1203_v6  ;;  %v3923_v6 = vshrl.u32 %v7867_v60, 16 }
  0xff   : > { %6154 = vmatprep.mubr.msk.bf16.mxu1 %vm598_vm2, %v1205_v52  ;;  %v3922_v52 = vsel %vm401_vm1, %v3917_v15, %v3921_v45 }
 0x100   : > { %6351 = vmatmul.mubr.msk.bf16.gmra.mrb[16].mxu0 %vm598_vm2, %v6997_v13  ;;  %v3931_v13 = vshrl.u32 %v7878_v32, 16  ;;  %v3925_v9 = vor.u32 %v3923_v6, %v3921_v45 }
 0x101   : > { %6354 = vmatprep.mubr.msk.bf16.mxu0 %vm598_vm2, %v6998_v27  ;;  %v3935_v27 = vshll.u32 %v7884_v39, 16 }
 0x102   : > { %v3930_v56 = vsel %vm401_vm1, %v3925_v9, %v3929_v61  ;;  %v7033_v9 = vld [vmem:[%s7151_s6 + $0x5c] sm:$0xff]  }
 0x106   : > { %6155 = vmatmul.mubr.msk.bf16.gmra.mrb[20].mxu1 %vm598_vm2, %v1207_v34  ;;  %v7017_v34 = vld [vmem:[%s7151_s6 + $0x1c] sm:$0xff]  }
 0x107   : > { %6158 = vmatprep.mubr.msk.bf16.mxu1 %vm598_vm2, %v1209_v47  ;;  %v3933_v47 = vor.u32 %v3931_v13, %v3929_v61  ;;  %v7970_v13 = vld [vmem:[%s7151_s6 + $0x78] sm:$0xff]  }
 0x108   : > { %6355 = vmatmul.mubr.msk.bf16.gmra.mrb[20].mxu0 %vm598_vm2, %v6999_v53  ;;  %v3937_v53 = vrot.slane %v3935_v27, 1  ;;  %v7031_v27 = vld [vmem:[%s7151_s6 + $0x54] sm:$0xff]  }
 0x109   : > { %6358 = vmatprep.mubr.msk.bf16.mxu0 %vm598_vm2, %v7000_v51  ;;  %v7902_v51 = vld [vmem:[%s7151_s6 + $0x40] sm:$0xff]  }
 0x10a   : > { %v3941_v11 = vor.u32 %v3939_v16, %v3937_v53  ;;  %v3955_v8 = vshrl.u32 %v7902_v51, 16 }
 0x10e   : > { %6159 = vmatmul.mubr.msk.bf16.gmra.mrb[24].mxu1 %vm598_vm2, %v1211_v62  ;;  %v3938_v62 = vsel %vm401_vm1, %v3933_v47, %v3937_v53  ;;  %v7976_v47 = vld [vmem:[%s7151_s6 + $0x80] sm:$0xff]   ;;  %v4007_v53 = vshll.u32 %v7970_v13, 16 }
 0x10f   : > { %6162 = vmatprep.mubr.msk.bf16.mxu1 %vm598_vm2, %v1213_v12  ;;  %v3947_v12 = vshrl.u32 %v7896_v0, 16 }
 0x110   : > { %6359 = vmatmul.mubr.msk.bf16.gmra.mrb[24].mxu0 %vm598_vm2, %v7001_v24  ;;  %v3951_v24 = vshll.u32 %v7902_v51, 16 }
 0x111   : > { %6362 = vmatprep.mubr.msk.bf16.mxu0 %vm598_vm2, %v7002_v20  ;;  %v3945_v20 = vrot.slane %v3943_v2, 1 }
 0x113   : > { %v3949_v19 = vor.u32 %v3947_v12, %v3945_v20  ;;  %v4009_v12 = vrot.slane %v4007_v53, 1  ;;  %v7047_v53 = vld [vmem:[%s7151_s6 + $0x94] sm:$0xff]  }
 0x116   : > { %6163 = vmatmul.mubr.msk.bf16.gmra.mrb[28].mxu1 %vm598_vm2, %v1215_v37  ;;  %v3953_v37 = vrot.slane %v3951_v24, 1  ;;  %v7988_v24 = vld [vmem:[%s7151_s6 + $0x88] sm:$0xff]  }
 0x117   : > { %6166 = vmatprep.mubr.msk.bf16.mxu1 %vm598_vm2, %v1217_v18  ;;  %v7922_v18 = vld [vmem:[%s7151_s6 + $0x50] sm:$0xff]  }
 0x118   : > { %6363 = vmatmul.mubr.msk.bf16.gmra.mrb[28].mxu0 %vm598_vm2, %v7003_v3  ;;  %v3959_v3 = vshll.u32 %v7916_v38, 16  ;;  %v3954_v22 = vsel %vm401_vm1, %v3949_v19, %v3953_v37  ;;  %v3957_v17 = vor.u32 %v3955_v8, %v3953_v37  ;;  %v3971_v28 = vshrl.u32 %v7922_v18, 16  ;;  %v7994_v37 = vld [vmem:[%s7151_s6 + $0x90] sm:$0xff]  }
 0x119   : > { %6366 = vmatprep.mubr.msk.bf16.mxu0 %vm598_vm2, %v7004_v58  ;;  %v3946_v58 = vsel %vm401_vm1, %v3941_v11, %v3945_v20  ;;  %v7035_v20 = vld [vmem:[%s7151_s6 + $0x64] sm:$0xff]   ;;  %v7037_v11 = vld [vmem:[%s7151_s6 + $0x6c] sm:$0xff]   ;;  %v4019_v8 = vshrl.u32 %v7976_v47, 16 }
 0x11e   : > { %6167 = vmatmul.mubr.msk.bf16.gmra.mrb[32].mxu1 %vm598_vm2, %v1219_v63  ;;  %v3963_v63 = vshrl.u32 %v7916_v38, 16 }
 0x11f   : > { %6170 = vmatprep.mubr.msk.bf16.mxu1 %vm598_vm2, %v1221_v31  ;;  %v3967_v31 = vshll.u32 %v7922_v18, 16 }
 0x120   : > { %6367 = vmatmul.mubr.msk.bf16.gmra.mrb[32].mxu0 %vm598_vm2, %v7005_v25  ;;  %v3961_v25 = vrot.slane %v3959_v3, 1  ;;  %v4023_v3 = vshll.u32 %v7988_v24, 16 }
 0x121   : > { %6370 = vmatprep.mubr.msk.bf16.mxu0 %vm598_vm2, %v7006_v21  ;;  %v7934_v21 = vld [vmem:[%s7151_s6 + $0x58] sm:$0xff]   ;;  %v3969_v10 = vrot.slane %v3967_v31, 1  ;;  %v4031_v31 = vshll.u32 %v7994_v37, 16 }
 0x122   : > { %v3962_v44 = vsel %vm401_vm1, %v3957_v17, %v3961_v25  ;;  %v7039_v17 = vld [vmem:[%s7151_s6 + $0x74] sm:$0xff]  }
 0x123   : > { %v3973_v48 = vor.u32 %v3971_v28, %v3969_v10 }
 0x126   : > { %6171 = vmatmul.mubr.msk.bf16.gmra.mrb[36].mxu1 %vm598_vm2, %v1223_v42  ;;  %v7025_v42 = vld [vmem:[%s7151_s6 + $0x3c] sm:$0xff]  }
 0x127   : > { %6174 = vmatprep.mubr.msk.bf16.mxu1 %vm598_vm2, %v1225_v35  ;;  %v3965_v35 = vor.u32 %v3963_v63, %v3961_v25  ;;  %v4027_v63 = vshrl.u32 %v7988_v24, 16  ;;  %v4025_v25 = vrot.slane %v4023_v3, 1 }
 0x128   : > { %6371 = vmatmul.mubr.msk.bf16.gmra.mrb[36].mxu0 %vm598_vm2, %v7007_v59  ;;  %v7940_v59 = vld [vmem:[%s7151_s6 + $0x60] sm:$0xff]  }
 0x129   : > { %6374 = vmatprep.mubr.msk.bf16.mxu0 %vm598_vm2, %v7008_v5  ;;  %v3975_v5 = vshll.u32 %v7934_v21, 16  ;;  %v3970_v54 = vsel %vm401_vm1, %v3965_v35, %v3969_v10  ;;  %v3983_v29 = vshll.u32 %v7940_v59, 16  ;;  %v3987_v45 = vshrl.u32 %v7940_v59, 16  ;;  %v7041_v35 = vld [vmem:[%s7151_s6 + $0x7c] sm:$0xff]  }
 0x12a   : > { %v4029_v10 = vor.u32 %v4027_v63, %v4025_v25  ;;  %v7053_v63 = vld [vmem:[%s7151_s6 + $0xac] sm:$0xff]  }
 0x12b   : > { %v3985_v49 = vrot.slane %v3983_v29, 1 }
 0x12d   : > { %v3989_v61 = vor.u32 %v3987_v45, %v3985_v49 }
 0x12e   : > { %6175 = vmatmul.mubr.msk.bf16.gmra.mrb[40].mxu1 %vm598_vm2, %v1227_v7  ;;  %v3979_v7 = vshrl.u32 %v7934_v21, 16 }
 0x12f   : > { %6178 = vmatprep.mubr.msk.bf16.mxu1 %vm598_vm2, %v1229_v30  ;;  %v3977_v30 = vrot.slane %v3975_v5, 1  ;;  %v4033_v5 = vrot.slane %v4031_v31, 1 }
 0x130   : > { %6375 = vmatmul.mubr.msk.bf16.gmra.mrb[40].mxu0 %vm598_vm2, %v7009_v4  ;;  %v7952_v4 = vld [vmem:[%s7151_s6 + $0x68] sm:$0xff]  }
 0x131   : > { %6378 = vmatprep.mubr.msk.bf16.mxu0 %vm598_vm2, %v7010_v26  ;;  %v7027_v26 = vld [vmem:[%s7151_s6 + $0x44] sm:$0xff]   ;;  %v3981_v40 = vor.u32 %v3979_v7, %v3977_v30  ;;  %v3978_v15 = vsel %vm401_vm1, %v3973_v48, %v3977_v30  ;;  %v3995_v14 = vshrl.u32 %v7952_v4, 16  ;;  %v4035_v7 = vshrl.u32 %v7994_v37, 16 }
 0x132   : > { %v4034_v29 = vsel %vm401_vm1, %v4029_v10, %v4033_v5 }
 0x136   : > { %6179 = vmatmul.mubr.msk.bf16.gmra.mrb[44].mxu1 %vm598_vm2, %v1231_v43  ;;  %v7958_v43 = vld [vmem:[%s7151_s6 + $0x70] sm:$0xff]  }
 0x137   : > { %6184 = vmatprep.mubr.msk.bf16.mxu1 %vm598_vm2, %v7012_v57  ;;  %v3991_v57 = vshll.u32 %v7952_v4, 16  ;;  %v3999_v6 = vshll.u32 %v7958_v43, 16 }
 0x138   : > { %6379 = vmatmul.mubr.msk.bf16.gmra.mrb[44].mxu0 %vm598_vm2, %v7011_v23  ;;  %v3986_v23 = vsel %vm401_vm1, %v3981_v40, %v3985_v49  ;;  %v7043_v40 = vld [vmem:[%s7151_s6 + $0x84] sm:$0xff]   ;;  %v4037_v49 = vor.u32 %v4035_v7, %v4033_v5 }
 0x139   : > { %6384 = vmatprep.mubr.msk.bf16.mxu0 %vm598_vm2, %v3922_v52  ;;  %v3993_v52 = vrot.slane %v3991_v57, 1  ;;  %v7045_v57 = vld [vmem:[%s7151_s6 + $0x8c] sm:$0xff]  }
 0x13b   : > { %v3994_v2 = vsel %vm401_vm1, %v3989_v61, %v3993_v52 }
 0x13e   : > { %6185 = vmatmul.mubr.msk.bf16.vlgmr.msra.gmra.mrb[0].mxu1 %vm598_vm2, %v7015_v36  ;;  %v3997_v36 = vor.u32 %v3995_v14, %v3993_v52 }
 0x13f   : > { %6188 = vmatprep.mubr.msk.bf16.mxu1 %vm598_vm2, %v7017_v34  ;;  %v4001_v34 = vrot.slane %v3999_v6, 1 }
 0x140   : > { %6385 = vmatmul.mubr.msk.bf16.vlgmr.msra.gmra.mrb[0].mxu0 %vm598_vm2, %v3930_v56  ;;  %v4003_v56 = vshrl.u32 %v7958_v43, 16 }
 0x141   : > { %6433 = vmatpush3.bf16.msra.mxu0 %v4583_v55  ;;  %6388 = vmatprep.mubr.msk.bf16.mxu0 %vm598_vm2, %v3938_v62  ;;  %v4002_v16 = vsel %vm401_vm1, %v3997_v36, %v4001_v34  ;;  %v4011_v55 = vshrl.u32 %v7970_v13, 16  ;;  %v4015_v62 = vshll.u32 %v7976_v47, 16 }
 0x143   : > { %v4017_v19 = vrot.slane %v4015_v62, 1  ;;  %v8048_v62 = vld [vmem:[%s7151_s6 + $0xc0] sm:$0xff]  }
 0x144   : > { %v4083_v10 = vshrl.u32 %v8048_v62, 16 }
 0x146   : > { %6189 = vmatmul.mubr.msk.bf16.gmra.mrb[4].mxu1 %vm598_vm2, %v7019_v46  ;;  %v4005_v46 = vor.u32 %v4003_v56, %v4001_v34  ;;  %v8042_v34 = vld [vmem:[%s7151_s6 + $0xb8] sm:$0xff]  }
 0x147   : > { %6192 = vmatprep.mubr.msk.bf16.mxu1 %vm598_vm2, %v7021_v1  ;;  %v4013_v1 = vor.u32 %v4011_v55, %v4009_v12  ;;  %v7049_v56 = vld [vmem:[%s7151_s6 + $0x9c] sm:$0xff]  }
 0x148   : > { %6389 = vmatmul.mubr.msk.bf16.gmra.mrb[4].mxu0 %vm598_vm2, %v3946_v58  ;;  %v4010_v58 = vsel %vm401_vm1, %v4005_v46, %v4009_v12  ;;  %v4071_v12 = vshll.u32 %v8042_v34, 16 }
 0x149   : > { %6392 = vmatprep.mubr.msk.bf16.mxu0 %vm598_vm2, %v3954_v22  ;;  %v4018_v22 = vsel %vm401_vm1, %v4013_v1, %v4017_v19  ;;  %v4075_v1 = vshrl.u32 %v8042_v34, 16 }
 0x14a   : > { %v4073_v3 = vrot.slane %v4071_v12, 1 }
 0x14c   : > { %v4077_v31 = vor.u32 %v4075_v1, %v4073_v3  ;;  %v4472_v1 = vrot.slane %v7916_v38, 1  ;;  %v4480_v38 = vrot.slane %v7952_v4, 1  ;;  %v4488_v4 = vrot.slane %v7988_v24, 1 }
 0x14e   : > { %6193 = vmatmul.mubr.msk.bf16.gmra.mrb[8].mxu1 %vm598_vm2, %v7023_v41  ;;  %v8006_v41 = vld [vmem:[%s7151_s6 + $0x98] sm:$0xff]  }
 0x14f   : > { %6196 = vmatprep.mubr.msk.bf16.mxu1 %vm598_vm2, %v7025_v42  ;;  %v4021_v42 = vor.u32 %v4019_v8, %v4017_v19  ;;  %v4039_v28 = vshll.u32 %v8006_v41, 16  ;;  %v4043_v30 = vshrl.u32 %v8006_v41, 16  ;;  %v4079_v19 = vshll.u32 %v8048_v62, 16  ;;  %v7051_v8 = vld [vmem:[%s7151_s6 + $0xa4] sm:$0xff]  }
 0x150   : > { %6393 = vmatmul.mubr.msk.bf16.gmra.mrb[8].mxu0 %vm598_vm2, %v3962_v44  ;;  %v8012_v44 = vld [vmem:[%s7151_s6 + $0xa0] sm:$0xff]  }
 0x151   : > { %6396 = vmatprep.mubr.msk.bf16.mxu0 %vm598_vm2, %v3970_v54  ;;  %v4026_v54 = vsel %vm401_vm1, %v4021_v42, %v4025_v25  ;;  %v4041_v48 = vrot.slane %v4039_v28, 1  ;;  %v4051_v52 = vshrl.u32 %v8012_v44, 16  ;;  %v4081_v25 = vrot.slane %v4079_v19, 1 }
 0x152   : > { %v4474_v19 = vrot.slane %v7922_v18, 1  ;;  %v4482_v18 = vrot.slane %v7958_v43, 1  ;;  %v4490_v43 = vrot.slane %v7994_v37, 1 }
 0x153   : > { %v4042_v6 = vsel %vm401_vm1, %v4037_v49, %v4041_v48  ;;  %v4082_v5 = vsel %vm401_vm1, %v4077_v31, %v4081_v25 }
 0x156   : > { %6197 = vmatmul.mubr.msk.bf16.gmra.mrb[12].mxu1 %vm598_vm2, %v7027_v26  ;;  %v4047_v26 = vshll.u32 %v8012_v44, 16 }
 0x157   : > { %6200 = vmatprep.mubr.msk.bf16.mxu1 %vm598_vm2, %v7029_v50  ;;  %v8024_v50 = vld [vmem:[%s7151_s6 + $0xa8] sm:$0xff]  }
 0x158   : > { %6397 = vmatmul.mubr.msk.bf16.gmra.mrb[12].mxu0 %vm598_vm2, %v3978_v15  ;;  %v4045_v15 = vor.u32 %v4043_v30, %v4041_v48  ;;  %v4049_v45 = vrot.slane %v4047_v26, 1  ;;  %v4055_v14 = vshll.u32 %v8024_v50, 16  ;;  %v4059_v61 = vshrl.u32 %v8024_v50, 16  ;;  %v8080_v26 = vld [vmem:[%s7151_s6 + $0xd8] ss:$0 sps:$4 sm:$0x11]  }
 0x159   : > { %6400 = vmatprep.mubr.msk.bf16.mxu0 %vm598_vm2, %v3986_v23  ;;  %v8030_v23 = vld [vmem:[%s7151_s6 + $0xb0] sm:$0xff]   ;;  %v4085_v30 = vor.u32 %v4083_v10, %v4081_v25  ;;  %v7057_v48 = vld [vmem:[%s7151_s6 + $0xbc] sm:$0xff]   ;;  %v4483_v25 = vsel %vm1182_vm3, %v4480_v38, %v4482_v18  ;;  %v4496_v24 = vrot.slane %v8024_v50, 1 }
 0x15a   : > { %v4057_v36 = vrot.slane %v4055_v14, 1  ;;  %v4067_v46 = vshrl.u32 %v8030_v23, 16  ;;  %v4103_v14 = vshll.u32 %v8080_v26, 16  ;;  %v4498_v37 = vrot.slane %v8030_v23, 1 }
 0x15e   : > { %6201 = vmatmul.mubr.msk.bf16.gmra.mrb[16].mxu1 %vm598_vm2, %v7031_v27  ;;  %v4050_v27 = vsel %vm401_vm1, %v4045_v15, %v4049_v45 }
 0x15f   : > { %6204 = vmatprep.mubr.msk.bf16.mxu1 %vm598_vm2, %v7033_v9  ;;  %v4063_v9 = vshll.u32 %v8030_v23, 16 }
 0x160   : > { %6401 = vmatmul.mubr.msk.bf16.gmra.mrb[16].mxu0 %vm598_vm2, %v3994_v2  ;;  %v4053_v2 = vor.u32 %v4051_v52, %v4049_v45 }
 0x161   : > { %6404 = vmatprep.mubr.msk.bf16.mxu0 %vm598_vm2, %v4002_v16  ;;  %v4061_v16 = vor.u32 %v4059_v61, %v4057_v36  ;;  %v4065_v55 = vrot.slane %v4063_v9, 1  ;;  %v4105_v9 = vrot.slane %v4103_v14, 1 }
 0x166   : > { %6205 = vmatmul.mubr.msk.bf16.gmra.mrb[20].mxu1 %vm598_vm2, %v7035_v20  ;;  %v4058_v20 = vsel %vm401_vm1, %v4053_v2, %v4057_v36 }
 0x167   : > { %6208 = vmatprep.mubr.msk.bf16.mxu1 %vm598_vm2, %v7037_v11  ;;  %v4066_v11 = vsel %vm401_vm1, %v4061_v16, %v4065_v55  ;;  %v4466_v16 = vrot.slane %v7884_v39, 1  ;;  %v4470_v39 = vrot.slane %v7902_v51, 1  ;;  %v4478_v51 = vrot.slane %v7940_v59, 1 }
 0x168   : > { %6405 = vmatmul.mubr.msk.bf16.gmra.mrb[20].mxu0 %vm598_vm2, %v4010_v58  ;;  %v8060_v58 = vld [vmem:[%s7151_s6 + $0xc8] sm:$0xff]   ;;  %v4486_v59 = vrot.slane %v7976_v47, 1  ;;  %v4494_v47 = vrot.slane %v8012_v44, 1  ;;  %v4502_v44 = vrot.slane %v8048_v62, 1 }
 0x169   : > { %6408 = vmatprep.mubr.msk.bf16.mxu0 %vm598_vm2, %v4018_v22  ;;  %v4069_v22 = vor.u32 %v4067_v46, %v4065_v55  ;;  %v4087_v42 = vshll.u32 %v8060_v58, 16  ;;  %v4091_v28 = vshrl.u32 %v8060_v58, 16  ;;  %v4937_v55 = vld [vmem:[%s8538_s3] sm:$0xf]  ;;  %v4481_v31 = vsel %vm1182_vm3, %v4478_v51, %v4480_v38 }
 0x16a   : > { %6925 = vmatprep.subr.msk.bf16.mxu1 %vm671_vm0, %v4937_v55  ;;  %v4489_v10 = vsel %vm1182_vm3, %v4486_v59, %v4488_v4  ;;  %v4504_v50 = vrot.slane %v8060_v58, 1 }
 0x16b   : > { %v4089_v7 = vrot.slane %v4087_v42, 1 }
 0x16d   : > { %v4090_v15 = vsel %vm401_vm1, %v4085_v30, %v4089_v7 }
 0x16e   : > { %6209 = vmatmul.mubr.msk.bf16.gmra.mrb[24].mxu1 %vm598_vm2, %v7039_v17  ;;  %v8066_v17 = vld [vmem:[%s7151_s6 + $0xd0] sm:$0xff]  }
 0x16f   : > { %6212 = vmatprep.mubr.msk.bf16.mxu1 %vm598_vm2, %v7041_v35  ;;  %v4074_v35 = vsel %vm401_vm1, %v4069_v22, %v4073_v3  ;;  %v4099_v45 = vshrl.u32 %v8066_v17, 16  ;;  %v4473_v3 = vsel %vm1182_vm3, %v4470_v39, %v4472_v1  ;;  %v4506_v23 = vrot.slane %v8066_v17, 1 }
 0x170   : > { %6409 = vmatmul.mubr.msk.bf16.gmra.mrb[24].mxu0 %vm598_vm2, %v4026_v54  ;;  %v4095_v54 = vshll.u32 %v8066_v17, 16 }
 0x171   : > { %6412 = vmatprep.mubr.msk.bf16.mxu0 %vm598_vm2, %v4034_v29  ;;  %v7055_v29 = vld [vmem:[%s7151_s6 + $0xb4] sm:$0xff]  }
 0x172   : > { %v4097_v49 = vrot.slane %v4095_v54, 1 }
 0x174   : > { %v4101_v61 = vor.u32 %v4099_v45, %v4097_v49 }
 0x176   : > { %6213 = vmatmul.mubr.msk.bf16.gmra.mrb[28].mxu1 %vm598_vm2, %v7043_v40  ;;  %v4093_v40 = vor.u32 %v4091_v28, %v4089_v7  ;;  %v4106_v2 = vsel %vm401_vm1, %v4101_v61, %v4105_v9  ;;  %v4497_v7 = vsel %vm1182_vm3, %v4494_v47, %v4496_v24 }
 0x177   : > { %6216 = vmatprep.mubr.msk.bf16.mxu1 %vm598_vm2, %v7045_v57  ;;  %v4455_v57 = vld [vmem:[%s7151_s6 + $0x18] sm:$0xe] }
 0x178   : > { %6413 = vmatmul.mubr.msk.bf16.gmra.mrb[28].mxu0 %vm598_vm2, %v4042_v6  ;;  %v4098_v6 = vsel %vm401_vm1, %v4093_v40, %v4097_v49  ;;  %v5729_v52 = vcombine.low %v4455_v57, %v7854_v33  ;;  %v4464_v33 = vrot.slane %v7878_v32, 1  ;;  %v4468_v32 = vrot.slane %v7896_v0, 1 }
 0x179   : > { %6416 = vmatprep.mubr.msk.bf16.mxu0 %vm598_vm2, %v4050_v27  ;;  %v7059_v27 = vld [vmem:[%s7151_s6 + $0xc4] sm:$0xff]   ;;  %v4476_v0 = vrot.slane %v7934_v21, 1  ;;  %v4484_v21 = vrot.slane %v7970_v13, 1  ;;  %v4492_v13 = vrot.slane %v8006_v41, 1  ;;  %v4500_v41 = vrot.slane %v8042_v34, 1 }
 0x17a   : > { %v4461_v36 = vrot.slane %v5729_v52, 1  ;;  %v4469_v46 = vsel %vm1182_vm3, %v4466_v16, %v4468_v32  ;;  %v4505_v40 = vsel %vm1182_vm3, %v4502_v44, %v4504_v50  ;;  %v4507_v49 = vsel %vm1182_vm3, %v4504_v50, %v4506_v23 }
 0x17b   : > { %v4477_v22 = vsel %vm1182_vm3, %v4474_v19, %v4476_v0  ;;  %v4485_v42 = vsel %vm1182_vm3, %v4482_v18, %v4484_v21  ;;  %v4493_v28 = vsel %vm1182_vm3, %v4490_v43, %v4492_v13  ;;  %v4495_v54 = vsel %vm1182_vm3, %v4492_v13, %v4494_v47 }
 0x17c   : > { %v4501_v30 = vsel %vm1182_vm3, %v4498_v37, %v4500_v41  ;;  %v4508_v34 = vrot.slane %v8080_v26, 1 }
 0x17e   : > { %6217 = vmatmul.mubr.msk.bf16.gmra.mrb[32].mxu1 %vm598_vm2, %v7047_v53  ;;  %v4462_v53 = vrot.slane %v7867_v60, 1  ;;  %v5018_v60 = vsel %vm671_vm0, %v4937_v55, 0  ;;  %v4509_v62 = vsel %vm1182_vm3, %v4506_v23, %v4508_v34 }
 0x17f   : > { %6220 = vmatprep.mubr.msk.bf16.mxu1 %vm598_vm2, %v7049_v56  ;;  %6483 = vmatpush3.bf16.msra.mxu1 %v5018_v60 }
 0x180   : > { %6417 = vmatmul.mubr.msk.bf16.gmra.mrb[32].mxu0 %vm598_vm2, %v4058_v20  ;;  %v4463_v56 = vsel %vm1182_vm3, %v4461_v36, %v4462_v53  ;;  %v4465_v12 = vsel %vm1182_vm3, %v4462_v53, %v4464_v33  ;;  %v4467_v20 = vsel %vm1182_vm3, %v4464_v33, %v4466_v16 }
 0x181   : > { %6420 = vmatprep.mubr.msk.bf16.mxu0 %vm598_vm2, %v4066_v11  ;;  %v4471_v11 = vsel %vm1182_vm3, %v4468_v32, %v4470_v39 }
 0x186   : > { %6221 = vmatmul.mubr.msk.bf16.gmra.mrb[36].mxu1 %vm598_vm2, %v7051_v8  ;;  %v4475_v8 = vsel %vm1182_vm3, %v4472_v1, %v4474_v19 }
 0x187   : > { %6224 = vmatprep.mubr.msk.bf16.mxu1 %vm598_vm2, %v7053_v63  ;;  %v4479_v63 = vsel %vm1182_vm3, %v4476_v0, %v4478_v51 }
 0x188   : > { %6421 = vmatmul.mubr.msk.bf16.gmra.mrb[36].mxu0 %vm598_vm2, %v4074_v35  ;;  %v4487_v35 = vsel %vm1182_vm3, %v4484_v21, %v4486_v59 }
 0x189   : > { %6424 = vmatprep.mubr.msk.bf16.mxu0 %vm598_vm2, %v4082_v5  ;;  %v4491_v5 = vsel %vm1182_vm3, %v4488_v4, %v4490_v43 }
 0x18e   : > { %6225 = vmatmul.mubr.msk.bf16.gmra.mrb[40].mxu1 %vm598_vm2, %v7055_v29  ;;  %v4499_v29 = vsel %vm1182_vm3, %v4496_v24, %v4498_v37  ;;  %v8261_v37 = vld [vmem:[%s8537_s2] ss:$0 sm:$0xff] }
 0x18f   : > { %6228 = vmatprep.mubr.msk.bf16.mxu1 %vm598_vm2, %v7057_v48  ;;  %v4503_v48 = vsel %vm1182_vm3, %v4500_v41, %v4502_v44 }
 0x190   : > { %6425 = vmatmul.mubr.msk.bf16.gmra.mrb[40].mxu0 %vm598_vm2, %v4090_v15 }
 0x191   : > { %6428 = vmatprep.mubr.msk.bf16.mxu0 %vm598_vm2, %v4098_v6 }
 0x196   : > { %6229 = vmatmul.mubr.msk.bf16.gmra.mrb[44].mxu1 %vm598_vm2, %v7059_v27 }
 0x198   : > { %6429 = vmatmul.mubr.msk.bf16.gmra.mrb[44].mxu0 %vm598_vm2, %v4106_v2 }
 0x199   : > { %6434 = vmatprep.mubr.msk.bf16.mxu0 %vm598_vm2, %v4463_v56 }
 0x1a0   : > { %6435 = vmatmul.mubr.msk.bf16.vlgmr.msra.gmra.mrb[0].mxu0 %vm598_vm2, %v4465_v12 }
 0x1a1   : > { %6438 = vmatprep.mubr.msk.bf16.mxu0 %vm598_vm2, %v4467_v20 }
 0x1a8   : > { %6439 = vmatmul.mubr.msk.bf16.gmra.mrb[4].mxu0 %vm598_vm2, %v4469_v46 }
 0x1a9   : > { %6442 = vmatprep.mubr.msk.bf16.mxu0 %vm598_vm2, %v4471_v11 }
 0x1b0   : > { %6443 = vmatmul.mubr.msk.bf16.gmra.mrb[8].mxu0 %vm598_vm2, %v4473_v3 }
 0x1b1   : > { %6446 = vmatprep.mubr.msk.bf16.mxu0 %vm598_vm2, %v4475_v8 }
 0x1b8   : > { %6447 = vmatmul.mubr.msk.bf16.gmra.mrb[12].mxu0 %vm598_vm2, %v4477_v22 }
 0x1b9   : > { %6450 = vmatprep.mubr.msk.bf16.mxu0 %vm598_vm2, %v4479_v63 }
 0x1c0   : > { %6451 = vmatmul.mubr.msk.bf16.gmra.mrb[16].mxu0 %vm598_vm2, %v4481_v31 }
 0x1c1   : > { %6454 = vmatprep.mubr.msk.bf16.mxu0 %vm598_vm2, %v4483_v25 }
 0x1c8   : > { %6455 = vmatmul.mubr.msk.bf16.gmra.mrb[20].mxu0 %vm598_vm2, %v4485_v42 }
 0x1c9   : > { %6458 = vmatprep.mubr.msk.bf16.mxu0 %vm598_vm2, %v4487_v35 }
 0x1d0   : > { %6459 = vmatmul.mubr.msk.bf16.gmra.mrb[24].mxu0 %vm598_vm2, %v4489_v10 }
 0x1d1   : > { %6462 = vmatprep.mubr.msk.bf16.mxu0 %vm598_vm2, %v4491_v5 }
 0x1d8   : > { %6463 = vmatmul.mubr.msk.bf16.gmra.mrb[28].mxu0 %vm598_vm2, %v4493_v28 }
 0x1d9   : > { %6466 = vmatprep.mubr.msk.bf16.mxu0 %vm598_vm2, %v4495_v54 }
 0x1e0   : > { %6467 = vmatmul.mubr.msk.bf16.gmra.mrb[32].mxu0 %vm598_vm2, %v4497_v7 }
 0x1e1   : > { %6470 = vmatprep.mubr.msk.bf16.mxu0 %vm598_vm2, %v4499_v29 }
 0x1e8   : > { %6471 = vmatmul.mubr.msk.bf16.gmra.mrb[36].mxu0 %vm598_vm2, %v4501_v30 }
 0x1e9   : > { %6474 = vmatprep.mubr.msk.bf16.mxu0 %vm598_vm2, %v4503_v48 }
 0x1f0   : > { %6475 = vmatmul.mubr.msk.bf16.gmra.mrb[40].mxu0 %vm598_vm2, %v4505_v40 }
 0x1f1   : > { %6478 = vmatprep.mubr.msk.bf16.mxu0 %vm598_vm2, %v4507_v49 }
 0x1f8   : > { %6479 = vmatmul.mubr.msk.bf16.gmra.mrb[44].mxu0 %vm598_vm2, %v4509_v62 }
 0x211   : > { %v6186_v57 = vpop.f32.mrb[0].mxu1 }
 0x212   : > { %v1859_v15 = vpop.f32.mrb[1].mxu1 }
 0x213   : > { %v6187_v45 = vpop.f32.mrb[2].mxu1 }
 0x214   : > { %v1862_v58 = vpop.f32.mrb[3].mxu1 }
 0x219   : > { %v6190_v14 = vpop.f32.mrb[4].mxu1 }
 0x21a   : > { %v1875_v17 = vpop.f32.mrb[5].mxu1 }
 0x21b   : > { %v8174_v6 = vpop.f32.mrb[6].mxu1 }
 0x21c   : > { %v8176_v52 = vpop.f32.mrb[7].mxu1 }
 0x221   : > { %v8178_v27 = vpop.f32.mrb[8].mxu1 }
 0x222   : > { %v8180_v61 = vpop.f32.mrb[9].mxu1 }
 0x223   : > { %v8182_v9 = vpop.f32.mrb[10].mxu1 }
 0x224   : > { %v8184_v26 = vpop.f32.mrb[11].mxu1 }
 0x229   : > { %v8186_v36 = vpop.f32.mrb[12].mxu1 }
 0x22a   : > { %v8188_v53 = vpop.f32.mrb[13].mxu1 }
 0x22b   : > { %v8190_v2 = vpop.f32.mrb[14].mxu1 }
 0x22c   : > { %v8192_v56 = vpop.f32.mrb[15].mxu1 }
 0x231   : > { %v8194_v33 = vpop.f32.mrb[16].mxu1 }
 0x232   : > { %v8196_v16 = vpop.f32.mrb[17].mxu1 }
 0x233   : > { %v8198_v55 = vpop.f32.mrb[18].mxu1 }
 0x234   : > { %v8200_v60 = vpop.f32.mrb[19].mxu1 }
 0x239   : > { %v8202_v12 = vpop.f32.mrb[20].mxu1 }
 0x23a   : > { %v8204_v20 = vpop.f32.mrb[21].mxu1 }
 0x23b   : > { %v8206_v32 = vpop.f32.mrb[22].mxu1 }
 0x23c   : > { %v8208_v39 = vpop.f32.mrb[23].mxu1 }
 0x241   : > { %v8210_v46 = vpop.f32.mrb[24].mxu1 }
 0x242   : > { %v8212_v11 = vpop.f32.mrb[25].mxu1 }
 0x243   : > { %v8214_v1 = vpop.f32.mrb[26].mxu1 }
 0x244   : > { %v8216_v19 = vpop.f32.mrb[27].mxu1 }
 0x249   : > { %v8218_v3 = vpop.f32.mrb[28].mxu1 }
 0x24a   : > { %v8220_v8 = vpop.f32.mrb[29].mxu1 }
 0x24b   : > { %v8222_v0 = vpop.f32.mrb[30].mxu1 }
 0x24c   : > { %v8224_v51 = vpop.f32.mrb[31].mxu1 }
 0x251   : > { %v8226_v22 = vpop.f32.mrb[32].mxu1 }
 0x252   : > { %v8228_v63 = vpop.f32.mrb[33].mxu1 }
 0x253   : > { %v8230_v38 = vpop.f32.mrb[34].mxu1 }
 0x254   : > { %v8232_v18 = vpop.f32.mrb[35].mxu1 }
 0x259   : > { %v8234_v31 = vpop.f32.mrb[36].mxu1 }
 0x25a   : > { %v8236_v25 = vpop.f32.mrb[37].mxu1 }
 0x25b   : > { %v8238_v21 = vpop.f32.mrb[38].mxu1 }
 0x25c   : > { %v8240_v59 = vpop.f32.mrb[39].mxu1 }
 0x261   : > { %v8242_v42 = vpop.f32.mrb[40].mxu1 }
 0x262   : > { %v8244_v35 = vpop.f32.mrb[41].mxu1 }
 0x263   : > { %v8246_v4 = vpop.f32.mrb[42].mxu1 }
 0x264   : > { %v8248_v43 = vpop.f32.mrb[43].mxu1 }
 0x269   : > { %v8250_v10 = vpop.f32.mrb[44].mxu1 }
 0x26a   : > { %v8252_v5 = vpop.f32.mrb[45].mxu1 }
 0x26b   : > { %v8254_v13 = vpop.f32.mrb[46].mxu1 }
 0x26c   : > { %8558 = vst [vmem:[#allocation2_spill] sm:$0xff] %v8254_v13  ;;  %v8256_v47 = vpop.f32.mrb[47].mxu1 }
 0x26d   : > { %8559 = vst [vmem:[#allocation3_spill] sm:$0xff] %v8256_v47 }
 0x273   : > { %v6436_v28 = vpop.f32.mrb[0].mxu0 }
 0x274   : > { %v6532_v54 = vadd.f32 %v6436_v28, %v6186_v57  ;;  %v4619_v24 = vpop.f32.mrb[1].mxu0 }
 0x275   : > { %v6533_v7 = vadd.f32 %v4619_v24, %v1859_v15  ;;  %v6437_v29 = vpop.f32.mrb[2].mxu0 }
 0x276   : > { %v6534_v41 = vadd.f32 %v6437_v29, %v6187_v45  ;;  %v4622_v44 = vpop.f32.mrb[3].mxu0  ;;  %v4867_v48 = vadd.f32 %v6532_v54, %v8261_v37 }
 0x277   : > { %v6535_v30 = vadd.f32 %v4622_v44, %v1862_v58  ;;  %v4865_v23 = vadd.f32 %v6533_v7, %v8261_v37 }
 0x278   : > { %v4868_v50 = vadd.f32 %v6534_v41, %v8261_v37 }
 0x279   : > { %v4866_v40 = vadd.f32 %v6535_v30, %v8261_v37 }
 0x27a   : > { %v4914_v49 = vpack.c.bf16 %v4868_v50, %v4867_v48 }
 0x27b   : > { %v4913_v34 = vpack.c.bf16 %v4866_v40, %v4865_v23  ;;  %v6440_v62 = vpop.f32.mrb[4].mxu0 }
 0x27c   : > { %v6536_v57 = vadd.f32 %v6440_v62, %v6190_v14  ;;  %v4635_v28 = vpop.f32.mrb[5].mxu0 }
 0x27d   : > { %v6537_v47 = vadd.f32 %v4635_v28, %v1875_v17  ;;  %v6441_v13 = vpop.f32.mrb[6].mxu0  ;;  %6484 = vmatprep.mubr.msk.bf16.mxu1 %vm598_vm2, %v4913_v34 }
 0x27e   : > { %v6538_v15 = vadd.f32 %v6441_v13, %v8174_v6  ;;  %v4638_v45 = vpop.f32.mrb[7].mxu0  ;;  %6485 = vmatmul.mubr.msk.bf16.vlgmr.msra.gmra.mrb[48].mxu1 %vm598_vm2, %v4914_v49  ;;  %v4871_v54 = vadd.f32 %v6536_v57, %v8261_v37 }
 0x27f   : > { %v6539_v58 = vadd.f32 %v4638_v45, %v8176_v52  ;;  %v4869_v7 = vadd.f32 %v6537_v47, %v8261_v37 }
 0x280   : > { %v4872_v24 = vadd.f32 %v6538_v15, %v8261_v37 }
 0x281   : > { %v4870_v14 = vadd.f32 %v6539_v58, %v8261_v37 }
 0x282   : > { %v4916_v29 = vpack.c.bf16 %v4872_v24, %v4871_v54 }
 0x283   : > { %v4915_v17 = vpack.c.bf16 %v4870_v14, %v4869_v7  ;;  %v6444_v41 = vpop.f32.mrb[8].mxu0 }
 0x284   : > { %v6540_v44 = vadd.f32 %v6444_v41, %v8178_v27  ;;  %v4651_v30 = vpop.f32.mrb[9].mxu0 }
 0x285   : > { %v6541_v6 = vadd.f32 %v4651_v30, %v8180_v61  ;;  %v6445_v13 = vpop.f32.mrb[10].mxu0  ;;  %6488 = vmatprep.mubr.msk.bf16.mxu1 %vm598_vm2, %v4915_v17 }
 0x286   : > { %v6542_v52 = vadd.f32 %v6445_v13, %v8182_v9  ;;  %v4654_v48 = vpop.f32.mrb[11].mxu0  ;;  %6489 = vmatmul.mubr.msk.bf16.gmra.mrb[52].mxu1 %vm598_vm2, %v4916_v29  ;;  %v4875_v50 = vadd.f32 %v6540_v44, %v8261_v37 }
 0x287   : > { %v6543_v47 = vadd.f32 %v4654_v48, %v8184_v26  ;;  %v4873_v40 = vadd.f32 %v6541_v6, %v8261_v37 }
 0x288   : > { %v4876_v23 = vadd.f32 %v6542_v52, %v8261_v37 }
 0x289   : > { %v4874_v27 = vadd.f32 %v6543_v47, %v8261_v37 }
 0x28a   : > { %v4918_v49 = vpack.c.bf16 %v4876_v23, %v4875_v50 }
 0x28b   : > { %v4917_v61 = vpack.c.bf16 %v4874_v27, %v4873_v40  ;;  %v6448_v34 = vpop.f32.mrb[12].mxu0 }
 0x28c   : > { %v6544_v62 = vadd.f32 %v6448_v34, %v8186_v36  ;;  %v4667_v57 = vpop.f32.mrb[13].mxu0 }
 0x28d   : > { %v6545_v9 = vadd.f32 %v4667_v57, %v8188_v53  ;;  %v6449_v28 = vpop.f32.mrb[14].mxu0  ;;  %6492 = vmatprep.mubr.msk.bf16.mxu1 %vm598_vm2, %v4917_v61 }
 0x28e   : > { %v6546_v26 = vadd.f32 %v6449_v28, %v8190_v2  ;;  %v4670_v15 = vpop.f32.mrb[15].mxu0  ;;  %6493 = vmatmul.mubr.msk.bf16.gmra.mrb[56].mxu1 %vm598_vm2, %v4918_v49  ;;  %v4879_v58 = vadd.f32 %v6544_v62, %v8261_v37 }
 0x28f   : > { %v6547_v45 = vadd.f32 %v4670_v15, %v8192_v56  ;;  %v4877_v24 = vadd.f32 %v6545_v9, %v8261_v37 }
 0x290   : > { %v4880_v54 = vadd.f32 %v6546_v26, %v8261_v37 }
 0x291   : > { %v4878_v36 = vadd.f32 %v6547_v45, %v8261_v37 }
 0x292   : > { %v4920_v7 = vpack.c.bf16 %v4880_v54, %v4879_v58 }
 0x293   : > { %v4919_v53 = vpack.c.bf16 %v4878_v36, %v4877_v24  ;;  %v6452_v14 = vpop.f32.mrb[16].mxu0 }
 0x294   : > { %v6548_v29 = vadd.f32 %v6452_v14, %v8194_v33  ;;  %v4683_v17 = vpop.f32.mrb[17].mxu0 }
 0x295   : > { %v6549_v2 = vadd.f32 %v4683_v17, %v8196_v16  ;;  %v6453_v41 = vpop.f32.mrb[18].mxu0  ;;  %6496 = vmatprep.mubr.msk.bf16.mxu1 %vm598_vm2, %v4919_v53 }
 0x296   : > { %v6550_v56 = vadd.f32 %v6453_v41, %v8198_v55  ;;  %v4686_v44 = vpop.f32.mrb[19].mxu0  ;;  %6497 = vmatmul.mubr.msk.bf16.gmra.mrb[60].mxu1 %vm598_vm2, %v4920_v7  ;;  %v4883_v6 = vadd.f32 %v6548_v29, %v8261_v37 }
 0x297   : > { %v6551_v30 = vadd.f32 %v4686_v44, %v8200_v60  ;;  %v4881_v52 = vadd.f32 %v6549_v2, %v8261_v37 }
 0x298   : > { %v4884_v13 = vadd.f32 %v6550_v56, %v8261_v37 }
 0x299   : > { %v4882_v33 = vadd.f32 %v6551_v30, %v8261_v37 }
 0x29a   : > { %v4922_v48 = vpack.c.bf16 %v4884_v13, %v4883_v6 }
 0x29b   : > { %v4921_v16 = vpack.c.bf16 %v4882_v33, %v4881_v52  ;;  %v6456_v47 = vpop.f32.mrb[20].mxu0 }
 0x29c   : > { %v6552_v50 = vadd.f32 %v6456_v47, %v8202_v12  ;;  %v4699_v23 = vpop.f32.mrb[21].mxu0 }
 0x29d   : > { %v6553_v55 = vadd.f32 %v4699_v23, %v8204_v20  ;;  %v6457_v40 = vpop.f32.mrb[22].mxu0  ;;  %6500 = vmatprep.mubr.msk.bf16.mxu1 %vm598_vm2, %v4921_v16 }
 0x29e   : > { %v6554_v60 = vadd.f32 %v6457_v40, %v8206_v32  ;;  %v4702_v27 = vpop.f32.mrb[23].mxu0  ;;  %6501 = vmatmul.mubr.msk.bf16.gmra.mrb[64].mxu1 %vm598_vm2, %v4922_v48  ;;  %v4887_v61 = vadd.f32 %v6552_v50, %v8261_v37 }
 0x29f   : > { %v6555_v49 = vadd.f32 %v4702_v27, %v8208_v39  ;;  %v4885_v62 = vadd.f32 %v6553_v55, %v8261_v37 }
 0x2a0   : > { %v4888_v34 = vadd.f32 %v6554_v60, %v8261_v37 }
 0x2a1   : > { %v4886_v12 = vadd.f32 %v6555_v49, %v8261_v37 }
 0x2a2   : > { %v4924_v57 = vpack.c.bf16 %v4888_v34, %v4887_v61 }
 0x2a3   : > { %v4923_v20 = vpack.c.bf16 %v4886_v12, %v4885_v62  ;;  %v6460_v9 = vpop.f32.mrb[24].mxu0 }
 0x2a4   : > { %v6556_v28 = vadd.f32 %v6460_v9, %v8210_v46  ;;  %v4715_v26 = vpop.f32.mrb[25].mxu0 }
 0x2a5   : > { %v6557_v32 = vadd.f32 %v4715_v26, %v8212_v11  ;;  %v6461_v15 = vpop.f32.mrb[26].mxu0  ;;  %6504 = vmatprep.mubr.msk.bf16.mxu1 %vm598_vm2, %v4923_v20 }
 0x2a6   : > { %v6558_v39 = vadd.f32 %v6461_v15, %v8214_v1  ;;  %v4718_v45 = vpop.f32.mrb[27].mxu0  ;;  %6505 = vmatmul.mubr.msk.bf16.gmra.mrb[68].mxu1 %vm598_vm2, %v4924_v57  ;;  %v4891_v54 = vadd.f32 %v6556_v28, %v8261_v37 }
 0x2a7   : > { %v6559_v58 = vadd.f32 %v4718_v45, %v8216_v19  ;;  %v4889_v36 = vadd.f32 %v6557_v32, %v8261_v37 }
 0x2a8   : > { %v4892_v24 = vadd.f32 %v6558_v39, %v8261_v37 }
 0x2a9   : > { %v4890_v46 = vadd.f32 %v6559_v58, %v8261_v37 }
 0x2aa   : > { %v4926_v7 = vpack.c.bf16 %v4892_v24, %v4891_v54 }
 0x2ab   : > { %v4925_v11 = vpack.c.bf16 %v4890_v46, %v4889_v36  ;;  %v6464_v53 = vpop.f32.mrb[28].mxu0 }
 0x2ac   : > { %v6560_v14 = vadd.f32 %v6464_v53, %v8218_v3  ;;  %v4731_v29 = vpop.f32.mrb[29].mxu0 }
 0x2ad   : > { %v6561_v1 = vadd.f32 %v4731_v29, %v8220_v8  ;;  %v6465_v17 = vpop.f32.mrb[30].mxu0  ;;  %6508 = vmatprep.mubr.msk.bf16.mxu1 %vm598_vm2, %v4925_v11 }
 0x2ae   : > { %v6562_v19 = vadd.f32 %v6465_v17, %v8222_v0  ;;  %v4734_v2 = vpop.f32.mrb[31].mxu0  ;;  %6509 = vmatmul.mubr.msk.bf16.gmra.mrb[72].mxu1 %vm598_vm2, %v4926_v7  ;;  %v4895_v56 = vadd.f32 %v6560_v14, %v8261_v37 }
 0x2af   : > { %v6563_v41 = vadd.f32 %v4734_v2, %v8224_v51  ;;  %v4893_v30 = vadd.f32 %v6561_v1, %v8261_v37  ;;  %v8561_v1 = vld [vmem:[#allocation3_spill] sm:$0xff] }
 0x2b0   : > { %v4896_v44 = vadd.f32 %v6562_v19, %v8261_v37 }
 0x2b1   : > { %v4894_v3 = vadd.f32 %v6563_v41, %v8261_v37 }
 0x2b2   : > { %v4928_v6 = vpack.c.bf16 %v4896_v44, %v4895_v56  ;;  %v8381_v44 = vld [vmem:[%s8539_s4] ss:$0 sm:$0xff] }
 0x2b3   : > { %v4927_v8 = vpack.c.bf16 %v4894_v3, %v4893_v30  ;;  %v6468_v13 = vpop.f32.mrb[32].mxu0 }
 0x2b4   : > { %v6564_v52 = vadd.f32 %v6468_v13, %v8226_v22  ;;  %v4747_v33 = vpop.f32.mrb[33].mxu0 }
 0x2b5   : > { %v6565_v0 = vadd.f32 %v4747_v33, %v8228_v63  ;;  %v6469_v48 = vpop.f32.mrb[34].mxu0  ;;  %6512 = vmatprep.mubr.msk.bf16.mxu1 %vm598_vm2, %v4927_v8 }
 0x2b6   : > { %v6566_v51 = vadd.f32 %v6469_v48, %v8230_v38  ;;  %v4750_v16 = vpop.f32.mrb[35].mxu0  ;;  %6513 = vmatmul.mubr.msk.bf16.gmra.mrb[76].mxu1 %vm598_vm2, %v4928_v6  ;;  %v4899_v50 = vadd.f32 %v6564_v52, %v8261_v37 }
 0x2b7   : > { %v6567_v47 = vadd.f32 %v4750_v16, %v8232_v18  ;;  %v4897_v55 = vadd.f32 %v6565_v0, %v8261_v37 }
 0x2b8   : > { %v4900_v23 = vadd.f32 %v6566_v51, %v8261_v37 }
 0x2b9   : > { %v4898_v22 = vadd.f32 %v6567_v47, %v8261_v37 }
 0x2ba   : > { %v4930_v40 = vpack.c.bf16 %v4900_v23, %v4899_v50 }
 0x2bb   : > { %v4929_v63 = vpack.c.bf16 %v4898_v22, %v4897_v55  ;;  %v6472_v60 = vpop.f32.mrb[36].mxu0 }
 0x2bc   : > { %v6568_v27 = vadd.f32 %v6472_v60, %v8234_v31  ;;  %v4763_v49 = vpop.f32.mrb[37].mxu0 }
 0x2bd   : > { %v6569_v38 = vadd.f32 %v4763_v49, %v8236_v25  ;;  %v6473_v61 = vpop.f32.mrb[38].mxu0  ;;  %6516 = vmatprep.mubr.msk.bf16.mxu1 %vm598_vm2, %v4929_v63 }
 0x2be   : > { %v6570_v18 = vadd.f32 %v6473_v61, %v8238_v21  ;;  %v4766_v34 = vpop.f32.mrb[39].mxu0  ;;  %6517 = vmatmul.mubr.msk.bf16.gmra.mrb[80].mxu1 %vm598_vm2, %v4930_v40  ;;  %v4903_v12 = vadd.f32 %v6568_v27, %v8261_v37 }
 0x2bf   : > { %v6571_v62 = vadd.f32 %v4766_v34, %v8240_v59  ;;  %v4901_v20 = vadd.f32 %v6569_v38, %v8261_v37 }
 0x2c0   : > { %v4904_v57 = vadd.f32 %v6570_v18, %v8261_v37 }
 0x2c1   : > { %v4902_v31 = vadd.f32 %v6571_v62, %v8261_v37 }
 0x2c2   : > { %v4932_v9 = vpack.c.bf16 %v4904_v57, %v4903_v12 }
 0x2c3   : > { %v4931_v25 = vpack.c.bf16 %v4902_v31, %v4901_v20  ;;  %v6476_v28 = vpop.f32.mrb[40].mxu0 }
 0x2c4   : > { %v6572_v26 = vadd.f32 %v6476_v28, %v8242_v42  ;;  %v4779_v32 = vpop.f32.mrb[41].mxu0 }
 0x2c5   : > { %v6573_v21 = vadd.f32 %v4779_v32, %v8244_v35  ;;  %v6477_v15 = vpop.f32.mrb[42].mxu0  ;;  %6520 = vmatprep.mubr.msk.bf16.mxu1 %vm598_vm2, %v4931_v25 }
 0x2c6   : > { %v6574_v59 = vadd.f32 %v6477_v15, %v8246_v4  ;;  %v4782_v39 = vpop.f32.mrb[43].mxu0  ;;  %6521 = vmatmul.mubr.msk.bf16.gmra.mrb[84].mxu1 %vm598_vm2, %v4932_v9  ;;  %v4907_v58 = vadd.f32 %v6572_v26, %v8261_v37 }
 0x2c7   : > { %v6575_v45 = vadd.f32 %v4782_v39, %v8248_v43  ;;  %v4905_v24 = vadd.f32 %v6573_v21, %v8261_v37  ;;  %v8560_v43 = vld [vmem:[#allocation2_spill] sm:$0xff] }
 0x2c8   : > { %v4908_v54 = vadd.f32 %v6574_v59, %v8261_v37 }
 0x2c9   : > { %v4906_v42 = vadd.f32 %v6575_v45, %v8261_v37 }
 0x2ca   : > { %v4934_v36 = vpack.c.bf16 %v4908_v54, %v4907_v58 }
 0x2cb   : > { %v4933_v35 = vpack.c.bf16 %v4906_v42, %v4905_v24  ;;  %v6480_v46 = vpop.f32.mrb[44].mxu0 }
 0x2cc   : > { %v6576_v7 = vadd.f32 %v6480_v46, %v8250_v10  ;;  %v4795_v11 = vpop.f32.mrb[45].mxu0 }
 0x2cd   : > { %v6577_v4 = vadd.f32 %v4795_v11, %v8252_v5  ;;  %v6481_v53 = vpop.f32.mrb[46].mxu0  ;;  %6524 = vmatprep.mubr.msk.bf16.mxu1 %vm598_vm2, %v4933_v35 }
 0x2ce   : > { %v6578_v14 = vadd.f32 %v6481_v53, %v8560_v43  ;;  %v4798_v29 = vpop.f32.mrb[47].mxu0  ;;  %6525 = vmatmul.mubr.msk.bf16.gmra.mrb[88].mxu1 %vm598_vm2, %v4934_v36  ;;  %v4911_v19 = vadd.f32 %v6576_v7, %v8261_v37 }
 0x2cf   : > { %v6579_v17 = vadd.f32 %v4798_v29, %v8561_v1  ;;  %v4909_v10 = vadd.f32 %v6577_v4, %v8261_v37 }
 0x2d0   : > { %v4912_v2 = vadd.f32 %v6578_v14, %v8261_v37 }
 0x2d1   : > { %v4910_v41 = vadd.f32 %v6579_v17, %v8261_v37 }
 0x2d2   : > { %v4936_v56 = vpack.c.bf16 %v4912_v2, %v4911_v19 }
 0x2d3   : > { %v4935_v5 = vpack.c.bf16 %v4910_v41, %v4909_v10 }
 0x2d5   : > { %6528 = vmatprep.mubr.msk.bf16.mxu1 %vm598_vm2, %v4935_v5 }
 0x2d6   : > { %6529 = vmatmul.mubr.msk.bf16.gmra.mrb[92].mxu1 %vm598_vm2, %v4936_v56 }
 0x351   : > { %v6486_v30 = vpop.f32.mrb[48].mxu1 }
 0x352   : > { %v5063_v3 = vadd.f32 %v6486_v30, %v8381_v44  ;;  %v5054_v6 = vpop.f32.mrb[49].mxu1 }
 0x353   : > { %v5055_v37 = vadd.f32 %v8381_v44, %v5054_v6  ;;  %v6487_v8 = vpop.f32.mrb[50].mxu1 }
 0x354   : > { %v5247_v13 = vmax.f32 %v5063_v3, 0.0  ;;  %v5066_v52 = vadd.f32 %v6487_v8, %v8381_v44  ;;  %v5057_v33 = vpop.f32.mrb[51].mxu1 }
 0x355   : > { %v5245_v0 = vmax.f32 %v5055_v37, 0.0  ;;  %v5058_v48 = vadd.f32 %v8381_v44, %v5057_v33 }
 0x356   : > { %5296 = vst.msk [vmem:[%s8387_s30 + $0x10] sm:$0xff] %vm5293_vm4, %v5247_v13  ;;  %v5248_v51 = vmax.f32 %v5066_v52, 0.0 }
 0x357   : > { %5294 = vst.msk [vmem:[%s8387_s30] sm:$0xff] %vm5293_vm4, %v5245_v0  ;;  %v5246_v16 = vmax.f32 %v5058_v48, 0.0 }
 0x358   : > { %5297 = vst.msk [vmem:[%s8387_s30 + $0x18] sm:$0xff] %vm5293_vm4, %v5248_v51 }
 0x359   : > { %5295 = vst.msk [vmem:[%s8387_s30 + $0x8] sm:$0xff] %vm5293_vm4, %v5246_v16  ;;  %v6490_v47 = vpop.f32.mrb[52].mxu1 }
 0x35a   : > { %v5079_v50 = vadd.f32 %v6490_v47, %v8381_v44  ;;  %v5070_v23 = vpop.f32.mrb[53].mxu1 }
 0x35b   : > { %v5071_v55 = vadd.f32 %v8381_v44, %v5070_v23  ;;  %v6491_v22 = vpop.f32.mrb[54].mxu1 }
 0x35c   : > { %v5251_v40 = vmax.f32 %v5079_v50, 0.0  ;;  %v5082_v63 = vadd.f32 %v6491_v22, %v8381_v44  ;;  %v5073_v60 = vpop.f32.mrb[55].mxu1 }
 0x35d   : > { %v5249_v27 = vmax.f32 %v5071_v55, 0.0  ;;  %v5074_v49 = vadd.f32 %v8381_v44, %v5073_v60 }
 0x35e   : > { %5300 = vst.msk [vmem:[%s8387_s30 + $0x30] sm:$0xff] %vm5293_vm4, %v5251_v40  ;;  %v5252_v38 = vmax.f32 %v5082_v63, 0.0 }
 0x35f   : > { %5298 = vst.msk [vmem:[%s8387_s30 + $0x20] sm:$0xff] %vm5293_vm4, %v5249_v27  ;;  %v5250_v61 = vmax.f32 %v5074_v49, 0.0 }
 0x360   : > { %5301 = vst.msk [vmem:[%s8387_s30 + $0x38] sm:$0xff] %vm5293_vm4, %v5252_v38 }
 0x361   : > { %5299 = vst.msk [vmem:[%s8387_s30 + $0x28] sm:$0xff] %vm5293_vm4, %v5250_v61  ;;  %v6494_v18 = vpop.f32.mrb[56].mxu1 }
 0x362   : > { %v5095_v34 = vadd.f32 %v6494_v18, %v8381_v44  ;;  %v5086_v62 = vpop.f32.mrb[57].mxu1 }
 0x363   : > { %v5087_v12 = vadd.f32 %v8381_v44, %v5086_v62  ;;  %v6495_v57 = vpop.f32.mrb[58].mxu1 }
 0x364   : > { %v5255_v20 = vmax.f32 %v5095_v34, 0.0  ;;  %v5098_v31 = vadd.f32 %v6495_v57, %v8381_v44  ;;  %v5089_v9 = vpop.f32.mrb[59].mxu1 }
 0x365   : > { %v5253_v25 = vmax.f32 %v5087_v12, 0.0  ;;  %v5090_v28 = vadd.f32 %v8381_v44, %v5089_v9 }
 0x366   : > { %5304 = vst.msk [vmem:[%s8387_s30 + $0x50] sm:$0xff] %vm5293_vm4, %v5255_v20  ;;  %v5256_v26 = vmax.f32 %v5098_v31, 0.0 }
 0x367   : > { %5302 = vst.msk [vmem:[%s8387_s30 + $0x40] sm:$0xff] %vm5293_vm4, %v5253_v25  ;;  %v5254_v32 = vmax.f32 %v5090_v28, 0.0 }
 0x368   : > { %5305 = vst.msk [vmem:[%s8387_s30 + $0x58] sm:$0xff] %vm5293_vm4, %v5256_v26 }
 0x369   : > { %5303 = vst.msk [vmem:[%s8387_s30 + $0x48] sm:$0xff] %vm5293_vm4, %v5254_v32  ;;  %v6498_v21 = vpop.f32.mrb[60].mxu1 }
 0x36a   : > { %v5111_v15 = vadd.f32 %v6498_v21, %v8381_v44  ;;  %v5102_v59 = vpop.f32.mrb[61].mxu1 }
 0x36b   : > { %v5103_v39 = vadd.f32 %v8381_v44, %v5102_v59  ;;  %v6499_v45 = vpop.f32.mrb[62].mxu1 }
 0x36c   : > { %v5259_v58 = vmax.f32 %v5111_v15, 0.0  ;;  %v5114_v54 = vadd.f32 %v6499_v45, %v8381_v44  ;;  %v5105_v24 = vpop.f32.mrb[63].mxu1 }
 0x36d   : > { %v5257_v42 = vmax.f32 %v5103_v39, 0.0  ;;  %v5106_v36 = vadd.f32 %v8381_v44, %v5105_v24 }
 0x36e   : > { %5308 = vst.msk [vmem:[%s8387_s30 + $0x70] sm:$0xff] %vm5293_vm4, %v5259_v58  ;;  %v5260_v35 = vmax.f32 %v5114_v54, 0.0 }
 0x36f   : > { %5306 = vst.msk [vmem:[%s8387_s30 + $0x60] sm:$0xff] %vm5293_vm4, %v5257_v42  ;;  %v5258_v46 = vmax.f32 %v5106_v36, 0.0 }
 0x370   : > { %5309 = vst.msk [vmem:[%s8387_s30 + $0x78] sm:$0xff] %vm5293_vm4, %v5260_v35 }
 0x371   : > { %5307 = vst.msk [vmem:[%s8387_s30 + $0x68] sm:$0xff] %vm5293_vm4, %v5258_v46  ;;  %v6502_v7 = vpop.f32.mrb[64].mxu1 }
 0x372   : > { %v5127_v11 = vadd.f32 %v6502_v7, %v8381_v44  ;;  %v5118_v4 = vpop.f32.mrb[65].mxu1 }
 0x373   : > { %v5119_v53 = vadd.f32 %v8381_v44, %v5118_v4  ;;  %v6503_v43 = vpop.f32.mrb[66].mxu1 }
 0x374   : > { %v5263_v14 = vmax.f32 %v5127_v11, 0.0  ;;  %v5130_v29 = vadd.f32 %v6503_v43, %v8381_v44  ;;  %v5121_v1 = vpop.f32.mrb[67].mxu1 }
 0x375   : > { %v5261_v17 = vmax.f32 %v5119_v53, 0.0  ;;  %v5122_v19 = vadd.f32 %v8381_v44, %v5121_v1 }
 0x376   : > { %5312 = vst.msk [vmem:[%s8387_s30 + $0x90] sm:$0xff] %vm5293_vm4, %v5263_v14  ;;  %v5264_v2 = vmax.f32 %v5130_v29, 0.0 }
 0x377   : > { %5310 = vst.msk [vmem:[%s8387_s30 + $0x80] sm:$0xff] %vm5293_vm4, %v5261_v17  ;;  %v5262_v10 = vmax.f32 %v5122_v19, 0.0 }
 0x378   : > { %5313 = vst.msk [vmem:[%s8387_s30 + $0x98] sm:$0xff] %vm5293_vm4, %v5264_v2 }
 0x379   : > { %5311 = vst.msk [vmem:[%s8387_s30 + $0x88] sm:$0xff] %vm5293_vm4, %v5262_v10  ;;  %v6506_v41 = vpop.f32.mrb[68].mxu1 }
 0x37a   : > { %v5143_v56 = vadd.f32 %v6506_v41, %v8381_v44  ;;  %v5134_v5 = vpop.f32.mrb[69].mxu1 }
 0x37b   : > { %v5135_v30 = vadd.f32 %v8381_v44, %v5134_v5  ;;  %v6507_v3 = vpop.f32.mrb[70].mxu1 }
 0x37c   : > { %v5267_v6 = vmax.f32 %v5143_v56, 0.0  ;;  %v5146_v37 = vadd.f32 %v6507_v3, %v8381_v44  ;;  %v5137_v8 = vpop.f32.mrb[71].mxu1 }
 0x37d   : > { %v5265_v13 = vmax.f32 %v5135_v30, 0.0  ;;  %v5138_v52 = vadd.f32 %v8381_v44, %v5137_v8 }
 0x37e   : > { %5316 = vst.msk [vmem:[%s8387_s30 + $0xb0] sm:$0xff] %vm5293_vm4, %v5267_v6  ;;  %v5268_v33 = vmax.f32 %v5146_v37, 0.0 }
 0x37f   : > { %5314 = vst.msk [vmem:[%s8387_s30 + $0xa0] sm:$0xff] %vm5293_vm4, %v5265_v13  ;;  %v5266_v0 = vmax.f32 %v5138_v52, 0.0 }
 0x380   : > { %5317 = vst.msk [vmem:[%s8387_s30 + $0xb8] sm:$0xff] %vm5293_vm4, %v5268_v33 }
 0x381   : > { %5315 = vst.msk [vmem:[%s8387_s30 + $0xa8] sm:$0xff] %vm5293_vm4, %v5266_v0  ;;  %v6510_v48 = vpop.f32.mrb[72].mxu1 }
 0x382   : > { %v5159_v51 = vadd.f32 %v6510_v48, %v8381_v44  ;;  %v5150_v16 = vpop.f32.mrb[73].mxu1 }
 0x383   : > { %v5151_v47 = vadd.f32 %v8381_v44, %v5150_v16  ;;  %v6511_v50 = vpop.f32.mrb[74].mxu1 }
 0x384   : > { %v5271_v23 = vmax.f32 %v5159_v51, 0.0  ;;  %v5162_v55 = vadd.f32 %v6511_v50, %v8381_v44  ;;  %v5153_v22 = vpop.f32.mrb[75].mxu1 }
 0x385   : > { %v5269_v40 = vmax.f32 %v5151_v47, 0.0  ;;  %v5154_v63 = vadd.f32 %v8381_v44, %v5153_v22 }
 0x386   : > { %5320 = vst.msk [vmem:[%s8387_s30 + $0xd0] sm:$0xff] %vm5293_vm4, %v5271_v23  ;;  %v5272_v60 = vmax.f32 %v5162_v55, 0.0 }
 0x387   : > { %5318 = vst.msk [vmem:[%s8387_s30 + $0xc0] sm:$0xff] %vm5293_vm4, %v5269_v40  ;;  %v5270_v27 = vmax.f32 %v5154_v63, 0.0 }
 0x388   : > { %5321 = vst.msk [vmem:[%s8387_s30 + $0xd8] sm:$0xff] %vm5293_vm4, %v5272_v60 }
 0x389   : > { %5319 = vst.msk [vmem:[%s8387_s30 + $0xc8] sm:$0xff] %vm5293_vm4, %v5270_v27  ;;  %v6514_v49 = vpop.f32.mrb[76].mxu1 }
 0x38a   : > { %v5175_v38 = vadd.f32 %v6514_v49, %v8381_v44  ;;  %v5166_v61 = vpop.f32.mrb[77].mxu1 }
 0x38b   : > { %v5167_v18 = vadd.f32 %v8381_v44, %v5166_v61  ;;  %v6515_v34 = vpop.f32.mrb[78].mxu1 }
 0x38c   : > { %v5275_v62 = vmax.f32 %v5175_v38, 0.0  ;;  %v5178_v12 = vadd.f32 %v6515_v34, %v8381_v44  ;;  %v5169_v57 = vpop.f32.mrb[79].mxu1 }
 0x38d   : > { %v5273_v20 = vmax.f32 %v5167_v18, 0.0  ;;  %v5170_v31 = vadd.f32 %v8381_v44, %v5169_v57 }
 0x38e   : > { %5324 = vst.msk [vmem:[%s8387_s30 + $0xf0] sm:$0xff] %vm5293_vm4, %v5275_v62  ;;  %v5276_v9 = vmax.f32 %v5178_v12, 0.0 }
 0x38f   : > { %5322 = vst.msk [vmem:[%s8387_s30 + $0xe0] sm:$0xff] %vm5293_vm4, %v5273_v20  ;;  %v5274_v25 = vmax.f32 %v5170_v31, 0.0 }
 0x390   : > { %5325 = vst.msk [vmem:[%s8387_s30 + $0xf8] sm:$0xff] %vm5293_vm4, %v5276_v9 }
 0x391   : > { %5323 = vst.msk [vmem:[%s8387_s30 + $0xe8] sm:$0xff] %vm5293_vm4, %v5274_v25  ;;  %v6518_v28 = vpop.f32.mrb[80].mxu1 }
 0x392   : > { %v5191_v26 = vadd.f32 %v6518_v28, %v8381_v44  ;;  %v5182_v32 = vpop.f32.mrb[81].mxu1 }
 0x393   : > { %v5183_v21 = vadd.f32 %v8381_v44, %v5182_v32  ;;  %v6519_v15 = vpop.f32.mrb[82].mxu1 }
 0x394   : > { %v5279_v59 = vmax.f32 %v5191_v26, 0.0  ;;  %v5194_v39 = vadd.f32 %v6519_v15, %v8381_v44  ;;  %v5185_v45 = vpop.f32.mrb[83].mxu1 }
 0x395   : > { %v5277_v58 = vmax.f32 %v5183_v21, 0.0  ;;  %v5186_v54 = vadd.f32 %v8381_v44, %v5185_v45 }
 0x396   : > { %5328 = vst.msk [vmem:[%s8387_s30 + $0x110] sm:$0xff] %vm5293_vm4, %v5279_v59  ;;  %v5280_v24 = vmax.f32 %v5194_v39, 0.0 }
 0x397   : > { %5326 = vst.msk [vmem:[%s8387_s30 + $0x100] sm:$0xff] %vm5293_vm4, %v5277_v58  ;;  %v5278_v42 = vmax.f32 %v5186_v54, 0.0 }
 0x398   : > { %5329 = vst.msk [vmem:[%s8387_s30 + $0x118] sm:$0xff] %vm5293_vm4, %v5280_v24 }
 0x399   : > { %5327 = vst.msk [vmem:[%s8387_s30 + $0x108] sm:$0xff] %vm5293_vm4, %v5278_v42  ;;  %v6522_v36 = vpop.f32.mrb[84].mxu1 }
 0x39a   : > { %v5207_v35 = vadd.f32 %v6522_v36, %v8381_v44  ;;  %v5198_v46 = vpop.f32.mrb[85].mxu1 }
 0x39b   : > { %v5199_v7 = vadd.f32 %v8381_v44, %v5198_v46  ;;  %v6523_v11 = vpop.f32.mrb[86].mxu1 }
 0x39c   : > { %v5283_v4 = vmax.f32 %v5207_v35, 0.0  ;;  %v5210_v53 = vadd.f32 %v6523_v11, %v8381_v44  ;;  %v5201_v43 = vpop.f32.mrb[87].mxu1 }
 0x39d   : > { %v5281_v14 = vmax.f32 %v5199_v7, 0.0  ;;  %v5202_v29 = vadd.f32 %v8381_v44, %v5201_v43 }
 0x39e   : > { %5332 = vst.msk [vmem:[%s8387_s30 + $0x130] sm:$0xff] %vm5293_vm4, %v5283_v4  ;;  %v5284_v1 = vmax.f32 %v5210_v53, 0.0 }
 0x39f   : > { %5330 = vst.msk [vmem:[%s8387_s30 + $0x120] sm:$0xff] %vm5293_vm4, %v5281_v14  ;;  %v5282_v17 = vmax.f32 %v5202_v29, 0.0 }
 0x3a0   : > { %5333 = vst.msk [vmem:[%s8387_s30 + $0x138] sm:$0xff] %vm5293_vm4, %v5284_v1 }
 0x3a1   : > { %5331 = vst.msk [vmem:[%s8387_s30 + $0x128] sm:$0xff] %vm5293_vm4, %v5282_v17  ;;  %v6526_v19 = vpop.f32.mrb[88].mxu1 }
 0x3a2   : > { %v5223_v2 = vadd.f32 %v6526_v19, %v8381_v44  ;;  %v5214_v10 = vpop.f32.mrb[89].mxu1 }
 0x3a3   : > { %v5215_v41 = vadd.f32 %v8381_v44, %v5214_v10  ;;  %v6527_v56 = vpop.f32.mrb[90].mxu1 }
 0x3a4   : > { %v5287_v5 = vmax.f32 %v5223_v2, 0.0  ;;  %v5226_v30 = vadd.f32 %v6527_v56, %v8381_v44  ;;  %v5217_v3 = vpop.f32.mrb[91].mxu1 }
 0x3a5   : > { %v5285_v6 = vmax.f32 %v5215_v41, 0.0  ;;  %v5218_v37 = vadd.f32 %v8381_v44, %v5217_v3 }
 0x3a6   : > { %5336 = vst.msk [vmem:[%s8387_s30 + $0x150] sm:$0xff] %vm5293_vm4, %v5287_v5  ;;  %v5288_v8 = vmax.f32 %v5226_v30, 0.0 }
 0x3a7   : > { %5334 = vst.msk [vmem:[%s8387_s30 + $0x140] sm:$0xff] %vm5293_vm4, %v5285_v6  ;;  %v5286_v13 = vmax.f32 %v5218_v37, 0.0 }
 0x3a8   : > { %5337 = vst.msk [vmem:[%s8387_s30 + $0x158] sm:$0xff] %vm5293_vm4, %v5288_v8 }
 0x3a9   : > { %5335 = vst.msk [vmem:[%s8387_s30 + $0x148] sm:$0xff] %vm5293_vm4, %v5286_v13  ;;  %v6530_v52 = vpop.f32.mrb[92].mxu1 }
 0x3aa   : > { %v5239_v33 = vadd.f32 %v6530_v52, %v8381_v44  ;;  %v5230_v0 = vpop.f32.mrb[93].mxu1 }
 0x3ab   : > { %v5231_v48 = vadd.f32 %v8381_v44, %v5230_v0  ;;  %v6531_v51 = vpop.f32.mrb[94].mxu1 }
 0x3ac   : > { %v5291_v16 = vmax.f32 %v5239_v33, 0.0  ;;  %v5242_v47 = vadd.f32 %v6531_v51, %v8381_v44  ;;  %v5233_v50 = vpop.f32.mrb[95].mxu1 }
 0x3ad   : > { %v5289_v23 = vmax.f32 %v5231_v48, 0.0  ;;  %v5234_v55 = vadd.f32 %v8381_v44, %v5233_v50 }
 0x3ae   : > { %5340 = vst.msk [vmem:[%s8387_s30 + $0x170] sm:$0xff] %vm5293_vm4, %v5291_v16  ;;  %v5292_v22 = vmax.f32 %v5242_v47, 0.0 }
 0x3af   : > { %5338 = vst.msk [vmem:[%s8387_s30 + $0x160] sm:$0xff] %vm5293_vm4, %v5289_v23  ;;  %v5290_v40 = vmax.f32 %v5234_v55, 0.0 }
 0x3b0   : > { %5341 = vst.msk [vmem:[%s8387_s30 + $0x178] sm:$0xff] %vm5293_vm4, %v5292_v22 }
 0x3b1   : > { %5339 = vst.msk [vmem:[%s8387_s30 + $0x168] sm:$0xff] %vm5293_vm4, %v5290_v40 }
 0x3b2 PF: > { %s15_s18 = sadd.s32 1, %s7087_s18  }
 0x3b3   : > { %p12_p4 = scmp.ge.s32.totalorder %s15_s18, 4  }
 0x3b5   :  { %14 = sbr.rel (!%p12_p4) target bundleno = 1 (0x1), region = 78 }

</bundles_post_ra>
